<compile_context>
chip_gen: v5e
topology: v5e:2x2
jax: 0.10.0
libtpu: 0.0.40
codegen_flags: <defaults>
</compile_context>

<pallas_src>
import math
import functools

import jax
import jax.numpy as jnp
from jax.experimental import pallas as pl
from jax.experimental.pallas import tpu as pltpu


def _round_up(x, m):
    return ((x + m - 1) // m) * m


@functools.lru_cache(maxsize=1)
def _vmem_limit_bytes():
    # Defaults are 16 MiB (v5e) / 32 MiB (v6e, v7x) scoped; raise with headroom.
    try:
        return int(pltpu.get_tpu_info().vmem_capacity_bytes * 3 // 4)
    except Exception:
        return 48 * 1024 * 1024


# ----------------------------------------------------------------------------
# Pallas kernels
# ----------------------------------------------------------------------------
def edge_kernel(xq_ref, xkv_ref, wq_ref, wkv_ref, aatt_ref, amsg_ref, hsum_ref,
                out_ref, *, num_types, num_rel, in_dim, blk, out_w):
    f32 = jnp.float32
    bf16 = jnp.bfloat16
    xq = xq_ref[...]                                     # (TE, in+T)      bf16
    xkv = xkv_ref[...]                                   # (TE, 2in+T+R)   bf16

    # Two fused wide matmuls; biases + RTE linear are folded into the weight slabs.
    qw = jnp.dot(xq, wq_ref[...], preferred_element_type=f32)     # (TE, T*blk)
    kvw = jnp.dot(xkv, wkv_ref[...], preferred_element_type=f32)  # (TE, 2T*blk)

    toh = xq[:, in_dim:in_dim + num_types].astype(f32)            # (TE, T)
    soh = xkv[:, 2 * in_dim:2 * in_dim + num_types].astype(f32)   # (TE, T)
    roh = xkv[:, 2 * in_dim + num_types:
              2 * in_dim + num_types + num_rel].astype(f32)       # (TE, R)

    T = num_types
    # Per-type selection: 128-aligned lane slices + masked VPU adds.
    q = toh[:, 0:1] * qw[:, 0:blk]
    k = soh[:, 0:1] * kvw[:, 0:blk]
    v = soh[:, 0:1] * kvw[:, T * blk:(T + 1) * blk]
    for t in range(1, T):
        q = q + toh[:, t:t + 1] * qw[:, t * blk:(t + 1) * blk]
        k = k + soh[:, t:t + 1] * kvw[:, t * blk:(t + 1) * blk]
        v = v + soh[:, t:t + 1] * kvw[:, (T + t) * blk:(T + t + 1) * blk]

    # Fused relation-specific per-head transforms (rel_pri / sqrt(dk) is pre-folded
    # into the Aatt slab, so no separate prior matmul / multiply is needed).
    kw = jnp.dot(k.astype(bf16), aatt_ref[...], preferred_element_type=f32)  # (TE, R*blk)
    vw = jnp.dot(v.astype(bf16), amsg_ref[...], preferred_element_type=f32)  # (TE, R*out_w)
    krel = roh[:, 0:1] * kw[:, 0:blk]
    msg = roh[:, 0:1] * vw[:, 0:out_w]           # msg lands in lanes [0, out_dim)
    for r in range(1, num_rel):
        krel = krel + roh[:, r:r + 1] * kw[:, r * blk:(r + 1) * blk]
        msg = msg + roh[:, r:r + 1] * vw[:, r * out_w:(r + 1) * out_w]

    # Per-head attention logits: 128-wide head-sum matmul, added only into the
    # final 128-lane block of the packed [msg | att] output (f32 for accuracy).
    att = jnp.dot(q * krel, hsum_ref[...], preferred_element_type=f32)       # (TE, 128)
    lo = out_w - 128
    if lo > 0:
        out_ref[:, :lo] = msg[:, :lo]
        out_ref[:, lo:] = msg[:, lo:] + att
    else:
        out_ref[...] = msg + att


def update_kernel(aggr_ref, xin_ref, noh_ref, wa_ref, tbl_ref, out_ref,
                  *, num_types, out_dim, blk, eps):
    f32 = jnp.float32
    x = jax.nn.gelu(aggr_ref[...], approximate=False)    # exact erf == F.gelu
    noh = noh_ref[...]                                   # (TN, T) f32

    # Fused type-specific output linear (bf16 MXU) + small per-type table matmul.
    tw = jnp.dot(x.astype(jnp.bfloat16), wa_ref[...],
                 preferred_element_type=f32)             # (TN, T*blk)
    tbl = jnp.dot(noh, tbl_ref[...], preferred_element_type=f32)  # (TN, 4*blk)

    trans = tbl[:, 0:blk]                                # per-type bias (padded lanes 0)
    for t in range(num_types):
        trans = trans + noh[:, t:t + 1] * tw[:, t * blk:(t + 1) * blk]
    gam = tbl[:, blk:2 * blk]
    bet = tbl[:, 2 * blk:3 * blk]
    alpha = tbl[:, 3 * blk:4 * blk]                      # sigmoid(skip), lane-replicated

    h = trans * alpha + xin_ref[...] * (1.0 - alpha)     # padded lanes stay exactly 0
    # LayerNorm over the real out_dim lanes via sums (padded lanes contribute 0).
    s1 = jnp.sum(h, axis=-1, keepdims=True)
    s2 = jnp.sum(h * h, axis=-1, keepdims=True)
    mu = s1 / out_dim
    var = s2 / out_dim - mu * mu
    out_ref[...] = (h - mu) * jax.lax.rsqrt(var + eps) * gam + bet


# ----------------------------------------------------------------------------
# Fused / lane-padded weight preparation (hoist: call ONCE, reuse every forward)
# ----------------------------------------------------------------------------
def _prep_edge_weights(params, n_heads):
    f32 = jnp.float32
    Wq, bq = params['Wq'], params['bq']          # (T, in, out), (T, out)
    Wk, bk = params['Wk'], params['bk']
    Wv, bv = params['Wv'], params['bv']
    Wrte, brte = params['Wrte'], params['brte']  # (in, in), (1, in)
    rel_att, rel_msg, rel_pri = params['rel_att'], params['rel_msg'], params['rel_pri']
    T, in_dim, out_dim = Wq.shape
    R, H, dk, _ = rel_att.shape
    assert out_dim == H * dk

    BLK = _round_up(out_dim, 128)                # per-type / per-relation block width
    OUT_W = _round_up(out_dim + H, 128)          # packed [msg | att] output width
    if out_dim >= OUT_W - 128:
        ATT_OFF = out_dim                        # att lanes sit in the final 128 block
    else:
        ATT_OFF = _round_up(out_dim, 128)
        OUT_W = ATT_OFF + 128
    assert ATT_OFF >= out_dim and ATT_OFF + H <= OUT_W and ATT_OFF >= OUT_W - 128

    def per_type_blocks(W):                      # (T, fi, out) -> (fi, T*BLK)
        Wp = jnp.pad(W, ((0, 0), (0, 0), (0, BLK - out_dim)))
        return jnp.transpose(Wp, (1, 0, 2)).reshape(W.shape[1], T * BLK)

    def bias_rows(b):                            # (T, out) -> (T, T*BLK), row t in block t
        bp = jnp.pad(b, ((0, 0), (0, BLK - out_dim)))
        return jnp.einsum('ts,tb->tsb', jnp.eye(T, dtype=bp.dtype), bp).reshape(T, T * BLK)

    # Q slab: input [x_tgt | toh]
    Wq_cat = jnp.concatenate([per_type_blocks(Wq), bias_rows(bq)], axis=0)
    # K|V slab: input [x_src | rte | soh | roh]
    Wkv_x = jnp.concatenate([per_type_blocks(Wk), per_type_blocks(Wv)], axis=1)
    Wrte_kv = Wrte @ Wkv_x
    bk_eff = bk + jnp.einsum('i,tio->to', brte[0], Wk)
    bv_eff = bv + jnp.einsum('i,tio->to', brte[0], Wv)
    bias_kv = jnp.concatenate([bias_rows(bk_eff), bias_rows(bv_eff)], axis=1)
    zeros_r = jnp.zeros((R, 2 * T * BLK), f32)   # roh lanes contribute nothing here
    Wkv_cat = jnp.concatenate([Wkv_x, Wrte_kv, bias_kv, zeros_r], axis=0)

    # Block-diagonal per-head relation transforms.
    eyeH = jnp.eye(H, dtype=f32)

    def blockdiag(rel):                          # (R, H, dk, dk) -> (R, out, out)
        return jnp.einsum('rhij,hg->rhigj', rel, eyeH).reshape(R, out_dim, out_dim)

    rel_att_s = rel_att * (rel_pri / math.sqrt(dk))[:, :, None, None]   # prior pre-folded
    Aatt = jnp.pad(blockdiag(rel_att_s), ((0, 0), (0, BLK - out_dim), (0, BLK - out_dim)))
    Aatt = jnp.transpose(Aatt, (1, 0, 2)).reshape(BLK, R * BLK)
    Amsg = jnp.pad(blockdiag(rel_msg), ((0, 0), (0, BLK - out_dim), (0, OUT_W - out_dim)))
    Amsg = jnp.transpose(Amsg, (1, 0, 2)).reshape(BLK, R * OUT_W)

    # Head-sum matrix, only 128 lanes wide; head h column sits at ATT_OFF - (OUT_W-128) + h.
    col0 = ATT_OFF - (OUT_W - 128)
    hs_base = jnp.kron(jnp.eye(H, dtype=f32), jnp.ones((dk, 1), f32))   # (out, H)
    hsum = jnp.pad(hs_base, ((0, BLK - out_dim), (col0, 128 - col0 - H)))

    bf16 = jnp.bfloat16
    return dict(Wq=Wq_cat.astype(bf16), Wkv=Wkv_cat.astype(bf16),
                Aatt=Aatt.astype(bf16), Amsg=Amsg.astype(bf16), hsum=hsum,
                BLK=BLK, OUT_W=OUT_W, ATT_OFF=ATT_OFF,
                T=T, R=R, H=H, in_dim=in_dim, out_dim=out_dim)


def _prep_node_weights(params):
    Wa, ba = params['Wa'], params['ba']          # (T, out, out), (T, out)
    gamma, beta, skip = params['gamma'], params['beta'], params['skip']
    T, out_dim, _ = Wa.shape
    BLK = _round_up(out_dim, 128)
    Wa_pad = jnp.pad(Wa, ((0, 0), (0, 0), (0, BLK - out_dim)))
    Wa_fused = jnp.transpose(Wa_pad, (1, 0, 2)).reshape(out_dim, T * BLK).astype(jnp.bfloat16)
    # Per-type table: [bias | gamma | beta | sigmoid(skip) replicated] at 128-aligned blocks.
    tbl = jnp.concatenate([
        jnp.pad(ba, ((0, 0), (0, BLK - out_dim))),
        jnp.pad(gamma, ((0, 0), (0, BLK - out_dim))),
        jnp.pad(beta, ((0, 0), (0, BLK - out_dim))),
        jnp.broadcast_to(jax.nn.sigmoid(skip), (T, BLK)),
    ], axis=1)
    return dict(Wa=Wa_fused, tbl=tbl, BLK=BLK, out_dim=out_dim, T=T)


def prepare_fused_weights(params, n_heads):
    """Call once; pass the result to general_conv_forward on every step."""
    return dict(edge=_prep_edge_weights(params, n_heads),
                node=_prep_node_weights(params))


# ----------------------------------------------------------------------------
# pallas_call wrappers
# ----------------------------------------------------------------------------
def _const_spec(a, single_buffer):
    nd = a.ndim
    if single_buffer:
        # Grid-invariant weights: single-buffer to free VMEM (esp. on v7x's 64 MiB).
        return pl.BlockSpec(a.shape, lambda i, _nd=nd: (0,) * _nd,
                            pipeline_mode=pl.Buffered(1))
    return pl.BlockSpec(a.shape, lambda i, _nd=nd: (0,) * _nd)


def hgt_edge_pallas(xq, xkv, fw, *, tile_e):
    Epad = xq.shape[0]
    T, R, in_dim = fw['T'], fw['R'], fw['in_dim']
    BLK, OUT_W = fw['BLK'], fw['OUT_W']
    grid = (Epad // tile_e,)
    weights = (fw['Wq'], fw['Wkv'], fw['Aatt'], fw['Amsg'], fw['hsum'])
    kernel = functools.partial(edge_kernel, num_types=T, num_rel=R, in_dim=in_dim,
                               blk=BLK, out_w=OUT_W)

    def build(single_buffer):
        return pl.pallas_call(
            kernel,
            out_shape=jax.ShapeDtypeStruct((Epad, OUT_W), jnp.float32),
            grid_spec=pltpu.PrefetchScalarGridSpec(
                num_scalar_prefetch=0,
                grid=grid,
                in_specs=[pl.BlockSpec((tile_e, xq.shape[1]), lambda e: (e, 0)),
                          pl.BlockSpec((tile_e, xkv.shape[1]), lambda e: (e, 0))]
                         + [_const_spec(w, single_buffer) for w in weights],
                out_specs=pl.BlockSpec((tile_e, OUT_W), lambda e: (e, 0))),
            compiler_params=pltpu.CompilerParams(
                dimension_semantics=("parallel",),
                vmem_limit_bytes=_vmem_limit_bytes()),
        )
    try:
        return build(True)(xq, xkv, *weights)
    except Exception:          # fallback if this JAX rejects Buffered(1)
        return build(False)(xq, xkv, *weights)


def hgt_update_pallas(aggr, xin_pad, noh, nw, *, tile_n):
    Npad, out_dim = aggr.shape
    T = noh.shape[1]
    BLK = nw['BLK']
    grid = (Npad // tile_n,)
    weights = (nw['Wa'], nw['tbl'])
    kernel = functools.partial(update_kernel, num_types=T, out_dim=out_dim,
                               blk=BLK, eps=1e-5)

    def build(single_buffer):
        return pl.pallas_call(
            kernel,
            out_shape=jax.ShapeDtypeStruct((Npad, BLK), jnp.float32),   # lane-dense output
            grid_spec=pltpu.PrefetchScalarGridSpec(
                num_scalar_prefetch=0,
                grid=grid,
                in_specs=[pl.BlockSpec((tile_n, out_dim), lambda n: (n, 0)),
                          pl.BlockSpec((tile_n, BLK), lambda n: (n, 0)),
                          pl.BlockSpec((tile_n, T), lambda n: (n, 0))]
                         + [_const_spec(w, single_buffer) for w in weights],
                out_specs=pl.BlockSpec((tile_n, BLK), lambda n: (n, 0))),
            compiler_params=pltpu.CompilerParams(
                dimension_semantics=("parallel",),
                vmem_limit_bytes=_vmem_limit_bytes()),
        )
    try:
        return build(True)(aggr, xin_pad, noh, *weights)
    except Exception:
        return build(False)(aggr, xin_pad, noh, *weights)


# ----------------------------------------------------------------------------
# Parameters (deterministic init -- mirrors HGTConv.__init__ shapes)
# ----------------------------------------------------------------------------
def init_params(key, in_dim, out_dim, num_types, num_relations, n_heads, max_len=240):
    dk = out_dim // n_heads
    keys = jax.random.split(key, 8)

    def lin(k, fi, fo):
        kw, kb = jax.random.split(k)
        bound = 1.0 / math.sqrt(fi)
        return (jax.random.uniform(kw, (fi, fo), jnp.float32, -bound, bound),
                jax.random.uniform(kb, (fo,), jnp.float32, -bound, bound))

    def lin_stack(k, n, fi, fo):
        Ws, bs = [], []
        for kk in jax.random.split(k, n):
            W, b = lin(kk, fi, fo)
            Ws.append(W)
            bs.append(b)
        return jnp.stack(Ws), jnp.stack(bs)

    Wk_, bk_ = lin_stack(keys[0], num_types, in_dim, out_dim)
    Wq_, bq_ = lin_stack(keys[1], num_types, in_dim, out_dim)
    Wv_, bv_ = lin_stack(keys[2], num_types, in_dim, out_dim)
    Wa_, ba_ = lin_stack(keys[3], num_types, out_dim, out_dim)

    g = math.sqrt(6.0 / (dk + dk))   # glorot on (R, H, dk, dk)
    rel_att = jax.random.uniform(keys[4], (num_relations, n_heads, dk, dk), jnp.float32, -g, g)
    rel_msg = jax.random.uniform(keys[5], (num_relations, n_heads, dk, dk), jnp.float32, -g, g)
    rel_pri = jnp.ones((num_relations, n_heads), jnp.float32)
    skip = jnp.ones((num_types, 1), jnp.float32)
    gamma = jnp.ones((num_types, out_dim), jnp.float32)
    beta = jnp.zeros((num_types, out_dim), jnp.float32)

    # RelTemporalEncoding sinusoid table (n_hid = in_dim)
    pos = jnp.arange(max_len, dtype=jnp.float32)[:, None]
    div = jnp.exp(jnp.arange(0, in_dim, 2, dtype=jnp.float32) * (-math.log(10000.0) / in_dim))
    s = jnp.sin(pos * div) / math.sqrt(in_dim)
    c = jnp.cos(pos * div) / math.sqrt(in_dim)
    rte_table = jnp.stack([s, c], axis=-1).reshape(max_len, in_dim)
    Wrte, brte = lin(keys[6], in_dim, in_dim)

    return dict(Wq=Wq_, bq=bq_, Wk=Wk_, bk=bk_, Wv=Wv_, bv=bv_, Wa=Wa_, ba=ba_,
                rel_att=rel_att, rel_msg=rel_msg, rel_pri=rel_pri,
                skip=skip, gamma=gamma, beta=beta,
                rte_table=rte_table, Wrte=Wrte, brte=brte.reshape(1, in_dim))


# ----------------------------------------------------------------------------
# GeneralConv('hgt') forward
# ----------------------------------------------------------------------------
def _pad_rows(a, mult):
    p = (-a.shape[0]) % mult
    if p:
        a = jnp.pad(a, ((0, p),) + ((0, 0),) * (a.ndim - 1))
    return a


def _pick_tile(n_rows, max_tile, mult=16, min_steps=2):
    """Row tile: multiple of 16 (bf16 sublane pack), clamped to the padded problem
    size, and small enough that the 'parallel' grid has >= min_steps steps so both
    v7x TensorCores get work."""
    n_pad = _round_up(max(int(n_rows), 1), mult)
    tile = min(_round_up(int(max_tile), mult), n_pad)
    if n_pad > mult and -(-n_pad // tile) < min_steps:
        tile = max(mult, _round_up(-(-n_pad // min_steps), mult))
    return tile


def general_conv_forward(params, x, node_type, edge_index, edge_type, edge_time,
                         *, n_heads, fused=None, tile_e=256, tile_n=256):
    # tile defaults sized for v7x's 64 MiB VMEM; v5e/v6e (128 MiB) can raise to 512.
    N, in_dim = x.shape
    E = edge_index.shape[1]
    if fused is None:                      # hoist this for repeated forward calls
        fused = prepare_fused_weights(params, n_heads)
    ef, nf = fused['edge'], fused['node']
    T, R, out_dim, H = ef['T'], ef['R'], ef['out_dim'], ef['H']
    dk = out_dim // n_heads
    assert in_dim == ef['in_dim']
    assert in_dim == out_dim, "HGT skip connection requires in_dim == out_dim"
    src, tgt = edge_index[0], edge_index[1]

    # ---- per-edge gathers + concatenated bf16 matmul inputs (glue; XLA gathers) ----
    toh = jax.nn.one_hot(node_type[tgt], T, dtype=jnp.float32)
    soh = jax.nn.one_hot(node_type[src], T, dtype=jnp.float32)
    roh = jax.nn.one_hot(edge_type, R, dtype=jnp.float32)
    xq = jnp.concatenate([x[tgt], toh], axis=1).astype(jnp.bfloat16)
    xkv = jnp.concatenate([x[src], params['rte_table'][edge_time], soh, roh],
                          axis=1).astype(jnp.bfloat16)

    tile_e = _pick_tile(E, tile_e)
    edge_out = hgt_edge_pallas(_pad_rows(xq, tile_e), _pad_rows(xkv, tile_e),
                               ef, tile_e=tile_e)
    msg = edge_out[:E, :out_dim]
    att_raw = edge_out[:E, ef['ATT_OFF']:ef['ATT_OFF'] + H]

    # ---- segment softmax over target node id + scatter-add aggregation ----
    # TODO(synk): move to a target-sorted Pallas kernel (scalar-prefetch offsets),
    #             fused with the edge kernel, to kill the extra HBM passes at large E.
    m = jax.ops.segment_max(att_raw, tgt, num_segments=N)
    ex = jnp.exp(att_raw - m[tgt])
    att = ex / jax.ops.segment_sum(ex, tgt, num_segments=N)[tgt]       # (E, H)
    res_edge = (msg.reshape(E, n_heads, dk) * att[..., None]).reshape(E, out_dim)
    aggr = jax.ops.segment_sum(res_edge, tgt, num_segments=N)

    # ---- node update kernel (lane-dense BLK-wide output, sliced here) ----
    noh = jax.nn.one_hot(node_type, T, dtype=jnp.float32)
    xin = jnp.pad(x, ((0, 0), (0, nf['BLK'] - out_dim)))
    tile_n = _pick_tile(N, tile_n)
    out = hgt_update_pallas(_pad_rows(aggr, tile_n), _pad_rows(xin, tile_n),
                            _pad_rows(noh, tile_n), nf, tile_n=tile_n)
    return att, out[:N, :out_dim]


# ----------------------------------------------------------------------------
# Pure-JAX f32 reference (same math, no Pallas) for verification
# ----------------------------------------------------------------------------
def reference_forward(params, x, node_type, edge_index, edge_type, edge_time, *, n_heads):
    N, in_dim = x.shape
    E = edge_index.shape[1]
    out_dim = params['Wq'].shape[2]
    dk = out_dim // n_heads
    src, tgt = edge_index[0], edge_index[1]
    st, tt = node_type[src], node_type[tgt]

    xt = x[tgt]
    xs = x[src] + params['rte_table'][edge_time] @ params['Wrte'] + params['brte'][0]
    q = jnp.einsum('ei,eio->eo', xt, params['Wq'][tt]) + params['bq'][tt]
    k = jnp.einsum('ei,eio->eo', xs, params['Wk'][st]) + params['bk'][st]
    v = jnp.einsum('ei,eio->eo', xs, params['Wv'][st]) + params['bv'][st]
    kh = k.reshape(E, n_heads, dk)
    vh = v.reshape(E, n_heads, dk)
    krel = jnp.einsum('ehd,ehdf->ehf', kh, params['rel_att'][edge_type])
    att_raw = (q.reshape(E, n_heads, dk) * krel).sum(-1) * params['rel_pri'][edge_type] / math.sqrt(dk)
    msg = jnp.einsum('ehd,ehdf->ehf', vh, params['rel_msg'][edge_type])

    m = jax.ops.segment_max(att_raw, tgt, num_segments=N)
    ex = jnp.exp(att_raw - m[tgt])
    att = ex / jax.ops.segment_sum(ex, tgt, num_segments=N)[tgt]
    aggr = jax.ops.segment_sum((msg * att[..., None]).reshape(E, out_dim), tgt, num_segments=N)

    g = jax.nn.gelu(aggr, approximate=False)
    trans = jnp.einsum('ni,nio->no', g, params['Wa'][node_type]) + params['ba'][node_type]
    alpha = jax.nn.sigmoid(params['skip'][node_type])          # (N, 1)
    h = trans * alpha + x * (1.0 - alpha)
    mu = h.mean(-1, keepdims=True)
    var = jnp.mean(jnp.square(h - mu), axis=-1, keepdims=True)
    out = (h - mu) / jnp.sqrt(var + 1e-5) * params['gamma'][node_type] + params['beta'][node_type]
    return att, out


# ----------------------------------------------------------------------------
if __name__ == "__main__":
    N, E = 24, 200
    in_hid = out_hid = 32
    num_types, num_relations, n_heads = 3, 2, 4

    key = jax.random.PRNGKey(0)
    kp, kx, kt, ks, kd, ke, ktime = jax.random.split(key, 7)
    params = init_params(kp, in_hid, out_hid, num_types, num_relations, n_heads)

    x = jax.random.normal(kx, (N, in_hid), jnp.float32)
    node_type = jax.random.randint(kt, (N,), 0, num_types, jnp.int32)
    src = jax.random.randint(ks, (E,), 0, N, jnp.int32)
    dst = jax.random.randint(kd, (E,), 0, N, jnp.int32)
    edge_index = jnp.stack([src, dst])                         # (2, E): [source; target]
    edge_type = jax.random.randint(ke, (E,), 0, num_relations, jnp.int32)
    edge_time = jax.random.randint(ktime, (E,), 0, 240, jnp.int32)

    att_ref, out_ref = reference_forward(params, x, node_type, edge_index, edge_type,
                                         edge_time, n_heads=n_heads)

    # Fused weight slabs built ONCE and reused across calls / tile configs.
    fused = prepare_fused_weights(params, n_heads)
    jax.block_until_ready(fused)

    # bf16 matmul operands (f32 accumulation) -> loosened tolerances vs the f32 reference.
    ATT_TOL, OUT_TOL = 2.5e-2, 7.5e-2

    # Default tiles (multi-step grid even at this toy size for v7x megacore).
    att, out = general_conv_forward(params, x, node_type, edge_index, edge_type,
                                    edge_time, n_heads=n_heads, fused=fused)
    jax.block_until_ready((att, out))
    assert jnp.allclose(att, att_ref, rtol=ATT_TOL, atol=ATT_TOL), "attention mismatch"
    assert jnp.allclose(out, out_ref, rtol=OUT_TOL, atol=OUT_TOL), "output mismatch"

    # Small explicit tiles: exercises multi-step grid + row padding/masking path.
    att2, out2 = general_conv_forward(params, x, node_type, edge_index, edge_type,
                                      edge_time, n_heads=n_heads, fused=fused,
                                      tile_e=64, tile_n=16)
    jax.block_until_ready((att2, out2))
    assert jnp.allclose(att2, att_ref, rtol=ATT_TOL, atol=ATT_TOL), "attention mismatch (tiled)"
    assert jnp.allclose(out2, out_ref, rtol=OUT_TOL, atol=OUT_TOL), "output mismatch (tiled)"

    print("KERNEL_OK")
</pallas_src>

<mosaic_0001>
module attributes {stable_mosaic.version = 11 : i64} {
  func.func @edge_kernel(%arg0: i32, %arg1: memref<112x35xbf16, #tpu.memory_space<vmem>>, %arg2: memref<112x69xbf16, #tpu.memory_space<vmem>>, %arg3: memref<35x384xbf16, #tpu.memory_space<vmem>>, %arg4: memref<69x768xbf16, #tpu.memory_space<vmem>>, %arg5: memref<128x256xbf16, #tpu.memory_space<vmem>>, %arg6: memref<128x256xbf16, #tpu.memory_space<vmem>>, %arg7: memref<128x128xf32, #tpu.memory_space<vmem>>, %arg8: memref<112x128xf32, #tpu.memory_space<vmem>>) attributes {dimension_semantics = [#tpu.dimension_semantics<parallel>], iteration_bounds = array<i64: 2>, scalar_prefetch = 0 : i64, scratch_operands = 0 : i64, tpu.core_type = #tpu.core_type<tc>, window_params = [{transform_indices = @transform_0, window_bounds = array<i64: 112, 35>}, {transform_indices = @transform_1, window_bounds = array<i64: 112, 69>}, {pipeline_mode = #tpu.pipeline_mode<synchronous>, transform_indices = @transform_2, window_bounds = array<i64: 35, 384>}, {pipeline_mode = #tpu.pipeline_mode<synchronous>, transform_indices = @transform_3, window_bounds = array<i64: 69, 768>}, {pipeline_mode = #tpu.pipeline_mode<synchronous>, transform_indices = @transform_4, window_bounds = array<i64: 128, 256>}, {pipeline_mode = #tpu.pipeline_mode<synchronous>, transform_indices = @transform_5, window_bounds = array<i64: 128, 256>}, {pipeline_mode = #tpu.pipeline_mode<synchronous>, transform_indices = @transform_6, window_bounds = array<i64: 128, 128>}, {transform_indices = @transform_7, window_bounds = array<i64: 112, 128>}]} {
    %c0 = arith.constant 0 : index
    %c0_0 = arith.constant 0 : index
    %0 = vector.load %arg1[%c0, %c0_0] : memref<112x35xbf16, #tpu.memory_space<vmem>>, vector<112x35xbf16>
    %c0_1 = arith.constant 0 : index
    %c0_2 = arith.constant 0 : index
    %1 = vector.load %arg2[%c0_1, %c0_2] : memref<112x69xbf16, #tpu.memory_space<vmem>>, vector<112x69xbf16>
    %c0_3 = arith.constant 0 : index
    %c0_4 = arith.constant 0 : index
    %2 = vector.load %arg3[%c0_3, %c0_4] : memref<35x384xbf16, #tpu.memory_space<vmem>>, vector<35x384xbf16>
    %cst = arith.constant dense<0.000000e+00> : vector<112x384xf32>
    %3 = tpu.matmul %0, %2, %cst {dimension_numbers = #tpu.dot_dimension_numbers<[1], [0], [0], [1], [0, 0, 1, 1], [], []>} : vector<112x35xbf16>, vector<35x384xbf16>, vector<112x384xf32> -> vector<112x384xf32>
    %c0_5 = arith.constant 0 : index
    %c0_6 = arith.constant 0 : index
    %4 = vector.load %arg4[%c0_5, %c0_6] : memref<69x768xbf16, #tpu.memory_space<vmem>>, vector<69x768xbf16>
    %cst_7 = arith.constant dense<0.000000e+00> : vector<112x768xf32>
    %5 = tpu.matmul %1, %4, %cst_7 {dimension_numbers = #tpu.dot_dimension_numbers<[1], [0], [0], [1], [0, 0, 1, 1], [], []>} : vector<112x69xbf16>, vector<69x768xbf16>, vector<112x768xf32> -> vector<112x768xf32>
    %6 = vector.extract_strided_slice %0 {offsets = [0, 32], sizes = [112, 3], strides = [1, 1]} : vector<112x35xbf16> to vector<112x3xbf16>
    %7 = arith.extf %6 : vector<112x3xbf16> to vector<112x3xf32>
    %8 = vector.extract_strided_slice %1 {offsets = [0, 64], sizes = [112, 3], strides = [1, 1]} : vector<112x69xbf16> to vector<112x3xbf16>
    %9 = arith.extf %8 : vector<112x3xbf16> to vector<112x3xf32>
    %10 = vector.extract_strided_slice %1 {offsets = [0, 67], sizes = [112, 2], strides = [1, 1]} : vector<112x69xbf16> to vector<112x2xbf16>
    %11 = arith.extf %10 : vector<112x2xbf16> to vector<112x2xf32>
    %12 = vector.extract_strided_slice %7 {offsets = [0, 0], sizes = [112, 1], strides = [1, 1]} : vector<112x3xf32> to vector<112x1xf32>
    %13 = vector.extract_strided_slice %3 {offsets = [0, 0], sizes = [112, 128], strides = [1, 1]} : vector<112x384xf32> to vector<112x128xf32>
    %14 = vector.broadcast %12 : vector<112x1xf32> to vector<112x128xf32>
    %15 = arith.mulf %14, %13 : vector<112x128xf32>
    %16 = vector.extract_strided_slice %9 {offsets = [0, 0], sizes = [112, 1], strides = [1, 1]} : vector<112x3xf32> to vector<112x1xf32>
    %17 = vector.extract_strided_slice %5 {offsets = [0, 0], sizes = [112, 128], strides = [1, 1]} : vector<112x768xf32> to vector<112x128xf32>
    %18 = vector.broadcast %16 : vector<112x1xf32> to vector<112x128xf32>
    %19 = arith.mulf %18, %17 : vector<112x128xf32>
    %20 = vector.extract_strided_slice %9 {offsets = [0, 0], sizes = [112, 1], strides = [1, 1]} : vector<112x3xf32> to vector<112x1xf32>
    %21 = vector.extract_strided_slice %5 {offsets = [0, 384], sizes = [112, 128], strides = [1, 1]} : vector<112x768xf32> to vector<112x128xf32>
    %22 = vector.broadcast %20 : vector<112x1xf32> to vector<112x128xf32>
    %23 = arith.mulf %22, %21 : vector<112x128xf32>
    %24 = vector.extract_strided_slice %7 {offsets = [0, 1], sizes = [112, 1], strides = [1, 1]} : vector<112x3xf32> to vector<112x1xf32>
    %25 = vector.extract_strided_slice %3 {offsets = [0, 128], sizes = [112, 128], strides = [1, 1]} : vector<112x384xf32> to vector<112x128xf32>
    %26 = vector.broadcast %24 : vector<112x1xf32> to vector<112x128xf32>
    %27 = arith.mulf %26, %25 : vector<112x128xf32>
    %28 = arith.addf %15, %27 : vector<112x128xf32>
    %29 = vector.extract_strided_slice %9 {offsets = [0, 1], sizes = [112, 1], strides = [1, 1]} : vector<112x3xf32> to vector<112x1xf32>
    %30 = vector.extract_strided_slice %5 {offsets = [0, 128], sizes = [112, 128], strides = [1, 1]} : vector<112x768xf32> to vector<112x128xf32>
    %31 = vector.broadcast %29 : vector<112x1xf32> to vector<112x128xf32>
    %32 = arith.mulf %31, %30 : vector<112x128xf32>
    %33 = arith.addf %19, %32 : vector<112x128xf32>
    %34 = vector.extract_strided_slice %9 {offsets = [0, 1], sizes = [112, 1], strides = [1, 1]} : vector<112x3xf32> to vector<112x1xf32>
    %35 = vector.extract_strided_slice %5 {offsets = [0, 512], sizes = [112, 128], strides = [1, 1]} : vector<112x768xf32> to vector<112x128xf32>
    %36 = vector.broadcast %34 : vector<112x1xf32> to vector<112x128xf32>
    %37 = arith.mulf %36, %35 : vector<112x128xf32>
    %38 = arith.addf %23, %37 : vector<112x128xf32>
    %39 = vector.extract_strided_slice %7 {offsets = [0, 2], sizes = [112, 1], strides = [1, 1]} : vector<112x3xf32> to vector<112x1xf32>
    %40 = vector.extract_strided_slice %3 {offsets = [0, 256], sizes = [112, 128], strides = [1, 1]} : vector<112x384xf32> to vector<112x128xf32>
    %41 = vector.broadcast %39 : vector<112x1xf32> to vector<112x128xf32>
    %42 = arith.mulf %41, %40 : vector<112x128xf32>
    %43 = arith.addf %28, %42 : vector<112x128xf32>
    %44 = vector.extract_strided_slice %9 {offsets = [0, 2], sizes = [112, 1], strides = [1, 1]} : vector<112x3xf32> to vector<112x1xf32>
    %45 = vector.extract_strided_slice %5 {offsets = [0, 256], sizes = [112, 128], strides = [1, 1]} : vector<112x768xf32> to vector<112x128xf32>
    %46 = vector.broadcast %44 : vector<112x1xf32> to vector<112x128xf32>
    %47 = arith.mulf %46, %45 : vector<112x128xf32>
    %48 = arith.addf %33, %47 : vector<112x128xf32>
    %49 = vector.extract_strided_slice %9 {offsets = [0, 2], sizes = [112, 1], strides = [1, 1]} : vector<112x3xf32> to vector<112x1xf32>
    %50 = vector.extract_strided_slice %5 {offsets = [0, 640], sizes = [112, 128], strides = [1, 1]} : vector<112x768xf32> to vector<112x128xf32>
    %51 = vector.broadcast %49 : vector<112x1xf32> to vector<112x128xf32>
    %52 = arith.mulf %51, %50 : vector<112x128xf32>
    %53 = arith.addf %38, %52 : vector<112x128xf32>
    %54 = arith.truncf %48 : vector<112x128xf32> to vector<112x128xbf16>
    %c0_8 = arith.constant 0 : index
    %c0_9 = arith.constant 0 : index
    %55 = vector.load %arg5[%c0_8, %c0_9] : memref<128x256xbf16, #tpu.memory_space<vmem>>, vector<128x256xbf16>
    %cst_10 = arith.constant dense<0.000000e+00> : vector<112x256xf32>
    %56 = tpu.matmul %54, %55, %cst_10 {dimension_numbers = #tpu.dot_dimension_numbers<[1], [0], [0], [1], [0, 0, 1, 1], [], []>} : vector<112x128xbf16>, vector<128x256xbf16>, vector<112x256xf32> -> vector<112x256xf32>
    %57 = arith.truncf %53 : vector<112x128xf32> to vector<112x128xbf16>
    %c0_11 = arith.constant 0 : index
    %c0_12 = arith.constant 0 : index
    %58 = vector.load %arg6[%c0_11, %c0_12] : memref<128x256xbf16, #tpu.memory_space<vmem>>, vector<128x256xbf16>
    %cst_13 = arith.constant dense<0.000000e+00> : vector<112x256xf32>
    %59 = tpu.matmul %57, %58, %cst_13 {dimension_numbers = #tpu.dot_dimension_numbers<[1], [0], [0], [1], [0, 0, 1, 1], [], []>} : vector<112x128xbf16>, vector<128x256xbf16>, vector<112x256xf32> -> vector<112x256xf32>
    %60 = vector.extract_strided_slice %11 {offsets = [0, 0], sizes = [112, 1], strides = [1, 1]} : vector<112x2xf32> to vector<112x1xf32>
    %61 = vector.extract_strided_slice %56 {offsets = [0, 0], sizes = [112, 128], strides = [1, 1]} : vector<112x256xf32> to vector<112x128xf32>
    %62 = vector.broadcast %60 : vector<112x1xf32> to vector<112x128xf32>
    %63 = arith.mulf %62, %61 : vector<112x128xf32>
    %64 = vector.extract_strided_slice %11 {offsets = [0, 0], sizes = [112, 1], strides = [1, 1]} : vector<112x2xf32> to vector<112x1xf32>
    %65 = vector.extract_strided_slice %59 {offsets = [0, 0], sizes = [112, 128], strides = [1, 1]} : vector<112x256xf32> to vector<112x128xf32>
    %66 = vector.broadcast %64 : vector<112x1xf32> to vector<112x128xf32>
    %67 = arith.mulf %66, %65 : vector<112x128xf32>
    %68 = vector.extract_strided_slice %11 {offsets = [0, 1], sizes = [112, 1], strides = [1, 1]} : vector<112x2xf32> to vector<112x1xf32>
    %69 = vector.extract_strided_slice %56 {offsets = [0, 128], sizes = [112, 128], strides = [1, 1]} : vector<112x256xf32> to vector<112x128xf32>
    %70 = vector.broadcast %68 : vector<112x1xf32> to vector<112x128xf32>
    %71 = arith.mulf %70, %69 : vector<112x128xf32>
    %72 = arith.addf %63, %71 : vector<112x128xf32>
    %73 = vector.extract_strided_slice %11 {offsets = [0, 1], sizes = [112, 1], strides = [1, 1]} : vector<112x2xf32> to vector<112x1xf32>
    %74 = vector.extract_strided_slice %59 {offsets = [0, 128], sizes = [112, 128], strides = [1, 1]} : vector<112x256xf32> to vector<112x128xf32>
    %75 = vector.broadcast %73 : vector<112x1xf32> to vector<112x128xf32>
    %76 = arith.mulf %75, %74 : vector<112x128xf32>
    %77 = arith.addf %67, %76 : vector<112x128xf32>
    %78 = arith.mulf %43, %72 : vector<112x128xf32>
    %c0_14 = arith.constant 0 : index
    %c0_15 = arith.constant 0 : index
    %79 = vector.load %arg7[%c0_14, %c0_15] : memref<128x128xf32, #tpu.memory_space<vmem>>, vector<128x128xf32>
    %cst_16 = arith.constant dense<0.000000e+00> : vector<112x128xf32>
    %80 = tpu.matmul %78, %79, %cst_16 {dimension_numbers = #tpu.dot_dimension_numbers<[1], [0], [0], [1], [0, 0, 1, 1], [], []>} : vector<112x128xf32>, vector<128x128xf32>, vector<112x128xf32> -> vector<112x128xf32>
    %81 = arith.addf %77, %80 : vector<112x128xf32>
    %c0_17 = arith.constant 0 : index
    %c0_18 = arith.constant 0 : index
    %82 = vector.load %arg8[%c0_17, %c0_18] : memref<112x128xf32, #tpu.memory_space<vmem>>, vector<112x128xf32>
    tpu.vector_store %arg8[%c0_17, %c0_18], %81 {strides = array<i32>} : memref<112x128xf32, #tpu.memory_space<vmem>>, vector<112x128xf32>,
    return
  }
  func.func @transform_0(%arg0: i32) -> (i32, i32) {
    %c0_i32 = arith.constant 0 : i32
    %c0_i32_0 = arith.constant 0 : i32
    return %arg0, %c0_i32 : i32, i32
  }
  func.func @transform_1(%arg0: i32) -> (i32, i32) {
    %c0_i32 = arith.constant 0 : i32
    %c0_i32_0 = arith.constant 0 : i32
    return %arg0, %c0_i32 : i32, i32
  }
  func.func @transform_2(%arg0: i32) -> (i32, i32) {
    %c0_i32 = arith.constant 0 : i32
    %c0_i32_0 = arith.constant 0 : i32
    %c0_i32_1 = arith.constant 0 : i32
    return %c0_i32, %c0_i32_0 : i32, i32
  }
  func.func @transform_3(%arg0: i32) -> (i32, i32) {
    %c0_i32 = arith.constant 0 : i32
    %c0_i32_0 = arith.constant 0 : i32
    %c0_i32_1 = arith.constant 0 : i32
    return %c0_i32, %c0_i32_0 : i32, i32
  }
  func.func @transform_4(%arg0: i32) -> (i32, i32) {
    %c0_i32 = arith.constant 0 : i32
    %c0_i32_0 = arith.constant 0 : i32
    %c0_i32_1 = arith.constant 0 : i32
    return %c0_i32, %c0_i32_0 : i32, i32
  }
  func.func @transform_5(%arg0: i32) -> (i32, i32) {
    %c0_i32 = arith.constant 0 : i32
    %c0_i32_0 = arith.constant 0 : i32
    %c0_i32_1 = arith.constant 0 : i32
    return %c0_i32, %c0_i32_0 : i32, i32
  }
  func.func @transform_6(%arg0: i32) -> (i32, i32) {
    %c0_i32 = arith.constant 0 : i32
    %c0_i32_0 = arith.constant 0 : i32
    %c0_i32_1 = arith.constant 0 : i32
    return %c0_i32, %c0_i32_0 : i32, i32
  }
  func.func @transform_7(%arg0: i32) -> (i32, i32) {
    %c0_i32 = arith.constant 0 : i32
    %c0_i32_0 = arith.constant 0 : i32
    return %arg0, %c0_i32 : i32, i32
  }
}

module attributes {stable_mosaic.version = 11 : i64} {
  func.func @edge_kernel(%arg0: i32, %arg1: memref<112x35xbf16, #tpu.memory_space<vmem>>, %arg2: memref<112x69xbf16, #tpu.memory_space<vmem>>, %arg3: memref<35x384xbf16, #tpu.memory_space<vmem>>, %arg4: memref<69x768xbf16, #tpu.memory_space<vmem>>, %arg5: memref<128x256xbf16, #tpu.memory_space<vmem>>, %arg6: memref<128x256xbf16, #tpu.memory_space<vmem>>, %arg7: memref<128x128xf32, #tpu.memory_space<vmem>>, %arg8: memref<112x128xf32, #tpu.memory_space<vmem>>) attributes {dimension_semantics = [#tpu.dimension_semantics<parallel>], iteration_bounds = array<i64: 2>, scalar_prefetch = 0 : i64, scratch_operands = 0 : i64, tpu.core_type = #tpu.core_type<tc>, window_params = [{transform_indices = @transform_0, window_bounds = array<i64: 112, 35>}, {transform_indices = @transform_1, window_bounds = array<i64: 112, 69>}, {pipeline_mode = #tpu.pipeline_mode<synchronous>, transform_indices = @transform_2, window_bounds = array<i64: 35, 384>}, {pipeline_mode = #tpu.pipeline_mode<synchronous>, transform_indices = @transform_3, window_bounds = array<i64: 69, 768>}, {pipeline_mode = #tpu.pipeline_mode<synchronous>, transform_indices = @transform_4, window_bounds = array<i64: 128, 256>}, {pipeline_mode = #tpu.pipeline_mode<synchronous>, transform_indices = @transform_5, window_bounds = array<i64: 128, 256>}, {pipeline_mode = #tpu.pipeline_mode<synchronous>, transform_indices = @transform_6, window_bounds = array<i64: 128, 128>}, {transform_indices = @transform_7, window_bounds = array<i64: 112, 128>}]} {
    %c0 = arith.constant 0 : index
    %c0_0 = arith.constant 0 : index
    %0 = vector.load %arg1[%c0, %c0_0] : memref<112x35xbf16, #tpu.memory_space<vmem>>, vector<112x35xbf16>
    %c0_1 = arith.constant 0 : index
    %c0_2 = arith.constant 0 : index
    %1 = vector.load %arg2[%c0_1, %c0_2] : memref<112x69xbf16, #tpu.memory_space<vmem>>, vector<112x69xbf16>
    %c0_3 = arith.constant 0 : index
    %c0_4 = arith.constant 0 : index
    %2 = vector.load %arg3[%c0_3, %c0_4] : memref<35x384xbf16, #tpu.memory_space<vmem>>, vector<35x384xbf16>
    %cst = arith.constant dense<0.000000e+00> : vector<112x384xf32>
    %3 = tpu.matmul %0, %2, %cst {dimension_numbers = #tpu.dot_dimension_numbers<[1], [0], [0], [1], [0, 0, 1, 1], [], []>} : vector<112x35xbf16>, vector<35x384xbf16>, vector<112x384xf32> -> vector<112x384xf32>
    %c0_5 = arith.constant 0 : index
    %c0_6 = arith.constant 0 : index
    %4 = vector.load %arg4[%c0_5, %c0_6] : memref<69x768xbf16, #tpu.memory_space<vmem>>, vector<69x768xbf16>
    %cst_7 = arith.constant dense<0.000000e+00> : vector<112x768xf32>
    %5 = tpu.matmul %1, %4, %cst_7 {dimension_numbers = #tpu.dot_dimension_numbers<[1], [0], [0], [1], [0, 0, 1, 1], [], []>} : vector<112x69xbf16>, vector<69x768xbf16>, vector<112x768xf32> -> vector<112x768xf32>
    %6 = vector.extract_strided_slice %0 {offsets = [0, 32], sizes = [112, 3], strides = [1, 1]} : vector<112x35xbf16> to vector<112x3xbf16>
    %7 = arith.extf %6 : vector<112x3xbf16> to vector<112x3xf32>
    %8 = vector.extract_strided_slice %1 {offsets = [0, 64], sizes = [112, 3], strides = [1, 1]} : vector<112x69xbf16> to vector<112x3xbf16>
    %9 = arith.extf %8 : vector<112x3xbf16> to vector<112x3xf32>
    %10 = vector.extract_strided_slice %1 {offsets = [0, 67], sizes = [112, 2], strides = [1, 1]} : vector<112x69xbf16> to vector<112x2xbf16>
    %11 = arith.extf %10 : vector<112x2xbf16> to vector<112x2xf32>
    %12 = vector.extract_strided_slice %7 {offsets = [0, 0], sizes = [112, 1], strides = [1, 1]} : vector<112x3xf32> to vector<112x1xf32>
    %13 = vector.extract_strided_slice %3 {offsets = [0, 0], sizes = [112, 128], strides = [1, 1]} : vector<112x384xf32> to vector<112x128xf32>
    %14 = vector.broadcast %12 : vector<112x1xf32> to vector<112x128xf32>
    %15 = arith.mulf %14, %13 : vector<112x128xf32>
    %16 = vector.extract_strided_slice %9 {offsets = [0, 0], sizes = [112, 1], strides = [1, 1]} : vector<112x3xf32> to vector<112x1xf32>
    %17 = vector.extract_strided_slice %5 {offsets = [0, 0], sizes = [112, 128], strides = [1, 1]} : vector<112x768xf32> to vector<112x128xf32>
    %18 = vector.broadcast %16 : vector<112x1xf32> to vector<112x128xf32>
    %19 = arith.mulf %18, %17 : vector<112x128xf32>
    %20 = vector.extract_strided_slice %9 {offsets = [0, 0], sizes = [112, 1], strides = [1, 1]} : vector<112x3xf32> to vector<112x1xf32>
    %21 = vector.extract_strided_slice %5 {offsets = [0, 384], sizes = [112, 128], strides = [1, 1]} : vector<112x768xf32> to vector<112x128xf32>
    %22 = vector.broadcast %20 : vector<112x1xf32> to vector<112x128xf32>
    %23 = arith.mulf %22, %21 : vector<112x128xf32>
    %24 = vector.extract_strided_slice %7 {offsets = [0, 1], sizes = [112, 1], strides = [1, 1]} : vector<112x3xf32> to vector<112x1xf32>
    %25 = vector.extract_strided_slice %3 {offsets = [0, 128], sizes = [112, 128], strides = [1, 1]} : vector<112x384xf32> to vector<112x128xf32>
    %26 = vector.broadcast %24 : vector<112x1xf32> to vector<112x128xf32>
    %27 = arith.mulf %26, %25 : vector<112x128xf32>
    %28 = arith.addf %15, %27 : vector<112x128xf32>
    %29 = vector.extract_strided_slice %9 {offsets = [0, 1], sizes = [112, 1], strides = [1, 1]} : vector<112x3xf32> to vector<112x1xf32>
    %30 = vector.extract_strided_slice %5 {offsets = [0, 128], sizes = [112, 128], strides = [1, 1]} : vector<112x768xf32> to vector<112x128xf32>
    %31 = vector.broadcast %29 : vector<112x1xf32> to vector<112x128xf32>
    %32 = arith.mulf %31, %30 : vector<112x128xf32>
    %33 = arith.addf %19, %32 : vector<112x128xf32>
    %34 = vector.extract_strided_slice %9 {offsets = [0, 1], sizes = [112, 1], strides = [1, 1]} : vector<112x3xf32> to vector<112x1xf32>
    %35 = vector.extract_strided_slice %5 {offsets = [0, 512], sizes = [112, 128], strides = [1, 1]} : vector<112x768xf32> to vector<112x128xf32>
    %36 = vector.broadcast %34 : vector<112x1xf32> to vector<112x128xf32>
    %37 = arith.mulf %36, %35 : vector<112x128xf32>
    %38 = arith.addf %23, %37 : vector<112x128xf32>
    %39 = vector.extract_strided_slice %7 {offsets = [0, 2], sizes = [112, 1], strides = [1, 1]} : vector<112x3xf32> to vector<112x1xf32>
    %40 = vector.extract_strided_slice %3 {offsets = [0, 256], sizes = [112, 128], strides = [1, 1]} : vector<112x384xf32> to vector<112x128xf32>
    %41 = vector.broadcast %39 : vector<112x1xf32> to vector<112x128xf32>
    %42 = arith.mulf %41, %40 : vector<112x128xf32>
    %43 = arith.addf %28, %42 : vector<112x128xf32>
    %44 = vector.extract_strided_slice %9 {offsets = [0, 2], sizes = [112, 1], strides = [1, 1]} : vector<112x3xf32> to vector<112x1xf32>
    %45 = vector.extract_strided_slice %5 {offsets = [0, 256], sizes = [112, 128], strides = [1, 1]} : vector<112x768xf32> to vector<112x128xf32>
    %46 = vector.broadcast %44 : vector<112x1xf32> to vector<112x128xf32>
    %47 = arith.mulf %46, %45 : vector<112x128xf32>
    %48 = arith.addf %33, %47 : vector<112x128xf32>
    %49 = vector.extract_strided_slice %9 {offsets = [0, 2], sizes = [112, 1], strides = [1, 1]} : vector<112x3xf32> to vector<112x1xf32>
    %50 = vector.extract_strided_slice %5 {offsets = [0, 640], sizes = [112, 128], strides = [1, 1]} : vector<112x768xf32> to vector<112x128xf32>
    %51 = vector.broadcast %49 : vector<112x1xf32> to vector<112x128xf32>
    %52 = arith.mulf %51, %50 : vector<112x128xf32>
    %53 = arith.addf %38, %52 : vector<112x128xf32>
    %54 = arith.truncf %48 : vector<112x128xf32> to vector<112x128xbf16>
    %c0_8 = arith.constant 0 : index
    %c0_9 = arith.constant 0 : index
    %55 = vector.load %arg5[%c0_8, %c0_9] : memref<128x256xbf16, #tpu.memory_space<vmem>>, vector<128x256xbf16>
    %cst_10 = arith.constant dense<0.000000e+00> : vector<112x256xf32>
    %56 = tpu.matmul %54, %55, %cst_10 {dimension_numbers = #tpu.dot_dimension_numbers<[1], [0], [0], [1], [0, 0, 1, 1], [], []>} : vector<112x128xbf16>, vector<128x256xbf16>, vector<112x256xf32> -> vector<112x256xf32>
    %57 = arith.truncf %53 : vector<112x128xf32> to vector<112x128xbf16>
    %c0_11 = arith.constant 0 : index
    %c0_12 = arith.constant 0 : index
    %58 = vector.load %arg6[%c0_11, %c0_12] : memref<128x256xbf16, #tpu.memory_space<vmem>>, vector<128x256xbf16>
    %cst_13 = arith.constant dense<0.000000e+00> : vector<112x256xf32>
    %59 = tpu.matmul %57, %58, %cst_13 {dimension_numbers = #tpu.dot_dimension_numbers<[1], [0], [0], [1], [0, 0, 1, 1], [], []>} : vector<112x128xbf16>, vector<128x256xbf16>, vector<112x256xf32> -> vector<112x256xf32>
    %60 = vector.extract_strided_slice %11 {offsets = [0, 0], sizes = [112, 1], strides = [1, 1]} : vector<112x2xf32> to vector<112x1xf32>
    %61 = vector.extract_strided_slice %56 {offsets = [0, 0], sizes = [112, 128], strides = [1, 1]} : vector<112x256xf32> to vector<112x128xf32>
    %62 = vector.broadcast %60 : vector<112x1xf32> to vector<112x128xf32>
    %63 = arith.mulf %62, %61 : vector<112x128xf32>
    %64 = vector.extract_strided_slice %11 {offsets = [0, 0], sizes = [112, 1], strides = [1, 1]} : vector<112x2xf32> to vector<112x1xf32>
    %65 = vector.extract_strided_slice %59 {offsets = [0, 0], sizes = [112, 128], strides = [1, 1]} : vector<112x256xf32> to vector<112x128xf32>
    %66 = vector.broadcast %64 : vector<112x1xf32> to vector<112x128xf32>
    %67 = arith.mulf %66, %65 : vector<112x128xf32>
    %68 = vector.extract_strided_slice %11 {offsets = [0, 1], sizes = [112, 1], strides = [1, 1]} : vector<112x2xf32> to vector<112x1xf32>
    %69 = vector.extract_strided_slice %56 {offsets = [0, 128], sizes = [112, 128], strides = [1, 1]} : vector<112x256xf32> to vector<112x128xf32>
    %70 = vector.broadcast %68 : vector<112x1xf32> to vector<112x128xf32>
    %71 = arith.mulf %70, %69 : vector<112x128xf32>
    %72 = arith.addf %63, %71 : vector<112x128xf32>
    %73 = vector.extract_strided_slice %11 {offsets = [0, 1], sizes = [112, 1], strides = [1, 1]} : vector<112x2xf32> to vector<112x1xf32>
    %74 = vector.extract_strided_slice %59 {offsets = [0, 128], sizes = [112, 128], strides = [1, 1]} : vector<112x256xf32> to vector<112x128xf32>
    %75 = vector.broadcast %73 : vector<112x1xf32> to vector<112x128xf32>
    %76 = arith.mulf %75, %74 : vector<112x128xf32>
    %77 = arith.addf %67, %76 : vector<112x128xf32>
    %78 = arith.mulf %43, %72 : vector<112x128xf32>
    %c0_14 = arith.constant 0 : index
    %c0_15 = arith.constant 0 : index
    %79 = vector.load %arg7[%c0_14, %c0_15] : memref<128x128xf32, #tpu.memory_space<vmem>>, vector<128x128xf32>
    %cst_16 = arith.constant dense<0.000000e+00> : vector<112x128xf32>
    %80 = tpu.matmul %78, %79, %cst_16 {dimension_numbers = #tpu.dot_dimension_numbers<[1], [0], [0], [1], [0, 0, 1, 1], [], []>} : vector<112x128xf32>, vector<128x128xf32>, vector<112x128xf32> -> vector<112x128xf32>
    %81 = arith.addf %77, %80 : vector<112x128xf32>
    %c0_17 = arith.constant 0 : index
    %c0_18 = arith.constant 0 : index
    %82 = vector.load %arg8[%c0_17, %c0_18] : memref<112x128xf32, #tpu.memory_space<vmem>>, vector<112x128xf32>
    tpu.vector_store %arg8[%c0_17, %c0_18], %81 {strides = array<i32>} : memref<112x128xf32, #tpu.memory_space<vmem>>, vector<112x128xf32>,
    return
  }
  func.func @transform_0(%arg0: i32) -> (i32, i32) {
    %c0_i32 = arith.constant 0 : i32
    %c0_i32_0 = arith.constant 0 : i32
    return %arg0, %c0_i32 : i32, i32
  }
  func.func @transform_1(%arg0: i32) -> (i32, i32) {
    %c0_i32 = arith.constant 0 : i32
    %c0_i32_0 = arith.constant 0 : i32
    return %arg0, %c0_i32 : i32, i32
  }
  func.func @transform_2(%arg0: i32) -> (i32, i32) {
    %c0_i32 = arith.constant 0 : i32
    %c0_i32_0 = arith.constant 0 : i32
    %c0_i32_1 = arith.constant 0 : i32
    return %c0_i32, %c0_i32_0 : i32, i32
  }
  func.func @transform_3(%arg0: i32) -> (i32, i32) {
    %c0_i32 = arith.constant 0 : i32
    %c0_i32_0 = arith.constant 0 : i32
    %c0_i32_1 = arith.constant 0 : i32
    return %c0_i32, %c0_i32_0 : i32, i32
  }
  func.func @transform_4(%arg0: i32) -> (i32, i32) {
    %c0_i32 = arith.constant 0 : i32
    %c0_i32_0 = arith.constant 0 : i32
    %c0_i32_1 = arith.constant 0 : i32
    return %c0_i32, %c0_i32_0 : i32, i32
  }
  func.func @transform_5(%arg0: i32) -> (i32, i32) {
    %c0_i32 = arith.constant 0 : i32
    %c0_i32_0 = arith.constant 0 : i32
    %c0_i32_1 = arith.constant 0 : i32
    return %c0_i32, %c0_i32_0 : i32, i32
  }
  func.func @transform_6(%arg0: i32) -> (i32, i32) {
    %c0_i32 = arith.constant 0 : i32
    %c0_i32_0 = arith.constant 0 : i32
    %c0_i32_1 = arith.constant 0 : i32
    return %c0_i32, %c0_i32_0 : i32, i32
  }
  func.func @transform_7(%arg0: i32) -> (i32, i32) {
    %c0_i32 = arith.constant 0 : i32
    %c0_i32_0 = arith.constant 0 : i32
    return %arg0, %c0_i32 : i32, i32
  }
}

</mosaic_0001>

<bundles_post_ra>
// kernel: tpu_custom_call.1
= control target key start
LH: loop header
LB: loop body
LE: loop exit
PB: predicated region body
PF: predicated region fallthrough
CT: control target
= control target key end

     0   :  { %s4919_s0 = inlined_call_operand.vmem [shape: bf16[224,35], index: 0, kind: input, shape index: {}]   ;;  %s4920_s1 = inlined_call_operand.vmem [shape: bf16[224,69], index: 1, kind: input, shape index: {}]   ;;  %s4921_s2 = inlined_call_operand.hbm [shape: bf16[35,384], index: 2, kind: input, shape index: {}]   ;;  %s4922_s3 = inlined_call_operand.vmem [shape: bf16[69,768], index: 3, kind: input, shape index: {}]   ;;  %s4923_s4 = inlined_call_operand.hbm [shape: bf16[128,256], index: 4, kind: input, shape index: {}]   ;;  %s4924_s5 = inlined_call_operand.hbm [shape: bf16[128,256], index: 5, kind: input, shape index: {}]   ;;  %s4925_s6 = inlined_call_operand.hbm [shape: f32[128,128], index: 6, kind: input, shape index: {}]   ;;  %s4926_s7 = inlined_call_operand.hbm [shape: f32[224,128], index: 7, kind: output, shape index: {}]  }
   0x1   :  { %4985 = sst [smem:[#allocation33_spill]] %s4921_s2 }
   0x2   :  { %4986 = sst [smem:[#allocation34_spill]] %s4923_s4 }
   0x3   :  { %12 = vsyncpa [#allocation3], 0 }
   0x4   :  { %13 = vsyncpa [#allocation6], 0 }
   0x5   :  { %14 = vsyncpa [#allocation9], 0 }
   0x6   :  { %15 = vsyncpa [#allocation4], 0 }
   0x7   :  { %17 = vsyncpa [#allocation4 + $0x1], 0  ;;  %s3708_s24 = smov 0   ;;  %s3710_s25 = smov 0  }
   0x8   :  { %s3712_s26 = smov 0   ;;  %s3714_s27 = smov 0  }
   0x9 LB: > { %4987 = sst [smem:[#allocation15_spill]] %s3643_s26  ;;  %s3729_s28 = sadd.s32 4294967295, %s3647_s27   ;;  %s3647_s27 = sphi %s3714_s27, %s5075_s27   ;;  %s3643_s26 = sphi %s3712_s26, %s5072_s26   ;;  %s3639_s25 = sphi %s3710_s25, %s5074_s25   ;;  %s3635_s24 = sphi %s3708_s24, %s5073_s24  }
   0xa   : > { %s2582_s29 = sadd.s32 4294967294, %s3647_s27   ;;  %s3733_s30 = sadd.s32 1, %s3647_s27  }
   0xb   : > { %s187_s8 = sadd.s32 1, %s3643_s26  ;;  %s184_s9 = ssub.s32 %s3647_s27, %s3733_s30 }
   0xc   : > { %p197_p0 = scmp.ne.s32.totalorder %s3643_s26, %s3639_s25  ;;  %p185_p1 = scmp.eq.s32.totalorder %s184_s9, 0 }
   0xd   : > { %p198_p2 = scmp.eq.s32.totalorder %s3729_s28, 1  ;;  %p203_p3 = scmp.ne.s32.totalorder %s3639_s25, %s3635_s24 }
   0xe   : > { %p204_p4 = scmp.eq.s32.totalorder %s2582_s29, 1  ;;  %p2583_p7 = scmp.ge.s32.totalorder %s3647_s27, 1 }
   0xf   : > { %s3744_s10 = scalar_select %p185_p1, %s3643_s26, %s187_s8  }
  0x10   : > { %p3746_p5 = por %p198_p2, %p197_p0  ;;  %p3750_p6 = por %p204_p4, %p203_p3 }
  0x11   : > { %4988 = sst [smem:[#allocation16_spill]] %s3744_s10  ;;  %p211_p8 = scmp.lt.s32.totalorder %s3647_s27, 3 }
  0x12   : > { %p3085_p9 = scmp.eq.s32.totalorder %s3729_s28, 0  ;;  %s4992_s4 = sld [smem:[#allocation34_spill]] }
  0x13   : > { %p3757_p10 = pnand %p2583_p7, %p211_p8  ;;  %s3649_s17 = smov [#allocation5]  }
  0x14   : > { %s241_s18 = sshll.u32 %s3649_s17, 4  ;;  %s4994_s2 = sld [smem:[#allocation33_spill]]  ;;  %s242_s18 = int_to_ptr.vmem [resolvable:$true] %s241_s18 }
  0x15   : > { %p3068_p11 = pneg %p3757_p10  ;;  %s3650_s23 = smov 128  }
  0x16   : > { %s3651_s29 = smov 8   ;;  %s3652_s8 = smov [#allocation2]  }
  0x17   : > { %p3768_p12 = pnand %p3085_p9, %p3068_p11  ;;  %s224_s9 = sshll.u32 %s3652_s8, 4  ;;  %s225_s9 = int_to_ptr.vmem [resolvable:$true] %s224_s9 }
  0x18   : > { %s239_s16 = sshll.u32 %s4992_s4, 4  ;;  %s3653_s14 = smov 192   ;;  %s240_s16 = int_to_ptr.hbm [resolvable:$true] %s239_s16 }
  0x19   : > { %3074 = dma.hbm_to_vmem [thread:$0]  (!%p3768_p12), %s240_s16, 2048, %s242_s18, [#allocation6], %s3650_s23, %s3650_s23, %s3651_s29  }
  0x1a   : > { %s222_s22 = sshll.u32 %s4994_s2, 4  ;;  %s3654_s15 = smov 12   ;;  %s223_s22 = int_to_ptr.hbm [resolvable:$true] %s222_s22 }
  0x1b   : > { %3071 = dma.hbm_to_vmem [thread:$0]  (!%p3768_p12), %s223_s22, 960, %s225_s9, [#allocation3], %s3653_s14, %s3653_s14, %s3654_s15  }
  0x1c   : > { %s253_s20 = sshll.u32 %s4924_s5, 4  ;;  %s3655_s21 = smov [#allocation7]   ;;  %s254_s20 = int_to_ptr.hbm [resolvable:$true] %s253_s20 }
  0x1d   : > { %s255_s2 = sshll.u32 %s3655_s21, 4  ;;  %s267_s16 = sshll.u32 %s4925_s6, 4  ;;  %s256_s2 = int_to_ptr.vmem [resolvable:$true] %s255_s2  ;;  %s268_s16 = int_to_ptr.hbm [resolvable:$true] %s267_s16 }
  0x1e   : > { %3077 = dma.hbm_to_vmem [thread:$0]  (!%p3768_p12), %s254_s20, 2048, %s256_s2, [#allocation6], %s3650_s23, %s3650_s23, %s3651_s29  }
  0x1f   : > { %s3656_s18 = smov [#allocation8]   ;;  %303 = sbr.rel (%p3757_p10) target bundleno = 711 (0x2c7), region = 48 }
  0x20   : > { %s269_s8 = sshll.u32 %s3656_s18, 4  ;;  %s270_s8 = int_to_ptr.vmem [resolvable:$true] %s269_s8 }
  0x21   : > { %3080 = dma.hbm_to_vmem [thread:$0]  (!%p3768_p12), %s268_s16, 2048, %s270_s8, [#allocation9], %s3650_s23, %s3650_s23, %s3651_s29  }
  0x24   : > { %3618 = dma.done.wait (%p3085_p9), [#allocation3], 960  }
  0x25   : > { %3620 = vsyncadd (%p3085_p9), [#allocation3], 4294966336 }
  0x26   : > { %3622 = dma.done.wait (%p3085_p9), [#allocation6], 4096  }
  0x27   : > { %3624 = vsyncadd (%p3085_p9), [#allocation6], 4294963200 }
  0x28   : > { %3626 = dma.done.wait (%p3085_p9), [#allocation9], 2048  }
  0x29   : > { %3628 = vsyncadd (%p3085_p9), [#allocation9], 4294965248  ;;  %s356_s2 = smul.u32 14, %s3729_s28  ;;  %v3657_v0 = vmov 32   ;;  %vm505_vm0 = vcmask 1040384   ;;  %vm506_vm1 = vcmask 1041408  }
  0x2a   : > { %3156 = vset.pattern.permute.xlu1 %v3657_v0  ;;  %3167 = vset.pattern.permute.xlu2 %v3657_v0  ;;  %v3658_v1 = vmov 65535   ;;  %v406_v3 = vld [vmem:[#allocation2 + $0x30] sm:$0x33]  ;;  %v2638_v18 = vld [vmem:[#allocation2 + $0x18] sm:$0xf]  ;;  %vm869_vm2 = vcmask 1042432  }
  0x2b   : > { %3145 = vset.pattern.permute.xlu0 %v3657_v0  ;;  %p357_p13 = scmp.lt.s32.totalorder %s356_s2, 27  ;;  %v507_v2 = vsel %vm505_vm0, 4294967295, %v3658_v1  ;;  %v465_v5 = vunpack.c.l.b16 %v406_v3  ;;  %v466_v7 = vunpack.c.h.b16 %v406_v3  ;;  %v2984_v22 = vld [vmem:[#allocation2 + $0x20] sm:$0xf0]  ;;  %v2983_v23 = vld [vmem:[#allocation2 + $0x1c] sm:$0xf] }
  0x2c   : > { %v3817_v6 = vsel %vm506_vm1, %v507_v2, 0  ;;  %v2640_v28 = vld [vmem:[#allocation2 + $0x24] sm:$0xf0]  ;;  %v407_v30 = vld [vmem:[#allocation2 + $0x38] sm:$0x3]  ;;  %v2639_v35 = vor.u32 %v2984_v22, %v2638_v18  ;;  %v870_v53 = vsel %vm506_vm1, 4294967295, %v3658_v1 }
  0x2d   : > { %s5077_s2 = smov (!%p357_p13, %s356_s2), 27  ;;  %v474_v14 = vpack.c.b16 %v465_v5, %v465_v5  ;;  %v475_v15 = vpack.c.b16 %v466_v7, %v466_v7  ;;  %v467_v36 = vunpack.c.l.b16 %v407_v30  ;;  %v2643_v37 = vor.u32 %v2983_v23, %v2640_v28  ;;  %v2626_v38 = vld [vmem:[#allocation2] sm:$0xf]  ;;  %v2981_v39 = vld [vmem:[#allocation2 + $0x8] sm:$0xf0]  ;;  %s3042_s20 = smul.u32 112, %s3729_s28 }
  0x2e   : > { %s2594_s4 = sshll.u32 %s5077_s2, 2  ;;  %v2980_v42 = vld [vmem:[#allocation2 + $0x4] sm:$0xf]  ;;  %v2628_v43 = vld [vmem:[#allocation2 + $0xc] sm:$0xf0]  ;;  %v2627_v47 = vor.u32 %v2981_v39, %v2626_v38  ;;  %vm483_vm3 = vcmask 285696  }
  0x2f   : > { %s3813_s13 = scalar_lea.vmem %s4919_s0, %s2594_s4  ;;  %v510_v25 = vand.u32 %v3817_v6, %v474_v14  ;;  %v513_v26 = vand.u32 %v3817_v6, %v475_v15  ;;  %s3839_s23 = scalar_lea.vmem %s4920_s1, %s2594_s4  ;;  %v476_v44 = vpack.c.b16 %v467_v36, %v467_v36  ;;  %v2631_v49 = vor.u32 %v2980_v42, %v2628_v43  ;;  %v3853_v52 = vld [vmem:[%s4922_s3 + $0xc0] sm:$0x77]  ;;  %v2985_v60 = vld [vmem:[#allocation2 + $0x28] sm:$0xf0]  ;;  %v3007_v7 = vld [vmem:[%s4922_s3 + $0xa4] sm:$0xf0] }
  0x30   : > { %v374_v4 = vld [vmem:[%s3813_s13 + $0x10] sm:$0xff]   ;;  %v378_v8 = vld [vmem:[%s3813_s13 + $0x20] sm:$0xff]   ;;  %v376_v19 = vld [vmem:[%s3813_s13 + $0x18] sm:$0xff]   ;;  %v787_v0 = vunpack.c.l.b16 %v3853_v52  ;;  %v3869_v1 = vsel %vm869_vm2, %v870_v53, 0  ;;  %v3659_v18 = vmov 64   ;;  %vm847_vm4 = vcmask 564224  }
  0x31   : > { %v370_v9 = vld [vmem:[%s3813_s13] sm:$0xff]   ;;  %v1158_v10 = vunpack.c.l.bf16 %v374_v4  ;;  %v1159_v11 = vunpack.c.h.bf16 %v374_v4  ;;  %v1162_v12 = vunpack.c.l.bf16 %v378_v8  ;;  %v1163_v13 = vunpack.c.h.bf16 %v378_v8  ;;  %v380_v24 = vld [vmem:[%s3813_s13 + $0x28] sm:$0xff]   ;;  %523 = vmatpush.bf16.msra.mxu0 %v510_v25  ;;  %3043 = vmatpush.bf16.msra.mxu2 %v510_v25  ;;  %v382_v56 = vld [vmem:[%s3813_s13 + $0x30] sm:$0xff]   ;;  %s3593_s19 = scalar_lea.hbm %s4926_s7, 224 }
  0x32   : > { %v1154_v16 = vunpack.c.l.bf16 %v370_v9  ;;  %v1155_v17 = vunpack.c.h.bf16 %v370_v9  ;;  %v372_v29 = vld [vmem:[%s3813_s13 + $0x8] sm:$0xff]   ;;  %v1160_v31 = vunpack.c.l.bf16 %v376_v19  ;;  %v1161_v32 = vunpack.c.h.bf16 %v376_v19  ;;  %3046 = vmatpush.bf16.msra.mxu3 %v513_v26  ;;  %567 = vmatpush.bf16.msra.mxu1 %v513_v26  ;;  %v384_v48 = vld [vmem:[%s3839_s23] sm:$0xff]   ;;  %v390_v14 = vld [vmem:[%s3839_s23 + $0x18] sm:$0xff]  }
  0x33   : > { %v3822_v20 = vpack.i.bf16 %v1159_v11, %v1158_v10  ;;  %v3824_v21 = vpack.i.bf16 %v1163_v13, %v1162_v12  ;;  %v1164_v33 = vunpack.c.l.bf16 %v380_v24  ;;  %v1165_v34 = vunpack.c.h.bf16 %v380_v24  ;;  %v386_v51 = vld [vmem:[%s3839_s23 + $0x8] sm:$0xff]   ;;  %v3858_v54 = vld [vmem:[%s3813_s13] sm:$0xff]  ;;  %v2982_v12 = vld [vmem:[#allocation2 + $0x10] sm:$0xf0] }
  0x34   : > { %v3829_v27 = vpack.i.bf16 %v1155_v17, %v1154_v16  ;;  %v1156_v40 = vunpack.c.l.bf16 %v372_v29  ;;  %v1157_v41 = vunpack.c.h.bf16 %v372_v29  ;;  %v3842_v45 = vpack.i.bf16 %v1161_v32, %v1160_v31  ;;  %v3865_v57 = vld [vmem:[%s3813_s13 + $0x20] sm:$0xff]  ;;  %v2634_v11 = vld [vmem:[#allocation2 + $0x8] sm:$0xf]  ;;  %v388_v19 = vld [vmem:[%s3839_s23 + $0x10] sm:$0xff]  }
  0x35   : > { %3158 = vperm.xlu1 %3156, %v3822_v20   ;;  %3169 = vperm.xlu2 %3167, %v3824_v21   ;;  %v3844_v46 = vpack.i.bf16 %v1165_v34, %v1164_v33  ;;  %v516_v55 = vand.u32 %v3817_v6, %v476_v44  ;;  %v1168_v58 = vunpack.c.l.bf16 %v384_v48  ;;  %v2646_v59 = vld [vmem:[#allocation2 + $0x20] sm:$0xf]  ;;  %v1169_v61 = vunpack.c.h.bf16 %v384_v48  ;;  %v2771_v6 = vld [vmem:[%s4922_s3 + $0x90] sm:$0xf]  ;;  %v3001_v23 = vld [vmem:[%s4922_s3 + $0x74] sm:$0xf0] }
  0x36   : > { %3147 = vperm.xlu0 %3145, %v3829_v27   ;;  %524 = vmatpush.bf16.msra.mxu0 %v2639_v35  ;;  %v3847_v50 = vpack.i.bf16 %v1157_v41, %v1156_v40  ;;  %v1170_v62 = vunpack.c.l.bf16 %v386_v51  ;;  %v1171_v63 = vunpack.c.h.bf16 %v386_v51  ;;  %v1166_v2 = vunpack.c.l.bf16 %v382_v56  ;;  %v392_v15 = vld [vmem:[%s3839_s23 + $0x20] sm:$0xff]   ;;  %v2723_v33 = vld [vmem:[%s4922_s3 + $0x30] sm:$0xf]  ;;  %v2995_v34 = vld [vmem:[%s4922_s3 + $0x44] sm:$0xf0] }
  0x37   : > { %3044 = vmatpush.bf16.msra.mxu2 %v2639_v35  ;;  %3047 = vmatpush.bf16.msra.mxu3 %v2643_v37  ;;  %v1167_v3 = vunpack.c.h.bf16 %v382_v56  ;;  %v2647_v4 = vor.u32 %v2985_v60, %v2646_v59  ;;  %v817_v5 = vpack.c.b16 %v787_v0, %v787_v0  ;;  %v3884_v8 = vpack.i.bf16 %v1169_v61, %v1168_v58  ;;  %v2747_v22 = vld [vmem:[%s4922_s3 + $0x60] sm:$0xf]  ;;  %v675_v38 = vld [vmem:[%s4922_s3 + $0xc8] sm:$0x77]  ;;  %v3921_v40 = vld [vmem:[%s3839_s23 + $0x30] sm:$0xff]  }
  0x38   : > { %568 = vmatpush.bf16.msra.mxu1 %v2643_v37  ;;  %v3886_v9 = vpack.i.bf16 %v1171_v63, %v1170_v62  ;;  %v2635_v16 = vor.u32 %v2982_v12, %v2634_v11  ;;  %v2772_v17 = vor.u32 %v3007_v7, %v2771_v6  ;;  %v1174_v24 = vunpack.c.l.bf16 %v390_v14  ;;  %v394_v39 = vld [vmem:[%s3839_s23 + $0x28] sm:$0xff]   ;;  %4995 = vst [vmem:[#allocation17_spill] sm:$0xff] %v3921_v40  ;;  %v2989_v51 = vld [vmem:[%s4922_s3 + $0x14] sm:$0xf0]  ;;  %v3004_v62 = vld [vmem:[%s4922_s3 + $0x94] sm:$0xf] }
  0x39   : > { %v873_v10 = vand.u32 %v3869_v1, %v817_v5  ;;  %v3891_v13 = vpack.i.bf16 %v1167_v3, %v1166_v2  ;;  %v1175_v25 = vunpack.c.h.bf16 %v390_v14  ;;  %v1176_v26 = vunpack.c.l.bf16 %v392_v15  ;;  %v3927_v44 = vld [vmem:[%s3813_s13 + $0x8] sm:$0xff]  ;;  %v2779_v5 = vld [vmem:[%s4922_s3 + $0x98] sm:$0xf]  ;;  %v3008_v6 = vld [vmem:[%s4922_s3 + $0xac] sm:$0xf0] }
  0x3a   : > { %525 = vmatpush.bf16.msra.mxu0 %v2627_v47  ;;  %v1177_v28 = vunpack.c.h.bf16 %v392_v15  ;;  %v788_v29 = vunpack.c.h.b16 %v3853_v52  ;;  %v1172_v30 = vunpack.c.l.bf16 %v388_v19  ;;  %v1173_v31 = vunpack.c.h.bf16 %v388_v19  ;;  %v3930_v48 = vld [vmem:[%s3813_s13 + $0x28] sm:$0xff]  ;;  %v2998_v11 = vld [vmem:[%s4922_s3 + $0x64] sm:$0xf]  ;;  %v2749_v12 = vld [vmem:[%s4922_s3 + $0x78] sm:$0xf0] }
  0x3b   : > { %3045 = vmatpush.bf16.msra.mxu2 %v2627_v47  ;;  %3048 = vmatpush.bf16.msra.mxu3 %v2631_v49  ;;  %v2748_v32 = vor.u32 %v3001_v23, %v2747_v22  ;;  %v3912_v36 = vpack.i.bf16 %v1175_v25, %v1174_v24  ;;  %v789_v42 = vunpack.c.l.b16 %v675_v38  ;;  %v2724_v47 = vor.u32 %v2995_v34, %v2723_v33  ;;  %v2773_v63 = vld [vmem:[%s4922_s3 + $0xa8] sm:$0xf0]  ;;  %v2755_v15 = vld [vmem:[%s4922_s3 + $0x68] sm:$0xf]  ;;  %v2992_v19 = vld [vmem:[%s4922_s3 + $0x34] sm:$0xf] }
  0x3c   : > { %569 = vmatpush.bf16.msra.mxu1 %v2631_v49  ;;  %v818_v35 = vpack.c.b16 %v788_v29, %v788_v29  ;;  %v3914_v37 = vpack.i.bf16 %v1177_v28, %v1176_v26  ;;  %v3924_v43 = vpack.i.bf16 %v1173_v31, %v1172_v30  ;;  %v2699_v49 = vld [vmem:[%s4922_s3] sm:$0xf]  ;;  %v1178_v53 = vunpack.c.l.bf16 %v394_v39  ;;  %v2725_v22 = vld [vmem:[%s4922_s3 + $0x48] sm:$0xf0]  ;;  %v2731_v24 = vld [vmem:[%s4922_s3 + $0x38] sm:$0xf] }
  0x3d   : > { %3163 = vperm.xlu1 %3156, %v3842_v45   ;;  %3174 = vperm.xlu2 %3167, %v3844_v46   ;;  %v819_v52 = vpack.c.b16 %v789_v42, %v789_v42  ;;  %v1180_v56 = vunpack.c.l.bf16 %v3921_v40  ;;  %v4928_v58 = vunpack.c.h.bf16 %v3921_v40  ;;  %v790_v59 = vunpack.c.h.b16 %v675_v38  ;;  %v2996_v25 = vld [vmem:[%s4922_s3 + $0x4c] sm:$0xf0]  ;;  %v2986_v26 = vld [vmem:[%s4922_s3 + $0x4] sm:$0xf]  ;;  %v2701_v28 = vld [vmem:[%s4922_s3 + $0x18] sm:$0xf0] }
  0x3e   : > { %3152 = vperm.xlu0 %3145, %v3847_v50   ;;  %2648 = vmatmul.msk.bf16.vlgmr.msra.gmra.mxu0 %vm483_vm3, %v3858_v54  ;;  %v876_v41 = vand.u32 %v3869_v1, %v818_v35  ;;  %v2700_v61 = vor.u32 %v2989_v51, %v2699_v49  ;;  %v2776_v2 = vor.u32 %v3004_v62, %v2773_v63  ;;  %v4007_v31 = vld [vmem:[%s3813_s13 + $0x10] sm:$0xff]  ;;  %v2990_v33 = vld [vmem:[%s4922_s3 + $0x1c] sm:$0xf0]  ;;  %v3005_v38 = vld [vmem:[%s4922_s3 + $0x9c] sm:$0xf]  ;;  %v3661_v42 = vmov 66  }
  0x3f   : > { %611 = vmatpush.bf16.msrb.mxu2 %v516_v55  ;;  %2659 = vmatmul.msk.bf16.vlgmr.msra.gmra.mxu3 %vm483_vm3, %v3865_v57  ;;  %v1179_v55 = vunpack.c.h.bf16 %v394_v39  ;;  %v879_v60 = vand.u32 %v3869_v1, %v819_v52  ;;  %v820_v0 = vpack.c.b16 %v790_v59, %v790_v59  ;;  %v2752_v14 = vor.u32 %v2998_v11, %v2749_v12  ;;  %v4016_v34 = vld [vmem:[%s3813_s13 + $0x30] sm:$0xff]  ;;  %v4041_v49 = vld [vmem:[%s3839_s23] sm:$0xff]  ;;  %v2999_v52 = vld [vmem:[%s4922_s3 + $0x6c] sm:$0xf] }
  0x40   : > { %2652 = vmatmul.msk.bf16.vlgmr.msra.gmra.mxu2 %vm483_vm3, %v3865_v57  ;;  %2655 = vmatmul.msk.bf16.vlgmr.msra.gmra.mxu1 %vm483_vm3, %v3858_v54  ;;  %v2728_v23 = vor.u32 %v2992_v19, %v2725_v22  ;;  %v2732_v29 = vor.u32 %v2996_v25, %v2731_v24  ;;  %v2704_v30 = vor.u32 %v2986_v26, %v2701_v28  ;;  %v2781_v39 = vld [vmem:[%s4922_s3 + $0xb0] sm:$0xf0]  ;;  %v3662_v51 = vmov 65   ;;  %v2709_v19 = vld [vmem:[%s4922_s3 + $0x20] sm:$0xf0] }
  0x41   : > { %893 = vmatpush.bf16.msrb.mxu3 %v873_v10  ;;  %937 = vmatpush.bf16.msrb.mxu0 %v876_v41  ;;  %v3956_v3 = vpack.i.bf16 %v1179_v55, %v1178_v53  ;;  %v882_v7 = vand.u32 %v3869_v1, %v820_v0  ;;  %v2780_v10 = vor.u32 %v3008_v6, %v2779_v5  ;;  %v4064_v55 = vld [vmem:[%s3839_s23 + $0x8] sm:$0xff]  ;;  %v4080_v59 = vld [vmem:[%s3839_s23 + $0x10] sm:$0xff]  ;;  %v4109_v5 = vld [vmem:[%s3839_s23 + $0x18] sm:$0xff] }
  0x42   : > { %981 = vmatpush.bf16.msrb.mxu1 %v879_v60  ;;  %v2784_v41 = vor.u32 %v3005_v38, %v2781_v39  ;;  %v4929_v60 = vmov 68   ;;  %v2733_v62 = vld [vmem:[%s4922_s3 + $0x50] sm:$0xf0]  ;;  %v3009_v24 = vld [vmem:[%s4922_s3 + $0xb4] sm:$0xf0] }
  0x43   : > { %612 = vmatpush.bf16.msrb.mxu2 %v2647_v4  ;;  %v3962_v4 = vpack.i.bf16 %v4928_v58, %v1180_v56  ;;  %v676_v11 = vld [vmem:[%s4922_s3 + $0xd0] sm:$0x77]  ;;  %v3003_v28 = vld [vmem:[%s4922_s3 + $0x84] sm:$0xf0] }
  0x44   : > { %v2763_v26 = vld [vmem:[%s4922_s3 + $0x70] sm:$0xf] }
  0x45   : > { %3183 = vset.pattern.permute.xlu1 %v3659_v18  ;;  %3189 = vset.pattern.permute.xlu2 %v3659_v18  ;;  %4996 = vst [vmem:[#allocation18_spill] sm:$0xff] %v3962_v4  ;;  %v2715_v39 = vld [vmem:[%s4922_s3 + $0x10] sm:$0xf] }
  0x46   : > { %3185 = vperm.xlu1 %3183, %v3884_v8   ;;  %3191 = vperm.xlu2 %3189, %v3886_v9  }
  0x47   : > { %3179 = vperm.xlu0 %3145, %v3891_v13   ;;  %613 = vmatpush.bf16.msrb.mxu2 %v2635_v16  ;;  %v3002_v16 = vld [vmem:[%s4922_s3 + $0x7c] sm:$0xf0] }
  0x48   : > { %894 = vmatpush.bf16.msrb.mxu3 %v2772_v17  ;;  %938 = vmatpush.bf16.msrb.mxu0 %v2776_v2  ;;  %v2756_v17 = vor.u32 %v3002_v16, %v2755_v15  ;;  %v4932_v2 = vmov 67  }
  0x49   : > { %982 = vmatpush.bf16.msrb.mxu1 %v2780_v10 }
  0x4b   : > { %1025 = vmatpush.bf16.msra.mxu2 %v882_v7  ;;  %v3665_v7 = vmov 34  }
  0x4c   : > { %895 = vmatpush.bf16.msrb.mxu3 %v2748_v32  ;;  %939 = vmatpush.bf16.msrb.mxu0 %v2752_v14  ;;  %v2707_v32 = vld [vmem:[%s4922_s3 + $0x8] sm:$0xf]  ;;  %v791_v14 = vunpack.c.l.b16 %v676_v11 }
  0x4d   : > { %983 = vmatpush.bf16.msrb.mxu1 %v2756_v17  ;;  %v2708_v35 = vor.u32 %v2990_v33, %v2707_v32  ;;  %v2997_v32 = vld [vmem:[%s4922_s3 + $0x54] sm:$0xf0] }
  0x4e   : > { %3202 = vperm.xlu1 %3183, %v3912_v36   ;;  %3207 = vperm.xlu2 %3189, %v3914_v37   ;;  %v821_v15 = vpack.c.b16 %v791_v14, %v791_v14 }
  0x4f   : > { %3195 = vset.pattern.permute.xlu0 %v3659_v18  ;;  %2649 = vmatmul.msk.bf16.gmra.mxu0 %vm483_vm3, %v3927_v44  ;;  %v3660_v18 = vmov 33  }
  0x50   : > { %3197 = vperm.xlu0 %3195, %v3924_v43   ;;  %896 = vmatpush.bf16.msrb.mxu3 %v2724_v47  ;;  %v4038_v47 = vld [vmem:[%s3813_s13 + $0x18] sm:$0xff]  ;;  %s2463_s13 = scalar_lea.hbm %s4926_s7, %s3042_s20 }
  0x51   : > { %2653 = vmatmul.msk.bf16.gmra.mxu2 %vm483_vm3, %v3930_v48  ;;  %2660 = vmatmul.msk.bf16.gmra.mxu3 %vm483_vm3, %v3930_v48  ;;  %s2466_s28 = sshll.u32 %s2463_s13, 4  ;;  %s2467_s28 = int_to_ptr.hbm [resolvable:$true] %s2466_s28 }
  0x52   : > { %2656 = vmatmul.msk.bf16.gmra.mxu1 %vm483_vm3, %v3927_v44  ;;  %940 = vmatpush.bf16.msrb.mxu0 %v2728_v23  ;;  %v2787_v23 = vld [vmem:[%s4922_s3 + $0xa0] sm:$0xf]  ;;  %s3587_s2 = sshra.s32 %s2467_s28, 4  ;;  %s3588_s2 = int_to_ptr.hbm [resolvable:$true] %s3587_s2 }
  0x53   : > { %984 = vmatpush.bf16.msrb.mxu1 %v2732_v29  ;;  %1026 = vmatpush.bf16.msra.mxu2 %v2784_v41  ;;  %v2788_v25 = vor.u32 %v3009_v24, %v2787_v23  ;;  %v2991_v41 = vld [vmem:[%s4922_s3 + $0x24] sm:$0xf0]  ;;  %v2765_v23 = vld [vmem:[%s4922_s3 + $0x88] sm:$0xf0]  ;;  %s3589_s4 = scalar_lea.hbm %s3588_s2, 112  ;;  %p3594_p3 = scmp.lt.s32.totalorder %s3588_s2, %s4926_s7 }
  0x54   : > { %897 = vmatpush.bf16.msrb.mxu3 %v2700_v61  ;;  %v2993_v61 = vld [vmem:[%s4922_s3 + $0x3c] sm:$0xf]  ;;  %p3590_p0 = scmp.ne.s32.totalorder %s3588_s2, %s3589_s4  ;;  %p3595_p4 = scmp.lt.s32.totalorder %s3593_s19, %s3589_s4 }
  0x55   : > { %v2736_v63 = vor.u32 %v2993_v61, %v2733_v62  ;;  %v3006_v62 = vld [vmem:[%s4922_s3 + $0xa4] sm:$0xf] }
  0x56   : > { %3212 = vperm.xlu1 %3183, %v3956_v3   ;;  %3217 = vperm.xlu2 %3189, %v3962_v4   ;;  %p3591_p1 = pnand %p3590_p0, %p3746_p5  ;;  %p3596_p7 = por %p3595_p4, %p3594_p3 }
  0x57   : > { %941 = vmatpush.bf16.msrb.mxu0 %v2704_v30  ;;  %985 = vmatpush.bf16.msrb.mxu1 %v2708_v35  ;;  %v792_v30 = vunpack.c.h.b16 %v676_v11 }
  0x58   : > { %3221 = vset.pattern.permute.xlu0 %v3660_v18  ;;  %p3592_p2 = pneg %p3591_p1 }
  0x59   : > { %3223 = vperm.xlu0 %3221, %v3829_v27   ;;  %v822_v38 = vpack.c.b16 %v792_v30, %v792_v30 }
  0x5a   : > { %p3597_p8 = pnand %p3596_p7, %p3592_p2 }
  0x5e   : > { %3227 = vset.pattern.permute.xlu1 %v3660_v18  ;;  %3233 = vset.pattern.permute.xlu2 %v3660_v18  ;;  %v2987_v18 = vld [vmem:[%s4922_s3 + $0xc] sm:$0xf] }
  0x5f   : > { %3229 = vperm.xlu1 %3227, %v3847_v50   ;;  %3235 = vperm.xlu2 %3233, %v3822_v20   ;;  %v2712_v22 = vor.u32 %v2987_v18, %v2709_v19  ;;  %v2895_v18 = vld [vmem:[#allocation5 + $0x78] sm:$0xf0] }
  0x60   : > { %2650 = vmatmul.msk.bf16.gmra.mxu0 %vm483_vm3, %v4007_v31 }
  0x61   : > { %3250 = vperm.xlu0 %3221, %v3844_v46   ;;  %2654 = vmatmul.msk.bf16.gmra.mxu2 %vm483_vm3, %v4016_v34 }
  0x62   : > { %2661 = vmatmul.msk.bf16.gmra.mxu3 %vm483_vm3, %v4016_v34  ;;  %2657 = vmatmul.msk.bf16.gmra.mxu1 %vm483_vm3, %v4007_v31 }
  0x67   : > { %3240 = vperm.xlu1 %3227, %v3842_v45   ;;  %3245 = vperm.xlu2 %3233, %v3824_v21  }
  0x69   : > { %3265 = vset.pattern.permute.xlu0 %v3661_v42 }
  0x6a   : > { %3267 = vperm.xlu0 %3265, %v3884_v8  }
  0x6f   : > { %3255 = vperm.xlu1 %3227, %v3891_v13   ;;  %3259 = vset.pattern.permute.xlu2 %v3662_v51 }
  0x70   : > { %3261 = vperm.xlu2 %3259, %v3884_v8   ;;  %2651 = vmatmul.msk.bf16.gmra.mxu0 %vm483_vm3, %v4038_v47 }
  0x71   : > { %2662 = vmatmul.msk.bf16.vlgmr.msrb.gmra.mxu2 %vm483_vm3, %v3858_v54  ;;  %v2757_v54 = vld [vmem:[%s4922_s3 + $0x80] sm:$0xf0] }
  0x72   : > { %2793 = vmatmul.msk.bf16.vlgmr.msrb.gmra.mxu3 %vm847_vm4, %v4041_v49  ;;  %2658 = vmatmul.msk.bf16.gmra.mxu1 %vm483_vm3, %v4038_v47  ;;  %v2760_v53 = vor.u32 %v2999_v52, %v2757_v54  ;;  %v4201_v52 = vld [vmem:[%s3839_s23 + $0x28] sm:$0xff] }
  0x73   : > { %3293 = vset.pattern.permute.xlu0 %v3662_v51 }
  0x74   : > { %3295 = vperm.xlu0 %3293, %v3912_v36   ;;  %1027 = vmatpush.bf16.msra.mxu2 %v2760_v53 }
  0x77   : > { %3271 = vset.pattern.permute.xlu1 %v3662_v51 }
  0x78   : > { %3273 = vperm.xlu1 %3271, %v3886_v9   ;;  %3277 = vset.pattern.permute.xlu2 %v3661_v42 }
  0x79   : > { %3279 = vperm.xlu2 %3277, %v3886_v9   ;;  %1028 = vmatpush.bf16.msra.mxu2 %v2736_v63 }
  0x7c   : > { %3321 = vset.pattern.permute.xlu0 %v3661_v42 }
  0x7d   : > { %3323 = vperm.xlu0 %3321, %v3956_v3   ;;  %1029 = vmatpush.bf16.msra.mxu2 %v2712_v22 }
  0x80   : > { %3284 = vperm.xlu1 %3271, %v3924_v43   ;;  %2800 = vmatmul.msk.bf16.vlgmr.msrb.gmra.mxu0 %vm847_vm4, %v4041_v49 }
  0x81   : > { %3289 = vperm.xlu2 %3277, %v3924_v43   ;;  %2663 = vmatmul.msk.bf16.gmra.mxu2 %vm483_vm3, %v3927_v44 }
  0x82   : > { %2794 = vmatmul.msk.bf16.gmra.mxu3 %vm847_vm4, %v4064_v55  ;;  %2807 = vmatmul.msk.bf16.vlgmr.msrb.gmra.mxu1 %vm847_vm4, %v4041_v49 }
  0x85   : > { %3351 = vset.pattern.permute.xlu0 %v4929_v60 }
  0x86   : > { %3353 = vperm.xlu0 %3351, %v3884_v8  }
  0x88   : > { %3299 = vset.pattern.permute.xlu1 %v3661_v42 }
  0x89   : > { %3301 = vperm.xlu1 %3299, %v3912_v36   ;;  %3305 = vset.pattern.permute.xlu2 %v3662_v51 }
  0x8a   : > { %3307 = vperm.xlu2 %3305, %v3914_v37  }
  0x8e   : > { %3379 = vset.pattern.permute.xlu0 %v4932_v2 }
  0x8f   : > { %v4083_v44 = vpop.permute.xlu2 %3169  ;;  %3381 = vperm.xlu0 %3379, %v3924_v43  }
  0x90   : > { %2801 = vmatmul.msk.bf16.gmra.mxu0 %vm847_vm4, %v4064_v55 }
  0x91   : > { %3312 = vperm.xlu1 %3299, %v3914_v37   ;;  %2664 = vmatmul.msk.bf16.gmra.mxu2 %vm483_vm3, %v4007_v31  ;;  %v2739_v31 = vld [vmem:[%s4922_s3 + $0x40] sm:$0xf] }
  0x92   : > { %2795 = vmatmul.msk.bf16.gmra.mxu3 %vm847_vm4, %v4080_v59  ;;  %2808 = vmatmul.msk.bf16.gmra.mxu1 %vm847_vm4, %v4064_v55  ;;  %v2740_v35 = vor.u32 %v2997_v32, %v2739_v31 }
  0x93   : > { %3317 = vperm.xlu2 %3305, %v3956_v3  }
  0x97   : > { %v4102_v0 = vpop.permute.xlu2 %3174  ;;  %3407 = vset.pattern.permute.xlu0 %v3665_v7 }
  0x98   : > { %3409 = vperm.xlu0 %3407, %v3824_v21  }
  0x99   : > { %3327 = vset.pattern.permute.xlu1 %v3662_v51 }
  0x9a   : > { %3329 = vperm.xlu1 %3327, %v3962_v4  }
  0x9b   : > { %3333 = vset.pattern.permute.xlu2 %v3661_v42  ;;  %v888_v42 = vand.u32 %v3869_v1, %v822_v38  ;;  %v2994_v38 = vld [vmem:[%s4922_s3 + $0x44] sm:$0xf] }
  0x9c   : > { %3335 = vperm.xlu2 %3333, %v3962_v4  }
  0x9d   : > { %1113 = vmatpush.bf16.msra.mxu0 %v888_v42  ;;  %v2741_v42 = vld [vmem:[%s4922_s3 + $0x58] sm:$0xf0] }
  0xa0   : > { %v4111_v6 = vpop.permute.xlu2 %3191  ;;  %2802 = vmatmul.msk.bf16.gmra.mxu0 %vm847_vm4, %v4080_v59  ;;  %3435 = vset.pattern.permute.xlu0 %v4929_v60 }
  0xa1   : > { %4997 = vst [vmem:[#allocation19_spill] sm:$0xff] %v4111_v6  ;;  %2665 = vmatmul.msk.bf16.gmra.mxu2 %vm483_vm3, %v4038_v47  ;;  %v2716_v47 = vor.u32 %v2991_v41, %v2715_v39  ;;  %v3172_v39 = vunpack.i.h.bf16 %v4083_v44  ;;  %3437 = vperm.xlu0 %3435, %v3956_v3  }
  0xa2   : > { %2796 = vmatmul.msk.bf16.gmra.mxu3 %vm847_vm4, %v4109_v5  ;;  %3339 = vset.pattern.permute.xlu1 %v3665_v7 }
  0xa3   : > { %2809 = vmatmul.msk.bf16.gmra.mxu1 %vm847_vm4, %v4080_v59  ;;  %3341 = vperm.xlu1 %3339, %v3829_v27   ;;  %v885_v27 = vand.u32 %v3869_v1, %v821_v15  ;;  %v2789_v1 = vld [vmem:[%s4922_s3 + $0xb8] sm:$0xf0] }
  0xa4   : > { %3345 = vset.pattern.permute.xlu2 %v4932_v2  ;;  %v2792_v63 = vor.u32 %v3006_v62, %v2789_v1  ;;  %v2744_v62 = vor.u32 %v2994_v38, %v2741_v42  ;;  %v3022_v38 = vld [vmem:[#allocation5 + $0x64] sm:$0xf]  ;;  %v3023_v42 = vld [vmem:[#allocation5 + $0x64] sm:$0xf0] }
  0xa5   : > { %3347 = vperm.xlu2 %3345, %v3884_v8   ;;  %v4141_v8 = vld [vmem:[%s3839_s23 + $0x20] sm:$0xff]  ;;  %1069 = vmatpush.bf16.msra.mxu3 %v885_v27  ;;  %v3024_v27 = vld [vmem:[#allocation5 + $0x74] sm:$0xf] }
  0xa6   : > { %1114 = vmatpush.bf16.msra.mxu0 %v2792_v63  ;;  %v2898_v22 = vor.u32 %v3024_v27, %v2895_v18 }
  0xa7   : > { %v4127_v10 = vpop.permute.xlu1 %3158 }
  0xa8   : > { %v4129_v21 = vpop.permute.xlu2 %3207  ;;  %v4134_v12 = vpop.permute.xlu0 %3147  ;;  %1903 = vmatpush.bf16.msrb.mxu2 %v2898_v22 }
  0xa9   : > { %1070 = vmatpush.bf16.msra.mxu3 %v2788_v25  ;;  %v3150_v15 = vunpack.i.h.bf16 %v4134_v12 }
  0xab   : > { %3358 = vperm.xlu1 %3339, %v3847_v50  }
  0xad   : > { %3363 = vperm.xlu2 %3345, %v3886_v9  }
  0xaf   : > { %v4143_v16 = vpop.permute.xlu1 %3163 }
  0xb0   : > { %v4145_v17 = vpop.permute.xlu2 %3217  ;;  %2803 = vmatmul.msk.bf16.gmra.mxu0 %vm847_vm4, %v4109_v5  ;;  %v4155_v50 = vpop.permute.xlu0 %3152 }
  0xb1   : > { %4998 = vst [vmem:[#allocation20_spill] sm:$0xff] %v4145_v17  ;;  %2666 = vmatmul.msk.bf16.gmra.mxu2 %vm483_vm3, %v3865_v57  ;;  %v2764_v57 = vor.u32 %v3003_v28, %v2763_v26  ;;  %v3154_v1 = vunpack.i.l.bf16 %v4155_v50 }
  0xb2   : > { %2797 = vmatmul.msk.bf16.gmra.mxu3 %vm847_vm4, %v4141_v8 }
  0xb3   : > { %2810 = vmatmul.msk.bf16.gmra.mxu1 %vm847_vm4, %v4109_v5  ;;  %3367 = vset.pattern.permute.xlu1 %v4929_v60 }
  0xb4   : > { %3369 = vperm.xlu1 %3367, %v3886_v9   ;;  %1071 = vmatpush.bf16.msra.mxu3 %v2764_v57 }
  0xb5   : > { %3373 = vset.pattern.permute.xlu2 %v3665_v7 }
  0xb6   : > { %3375 = vperm.xlu2 %3373, %v3822_v20   ;;  %v3149_v20 = vunpack.i.l.bf16 %v4134_v12 }
  0xb8   : > { %v4179_v29 = vpop.permute.xlu1 %3185  ;;  %1072 = vmatpush.bf16.msra.mxu3 %v2740_v35  ;;  %v2893_v35 = vld [vmem:[#allocation5 + $0x70] sm:$0xf] }
  0xb9   : > { %4999 = vst [vmem:[#allocation21_spill] sm:$0xff] %v4179_v29  ;;  %v4187_v33 = vpop.permute.xlu2 %3235  ;;  %v4189_v9 = vpop.permute.xlu0 %3179 }
  0xbb   : > { %v527_v51 = vpop.f32.mrf.mxu0 }
  0xbc   : > { %3386 = vperm.xlu1 %3367, %v3924_v43   ;;  %v4204_v54 = vmul.f32 %v3149_v20, %v527_v51  ;;  %1073 = vmatpush.bf16.msra.mxu3 %v2716_v47  ;;  %v3171_v43 = vunpack.i.l.bf16 %v4083_v44  ;;  %v3025_v20 = vld [vmem:[#allocation5 + $0x74] sm:$0xf0] }
  0xbd   : > { %v571_v53 = vpop.f32.mrf.mxu1  ;;  %v2894_v41 = vor.u32 %v3025_v20, %v2893_v35  ;;  %v2988_v44 = vld [vmem:[%s4922_s3 + $0x14] sm:$0xf] }
  0xbe   : > { %3391 = vperm.xlu2 %3373, %v3842_v45  }
  0xbf   : > { %1859 = vmatpush.bf16.msra.mxu1 %v2894_v41 }
  0xc0   : > { %v4206_v61 = vpop.permute.xlu1 %3202  ;;  %2804 = vmatmul.msk.bf16.gmra.mxu0 %vm847_vm4, %v4141_v8 }
  0xc1   : > { %v3246_v45 = vpop.permute.xlu2 %3245  ;;  %2667 = vmatmul.msk.bf16.gmra.mxu2 %vm483_vm3, %v3930_v48  ;;  %v3000_v48 = vld [vmem:[%s4922_s3 + $0x74] sm:$0xf] }
  0xc2   : > { %2798 = vmatmul.msk.bf16.gmra.mxu3 %vm847_vm4, %v4201_v52  ;;  %v3247_v11 = vunpack.i.l.bf16 %v3246_v45  ;;  %v4221_v14 = vpop.permute.xlu0 %3197  ;;  %v591_v25 = vpop.f32.mrf.mxu3  ;;  %v2768_v12 = vor.u32 %v3000_v48, %v2765_v23  ;;  %v3248_v47 = vunpack.i.h.bf16 %v3246_v45  ;;  %v2717_v45 = vld [vmem:[%s4922_s3 + $0x28] sm:$0xf0] }
  0xc3   : > { %2811 = vmatmul.msk.bf16.gmra.mxu1 %vm847_vm4, %v4141_v8  ;;  %v547_v19 = vpop.f32.mrf.mxu2  ;;  %v529_v28 = vpop.f32.mrf.mxu0 }
  0xc4   : > { %v1260_v24 = vmul.f32 %v3171_v43, %v547_v19  ;;  %3395 = vset.pattern.permute.xlu1 %v4932_v2  ;;  %v1428_v26 = vmul.f32 %v3247_v11, %v591_v25  ;;  %v1253_v57 = vmul.f32 %v3150_v15, %v529_v28  ;;  %1115 = vmatpush.bf16.msra.mxu0 %v2768_v12  ;;  %v4257_v25 = vld [vmem:[%s3839_s23 + $0x30] sm:$0xff]  ;;  %s353_s23 = sand.u32 1, %s3639_s25  }
  0xc5   : > { %3397 = vperm.xlu1 %3395, %v3912_v36   ;;  %v573_v31 = vpop.f32.mrf.mxu1  ;;  %v2720_v19 = vor.u32 %v2988_v44, %v2717_v45  ;;  %s3049_s15 = smul.u32 112, %s353_s23  ;;  %s2452_s8 = scalar_lea.sflag [#allocation4], %s353_s23 }
  0xc6   : > { %3401 = vset.pattern.permute.xlu2 %v4929_v60  ;;  %v4235_v30 = vadd.f32 %v1428_v26, %v1260_v24 }
  0xc7   : > { %3403 = vperm.xlu2 %3401, %v3912_v36   ;;  %v2909_v36 = vld [vmem:[#allocation7 + $0x10] sm:$0xf]  ;;  %s4821_s17 = scalar_lea.vmem [#allocation10], %s3049_s15 }
  0xc8   : > { %v4237_v32 = vpop.permute.xlu1 %3212  ;;  %1116 = vmatpush.bf16.msra.mxu0 %v2744_v62  ;;  %s2464_s18 = sshll.u32 %s4821_s17, 4  ;;  %s2465_s18 = int_to_ptr.vmem [resolvable:$true] %s2464_s18 }
  0xca   : > { %v4246_v51 = vpop.permute.xlu2 %3261  ;;  %v593_v18 = vpop.f32.mrf.mxu3 }
  0xcb   : > { %5000 = vst [vmem:[#allocation22_spill] sm:$0xff] %v4246_v51  ;;  %v3224_v43 = vpop.permute.xlu0 %3223  ;;  %v549_v15 = vpop.f32.mrf.mxu2  ;;  %v1429_v23 = vmul.f32 %v3248_v47, %v593_v18  ;;  %v3155_v47 = vunpack.i.h.bf16 %v4155_v50 }
  0xcc   : > { %v3226_v63 = vunpack.i.h.bf16 %v3224_v43  ;;  %v3225_v11 = vunpack.i.l.bf16 %v3224_v43  ;;  %v1261_v27 = vmul.f32 %v3172_v39, %v549_v15  ;;  %v532_v24 = vpop.f32.mrf.mxu0  ;;  %1117 = vmatpush.bf16.msra.mxu0 %v2720_v19  ;;  %v2887_v39 = vld [vmem:[#allocation5 + $0x68] sm:$0xf0]  ;;  %v2877_v19 = vld [vmem:[#allocation5 + $0x50] sm:$0xf] }
  0xcd   : > { %3414 = vperm.xlu1 %3395, %v3914_v37   ;;  %v1254_v12 = vmul.f32 %v3154_v1, %v532_v24  ;;  %v2890_v41 = vor.u32 %v3022_v38, %v2887_v39  ;;  %v3177_v38 = vunpack.i.h.bf16 %v4102_v0 }
  0xce   : > { %v1421_v22 = vmul.f32 %v3226_v63, %v573_v31  ;;  %v1420_v48 = vmul.f32 %v3225_v11, %v571_v53  ;;  %v4264_v35 = vadd.f32 %v1429_v23, %v1261_v27  ;;  %v3176_v53 = vunpack.i.l.bf16 %v4102_v0 }
  0xcf   : > { %v576_v20 = vpop.f32.mrf.mxu1  ;;  %1904 = vmatpush.bf16.msrb.mxu2 %v2890_v41  ;;  %v3019_v41 = vld [vmem:[#allocation5 + $0x44] sm:$0xf0]  ;;  %3419 = vperm.xlu2 %3401, %v3914_v37  }
  0xd0   : > { %v4260_v26 = vadd.f32 %v1420_v48, %v4204_v54  ;;  %v4262_v28 = vadd.f32 %v1421_v22, %v1253_v57  ;;  %2805 = vmatmul.msk.bf16.gmra.mxu0 %vm847_vm4, %v4201_v52  ;;  %v2885_v57 = vld [vmem:[#allocation5 + $0x60] sm:$0xf]  ;;  %v3021_v22 = vld [vmem:[#allocation5 + $0x54] sm:$0xf0] }
  0xd1   : > { %v3230_v31 = vpop.permute.xlu1 %3229  ;;  %2668 = vmatmul.msk.bf16.gmra.mxu2 %vm483_vm3, %v4016_v34  ;;  %v2886_v43 = vor.u32 %v3023_v42, %v2885_v57  ;;  %v2878_v23 = vor.u32 %v3021_v22, %v2877_v19 }
  0xd2   : > { %2799 = vmatmul.msk.bf16.gmra.mxu3 %vm847_vm4, %v4257_v25  ;;  %v3231_v54 = vunpack.i.l.bf16 %v3230_v31  ;;  %v3232_v34 = vunpack.i.h.bf16 %v3230_v31  ;;  %v2869_v31 = vld [vmem:[#allocation5 + $0x40] sm:$0xf] }
  0xd3   : > { %v3251_v62 = vpop.permute.xlu0 %3250  ;;  %2812 = vmatmul.msk.bf16.gmra.mxu1 %vm847_vm4, %v4201_v52  ;;  %v4276_v1 = vpop.permute.xlu2 %3279 }
  0xd4   : > { %v1422_v63 = vmul.f32 %v3231_v54, %v576_v20  ;;  %v3252_v11 = vunpack.i.l.bf16 %v3251_v62  ;;  %v552_v15 = vpop.f32.mrf.mxu2  ;;  %v596_v45 = vpop.f32.mrf.mxu3  ;;  %1860 = vmatpush.bf16.msra.mxu1 %v2886_v43 }
  0xd5   : > { %v1262_v44 = vmul.f32 %v3176_v53, %v552_v15  ;;  %3423 = vset.pattern.permute.xlu1 %v3665_v7  ;;  %v534_v50 = vpop.f32.mrf.mxu0  ;;  %v3160_v7 = vunpack.i.l.bf16 %v4127_v10  ;;  %v3020_v15 = vld [vmem:[#allocation5 + $0x54] sm:$0xf] }
  0xd6   : > { %v4278_v27 = vadd.f32 %v1422_v63, %v1254_v12  ;;  %v1430_v18 = vmul.f32 %v3252_v11, %v596_v45  ;;  %v1255_v48 = vmul.f32 %v3155_v47, %v534_v50  ;;  %3425 = vperm.xlu1 %3423, %v3844_v46   ;;  %v3253_v12 = vunpack.i.h.bf16 %v3251_v62  ;;  %v2861_v62 = vld [vmem:[#allocation5 + $0x30] sm:$0xf] }
  0xd7   : > { %v578_v20 = vpop.f32.mrf.mxu1  ;;  %v2870_v46 = vor.u32 %v3019_v41, %v2869_v31  ;;  %v3237_v47 = vunpack.i.l.bf16 %v4187_v33 }
  0xd8   : > { %v4282_v24 = vadd.f32 %v1430_v18, %v1262_v44  ;;  %v1423_v39 = vmul.f32 %v3232_v34, %v578_v20  ;;  %1861 = vmatpush.bf16.msra.mxu1 %v2878_v23  ;;  %v2879_v34 = vld [vmem:[#allocation5 + $0x58] sm:$0xf0]  ;;  %v3017_v18 = vld [vmem:[#allocation5 + $0x34] sm:$0xf0]  ;;  %v3181_v20 = vunpack.i.l.bf16 %v4189_v9 }
  0xd9   : > { %v4285_v53 = vpop.permute.xlu1 %3240  ;;  %v2882_v45 = vor.u32 %v3020_v15, %v2879_v34  ;;  %v2862_v22 = vor.u32 %v3017_v18, %v2861_v62  ;;  %v3013_v15 = vld [vmem:[#allocation5 + $0x14] sm:$0xf0] }
  0xda   : > { %v4288_v54 = vadd.f32 %v1423_v39, %v1255_v48  ;;  %v3015_v39 = vld [vmem:[#allocation5 + $0x24] sm:$0xf0] }
  0xdb   : > { %v4290_v57 = vpop.permute.xlu2 %3289  ;;  %1905 = vmatpush.bf16.msrb.mxu2 %v2882_v45 }
  0xdc   : > { %v554_v42 = vpop.f32.mrf.mxu2  ;;  %v598_v63 = vpop.f32.mrf.mxu3  ;;  %1862 = vmatpush.bf16.msra.mxu1 %v2870_v46  ;;  %v3238_v46 = vunpack.i.h.bf16 %v4187_v33  ;;  %v3182_v33 = vunpack.i.h.bf16 %v4189_v9 }
  0xdd   : > { %v1263_v43 = vmul.f32 %v3177_v38, %v554_v42  ;;  %v1431_v0 = vmul.f32 %v3253_v12, %v598_v63  ;;  %v537_v11 = vpop.f32.mrf.mxu0  ;;  %v2853_v38 = vld [vmem:[#allocation5 + $0x20] sm:$0xf]  ;;  %v3161_v12 = vunpack.i.h.bf16 %v4127_v10 }
  0xde   : > { %v1256_v44 = vmul.f32 %v3160_v7, %v537_v11  ;;  %3442 = vperm.xlu1 %3423, %v3891_v13   ;;  %v2854_v7 = vor.u32 %v3015_v39, %v2853_v38  ;;  %v2845_v11 = vld [vmem:[#allocation5 + $0x10] sm:$0xf]  ;;  %v3242_v39 = vunpack.i.l.bf16 %v4285_v53 }
  0xdf   : > { %v4294_v50 = vadd.f32 %v1431_v0, %v1263_v43  ;;  %v581_v19 = vpop.f32.mrf.mxu1 }
  0xe0   : > { %v1424_v48 = vmul.f32 %v3237_v47, %v581_v19  ;;  %2806 = vmatmul.msk.bf16.gmra.mxu0 %vm847_vm4, %v4257_v25  ;;  %1863 = vmatpush.bf16.msra.mxu1 %v2862_v22  ;;  %v2837_v22 = vld [vmem:[#allocation5] sm:$0xf] }
  0xe1   : > { %v3256_v23 = vpop.permute.xlu1 %3255  ;;  %2814 = vmatmul.msk.bf16.vlgmr.msra.gmra.mxu2 %vm847_vm4, %v4041_v49 }
  0xe2   : > { %2821 = vmatmul.msk.bf16.vlgmr.msra.gmra.mxu3 %vm847_vm4, %v4041_v49  ;;  %v3257_v13 = vunpack.i.l.bf16 %v3256_v23  ;;  %v4304_v31 = vadd.f32 %v1424_v48, %v1256_v44  ;;  %v2846_v44 = vor.u32 %v3013_v15, %v2845_v11  ;;  %v3258_v18 = vunpack.i.h.bf16 %v3256_v23  ;;  %v3011_v48 = vld [vmem:[#allocation5 + $0x4] sm:$0xf0] }
  0xe3   : > { %2813 = vmatmul.msk.bf16.gmra.mxu1 %vm847_vm4, %v4257_v25  ;;  %v2838_v38 = vor.u32 %v3011_v48, %v2837_v22 }
  0xe4   : > { %v4308_v41 = vpop.permute.xlu2 %3307  ;;  %v557_v42 = vpop.f32.mrf.mxu2  ;;  %1864 = vmatpush.bf16.msra.mxu1 %v2854_v7 }
  0xe5   : > { %v601_v47 = vpop.f32.mrf.mxu3  ;;  %v1264_v43 = vmul.f32 %v3181_v20, %v557_v42  ;;  %v539_v0 = vpop.f32.mrf.mxu0  ;;  %v3165_v20 = vunpack.i.l.bf16 %v4143_v16  ;;  %v3018_v42 = vld [vmem:[#allocation5 + $0x44] sm:$0xf] }
  0xe6   : > { %v1432_v63 = vmul.f32 %v3257_v13, %v601_v47  ;;  %v1257_v34 = vmul.f32 %v3161_v12, %v539_v0  ;;  %3451 = vset.pattern.permute.xlu1 %v4929_v60 }
  0xe7   : > { %v583_v62 = vpop.f32.mrf.mxu1  ;;  %2271 = vperm.xlu1 %3451, %v1180_v56   ;;  %v2871_v56 = vld [vmem:[#allocation5 + $0x48] sm:$0xf0] }
  0xe8   : > { %v4312_v10 = vadd.f32 %v1432_v63, %v1264_v43  ;;  %v1425_v45 = vmul.f32 %v3238_v46, %v583_v62  ;;  %1865 = vmatpush.bf16.msra.mxu1 %v2846_v44  ;;  %v2874_v43 = vor.u32 %v3018_v42, %v2871_v56  ;;  %v3166_v62 = vunpack.i.h.bf16 %v4143_v16  ;;  %v2863_v42 = vld [vmem:[#allocation5 + $0x38] sm:$0xf0]  ;;  %v4347_v16 = vpop.permute.xlu0 %3267 }
  0xe9   : > { %5003 = vst [vmem:[#allocation25_spill] sm:$0xff] %v4347_v16 }
  0xea   : > { %v4317_v19 = vpop.permute.xlu1 %3273  ;;  %v4320_v13 = vadd.f32 %v1425_v45, %v1257_v34  ;;  %1906 = vmatpush.bf16.msrb.mxu2 %v2874_v43  ;;  %v3243_v45 = vunpack.i.h.bf16 %v4285_v53  ;;  %v4931_v53 = vunpack.i.l.bf16 %v4179_v29 }
  0xeb   : > { %5001 = vst [vmem:[#allocation23_spill] sm:$0xff] %v4317_v19 }
  0xec   : > { %v559_v12 = vpop.f32.mrf.mxu2  ;;  %1866 = vmatpush.bf16.msra.mxu1 %v2838_v38 }
  0xed   : > { %v603_v7 = vpop.f32.mrf.mxu3  ;;  %v1265_v46 = vmul.f32 %v3182_v33, %v559_v12  ;;  %v542_v9 = vpop.f32.mrf.mxu0 }
  0xee   : > { %v1433_v47 = vmul.f32 %v3258_v18, %v603_v7  ;;  %v4323_v23 = vpop.permute.xlu2 %3317  ;;  %v1258_v63 = vmul.f32 %v3165_v20, %v542_v9  ;;  %v3016_v7 = vld [vmem:[#allocation5 + $0x34] sm:$0xf] }
  0xef   : > { %v586_v11 = vpop.f32.mrf.mxu1  ;;  %v2866_v56 = vor.u32 %v3016_v7, %v2863_v42 }
  0xf0   : > { %v4325_v0 = vadd.f32 %v1433_v47, %v1265_v46  ;;  %v1426_v15 = vmul.f32 %v3242_v39, %v586_v11  ;;  %2828 = vmatmul.msk.bf16.vlgmr.msra.gmra.mxu0 %vm847_vm4, %v4041_v49  ;;  %v4930_v46 = vunpack.i.l.bf16 %v4246_v51 }
  0xf1   : > { %2815 = vmatmul.msk.bf16.gmra.mxu2 %vm847_vm4, %v4064_v55 }
  0xf2   : > { %2822 = vmatmul.msk.bf16.gmra.mxu3 %vm847_vm4, %v4064_v55  ;;  %v4333_v34 = vpop.permute.xlu1 %3284  ;;  %v4336_v44 = vadd.f32 %v1426_v15, %v1258_v63  ;;  %1907 = vmatpush.bf16.msrb.mxu2 %v2866_v56  ;;  %v4934_v15 = vunpack.i.h.bf16 %v4179_v29  ;;  %v4943_v56 = vunpack.i.h.bf16 %v4347_v16  ;;  %v4942_v29 = vunpack.i.l.bf16 %v4111_v6 }
  0xf4   : > { %v4339_v33 = vpop.f32.mrf.mxu2 }
  0xf5   : > { %v899_v18 = vpop.f32.mrf.mxu3  ;;  %v544_v22 = vpop.f32.mrf.mxu0 }
  0xf6   : > { %v4341_v48 = vpop.permute.xlu2 %3335  ;;  %v1259_v49 = vmul.f32 %v3166_v62, %v544_v22  ;;  %v1336_v62 = vmul.f32 %v4931_v53, %v899_v18  ;;  %v4938_v22 = vunpack.i.l.bf16 %v4347_v16 }
  0xf7   : > { %5002 = vst [vmem:[#allocation24_spill] sm:$0xff] %v4341_v48  ;;  %v588_v20 = vpop.f32.mrf.mxu1 }
  0xf8   : > { %v1427_v38 = vmul.f32 %v3243_v45, %v588_v20 }
  0xfa   : > { %v4343_v39 = vadd.f32 %v1427_v38, %v1259_v49  ;;  %v4939_v49 = vunpack.i.h.bf16 %v4246_v51  ;;  %v4370_v38 = vpop.permute.xlu0 %3295 }
  0xfb   : > { %v4345_v12 = vpop.permute.xlu1 %3301 }
  0xfc   : > { %v4351_v47 = vpop.f32.mrf.mxu2 }
  0xfd   : > { %v901_v9 = vpop.f32.mrf.mxu3  ;;  %v943_v43 = vpop.f32.mrf.mxu0 }
  0xfe   : > { %v1504_v45 = vmul.f32 %v4930_v46, %v943_v43  ;;  %v1337_v18 = vmul.f32 %v4934_v15, %v901_v9 }
  0xff   : > { %v4353_v63 = vpop.permute.xlu2 %3347  ;;  %v987_v11 = vpop.f32.mrf.mxu1 }
 0x100   : > { %5004 = vst [vmem:[#allocation26_spill] sm:$0xff] %v4353_v63  ;;  %2829 = vmatmul.msk.bf16.gmra.mxu0 %vm847_vm4, %v4064_v55  ;;  %v1518_v7 = vadd.f32 %v1504_v45, %v1336_v62  ;;  %v1700_v43 = vmul.f32 %v4938_v22, %v987_v11  ;;  %v3014_v62 = vld [vmem:[#allocation5 + $0x24] sm:$0xf]  ;;  %v2855_v45 = vld [vmem:[#allocation5 + $0x28] sm:$0xf0]  ;;  %v4941_v11 = vunpack.i.l.bf16 %v4317_v19 }
 0x101   : > { %2816 = vmatmul.msk.bf16.gmra.mxu2 %vm847_vm4, %v4080_v59  ;;  %v2858_v15 = vor.u32 %v3014_v62, %v2855_v45 }
 0x102   : > { %2823 = vmatmul.msk.bf16.gmra.mxu3 %vm847_vm4, %v4080_v59  ;;  %v1714_v63 = vadd.f32 %v1700_v43, %v1518_v7 }
 0x103   : > { %v4368_v20 = vpop.permute.xlu1 %3312  ;;  %1908 = vmatpush.bf16.msrb.mxu2 %v2858_v15  ;;  %v4967_v15 = vunpack.i.h.bf16 %v4317_v19 }
 0x104   : > { %v4374_v42 = vpop.f32.mrf.mxu2 }
 0x105   : > { %v904_v55 = vpop.f32.mrf.mxu3  ;;  %v945_v58 = vpop.f32.mrf.mxu0 }
 0x106   : > { %v1505_v60 = vmul.f32 %v4939_v49, %v945_v58 }
 0x107   : > { %v4381_v46 = vpop.permute.xlu2 %3363  ;;  %v989_v53 = vpop.f32.mrf.mxu1 }
 0x108   : > { %5005 = vst [vmem:[#allocation27_spill] sm:$0xff] %v4381_v46  ;;  %v1519_v2 = vadd.f32 %v1505_v60, %v1337_v18  ;;  %v1701_v9 = vmul.f32 %v4943_v56, %v989_v53  ;;  %v4392_v18 = vpop.permute.xlu0 %3323  ;;  %v4951_v53 = vunpack.i.l.bf16 %v4276_v1 }
 0x10a   : > { %v1715_v40 = vadd.f32 %v1701_v9, %v1519_v2  ;;  %v1338_v2 = vmul.f32 %v4942_v29, %v904_v55 }
 0x10c   : > { %v4387_v22 = vpop.permute.xlu1 %3329  ;;  %v4389_v58 = vpack.c.bf16 %v1715_v40, %v1714_v63  ;;  %v622_v49 = vpop.f32.mrf.mxu2  ;;  %v4952_v40 = vunpack.i.h.bf16 %v4111_v6 }
 0x10d   : > { %v906_v46 = vpop.f32.mrf.mxu3  ;;  %v948_v60 = vpop.f32.mrf.mxu0 }
 0x10e   : > { %1867 = vmatmul.bf16.vlgmr.msra.gmra.mxu1 %v4389_v58  ;;  %v1506_v7 = vmul.f32 %v4941_v11, %v948_v60  ;;  %v1339_v60 = vmul.f32 %v4952_v40, %v906_v46 }
 0x10f   : > { %v992_v43 = vpop.f32.mrf.mxu1 }
 0x110   : > { %v3376_v9 = vpop.permute.xlu2 %3375  ;;  %2830 = vmatmul.msk.bf16.gmra.mxu0 %vm847_vm4, %v4080_v59  ;;  %v1520_v55 = vadd.f32 %v1506_v7, %v1338_v2  ;;  %v1702_v62 = vmul.f32 %v4951_v53, %v992_v43  ;;  %v3012_v43 = vld [vmem:[#allocation5 + $0x14] sm:$0xf]  ;;  %v2847_v53 = vld [vmem:[#allocation5 + $0x18] sm:$0xf0] }
 0x111   : > { %2817 = vmatmul.msk.bf16.gmra.mxu2 %vm847_vm4, %v4109_v5  ;;  %v3377_v63 = vunpack.i.l.bf16 %v3376_v9  ;;  %v3378_v6 = vunpack.i.h.bf16 %v3376_v9  ;;  %v2850_v19 = vor.u32 %v3012_v43, %v2847_v53 }
 0x112   : > { %2824 = vmatmul.msk.bf16.gmra.mxu3 %vm847_vm4, %v4109_v5  ;;  %v1716_v17 = vadd.f32 %v1702_v62, %v1520_v55 }
 0x113   : > { %1909 = vmatpush.bf16.msrb.mxu2 %v2850_v19  ;;  %v4957_v19 = vunpack.i.l.bf16 %v4290_v57 }
 0x114   : > { %v625_v11 = vpop.f32.mrf.mxu2 }
 0x115   : > { %v909_v59 = vpop.f32.mrf.mxu3  ;;  %v1620_v29 = vmul.f32 %v3377_v63, %v625_v11  ;;  %v3342_v56 = vpop.permute.xlu1 %3341  ;;  %v5006_v11 = vunpack.i.h.bf16 %v4276_v1 }
 0x116   : > { %v950_v16 = vpop.f32.mrf.mxu0  ;;  %v3344_v51 = vunpack.i.h.bf16 %v3342_v56  ;;  %v3343_v4 = vunpack.i.l.bf16 %v3342_v56  ;;  %v4421_v56 = vpop.permute.xlu0 %3353 }
 0x117   : > { %v1507_v48 = vmul.f32 %v4967_v15, %v950_v16  ;;  %v4415_v2 = vadd.f32 %v1620_v29, %v4304_v31  ;;  %v994_v7 = vpop.f32.mrf.mxu1 }
 0x118   : > { %v1617_v45 = vmul.f32 %v3344_v51, %v4351_v47  ;;  %v1616_v46 = vmul.f32 %v3343_v4, %v4339_v33  ;;  %v1703_v63 = vmul.f32 %v5006_v11, %v994_v7  ;;  %v4963_v51 = vunpack.i.l.bf16 %v4221_v14  ;;  %v2839_v11 = vld [vmem:[#allocation5 + $0x8] sm:$0xf0] }
 0x119   : > { %v1521_v40 = vadd.f32 %v1507_v48, %v1339_v60  ;;  %v4962_v4 = vunpack.i.l.bf16 %v4333_v34 }
 0x11a   : > { %v4424_v16 = vadd.f32 %v1616_v46, %v4260_v26  ;;  %v4427_v29 = vadd.f32 %v1617_v45, %v4262_v28  ;;  %v3392_v26 = vpop.permute.xlu2 %3391  ;;  %v4958_v28 = vunpack.i.h.bf16 %v4221_v14  ;;  %v4960_v46 = vunpack.i.h.bf16 %v4333_v34 }
 0x11b   : > { %v1717_v31 = vadd.f32 %v1703_v63, %v1521_v40 }
 0x11c   : > { %v627_v33 = vpop.f32.mrf.mxu2 }
 0x11d   : > { %v911_v48 = vpop.f32.mrf.mxu3  ;;  %v4431_v47 = vpack.c.bf16 %v1717_v31, %v1716_v17  ;;  %v1621_v9 = vmul.f32 %v3378_v6, %v627_v33  ;;  %v3359_v55 = vpop.permute.xlu1 %3358  ;;  %v1340_v17 = vmul.f32 %v4963_v51, %v909_v59  ;;  %v4959_v31 = vunpack.i.h.bf16 %v4290_v57 }
 0x11e   : > { %v953_v62 = vpop.f32.mrf.mxu0  ;;  %v3361_v53 = vunpack.i.h.bf16 %v3359_v55  ;;  %v3360_v60 = vunpack.i.l.bf16 %v3359_v55  ;;  %v4457_v63 = vpop.permute.xlu0 %3381  ;;  %v1341_v33 = vmul.f32 %v4958_v28, %v911_v48 }
 0x11f   : > { %1872 = vmatmul.bf16.gmra.mxu1 %v4431_v47  ;;  %v4437_v40 = vadd.f32 %v1621_v9, %v4320_v13  ;;  %v1508_v43 = vmul.f32 %v4962_v4, %v953_v62  ;;  %v3393_v13 = vunpack.i.l.bf16 %v3392_v26 }
 0x120   : > { %v997_v45 = vpop.f32.mrf.mxu1  ;;  %v1619_v7 = vmul.f32 %v3361_v53, %v622_v49  ;;  %v1618_v6 = vmul.f32 %v3360_v60, %v4374_v42  ;;  %2831 = vmatmul.msk.bf16.gmra.mxu0 %vm847_vm4, %v4109_v5  ;;  %v3010_v42 = vld [vmem:[#allocation5 + $0x4] sm:$0xf] }
 0x121   : > { %2818 = vmatmul.msk.bf16.gmra.mxu2 %vm847_vm4, %v4141_v8  ;;  %v2842_v5 = vor.u32 %v3010_v42, %v2839_v11  ;;  %v1522_v9 = vadd.f32 %v1508_v43, %v1340_v17  ;;  %v1704_v55 = vmul.f32 %v4957_v19, %v997_v45  ;;  %v3394_v45 = vunpack.i.h.bf16 %v3392_v26 }
 0x122   : > { %2825 = vmatmul.msk.bf16.gmra.mxu3 %vm847_vm4, %v4141_v8  ;;  %v4452_v59 = vadd.f32 %v1618_v6, %v4278_v27  ;;  %v4455_v49 = vadd.f32 %v1619_v7, %v4288_v54  ;;  %v4964_v26 = vunpack.i.l.bf16 %v4206_v61 }
 0x123   : > { %1910 = vmatpush.bf16.msrb.mxu2 %v2842_v5  ;;  %v1718_v11 = vadd.f32 %v1704_v55, %v1522_v9  ;;  %v4966_v55 = vunpack.i.l.bf16 %v4345_v12 }
 0x124   : > { %v630_v62 = vpop.f32.mrf.mxu2 }
 0x125   : > { %v914_v27 = vpop.f32.mrf.mxu3  ;;  %v1622_v53 = vmul.f32 %v3393_v13, %v630_v62 }
 0x126   : > { %v955_v60 = vpop.f32.mrf.mxu0  ;;  %v4466_v7 = vpop.permute.xlu1 %3369 }
 0x127   : > { %v1509_v54 = vmul.f32 %v4960_v46, %v955_v60  ;;  %v4469_v6 = vadd.f32 %v1622_v53, %v4336_v44  ;;  %v4961_v60 = vunpack.i.l.bf16 %v4370_v38  ;;  %v3410_v53 = vpop.permute.xlu0 %3409 }
 0x128   : > { %v999_v42 = vpop.f32.mrf.mxu1 }
 0x129   : > { %5007 = vst [vmem:[#allocation28_spill] sm:$0xff] %v4469_v6  ;;  %v1523_v48 = vadd.f32 %v1509_v54, %v1341_v33  ;;  %v1705_v17 = vmul.f32 %v4959_v31, %v999_v42  ;;  %v4968_v54 = vunpack.i.h.bf16 %v4370_v38  ;;  %v4965_v42 = vunpack.i.h.bf16 %v4206_v61 }
 0x12b   : > { %v1719_v43 = vadd.f32 %v1705_v17, %v1523_v48 }
 0x12c   : > { %v632_v19 = vpop.f32.mrf.mxu2 }
 0x12d   : > { %v916_v13 = vpop.f32.mrf.mxu3  ;;  %v4473_v62 = vpack.c.bf16 %v1719_v43, %v1718_v11  ;;  %v1623_v5 = vmul.f32 %v3394_v45, %v632_v19  ;;  %v3411_v19 = vunpack.i.l.bf16 %v3410_v53  ;;  %v4969_v11 = vunpack.i.h.bf16 %v4345_v12 }
 0x12e   : > { %v958_v28 = vpop.f32.mrf.mxu0  ;;  %v4477_v44 = vpop.permute.xlu1 %3386 }
 0x12f   : > { %1877 = vmatmul.bf16.gmra.mxu1 %v4473_v62  ;;  %v4480_v33 = vadd.f32 %v1623_v5, %v4343_v39  ;;  %v1510_v39 = vmul.f32 %v4961_v60, %v958_v28  ;;  %v1343_v5 = vmul.f32 %v4965_v42, %v916_v13  ;;  %v3040_v42 = vld [vmem:[#allocation7 + $0x74] sm:$0xf] }
 0x130   : > { %v1002_v9 = vpop.f32.mrf.mxu1  ;;  %2832 = vmatmul.msk.bf16.gmra.mxu0 %vm847_vm4, %v4141_v8  ;;  %v1342_v8 = vmul.f32 %v4964_v26, %v914_v27 }
 0x131   : > { %5008 = vst [vmem:[#allocation29_spill] sm:$0xff] %v4480_v33  ;;  %2819 = vmatmul.msk.bf16.gmra.mxu2 %vm847_vm4, %v4201_v52  ;;  %v1706_v46 = vmul.f32 %v4966_v55, %v1002_v9 }
 0x132   : > { %2826 = vmatmul.msk.bf16.gmra.mxu3 %vm847_vm4, %v4201_v52  ;;  %v1524_v31 = vadd.f32 %v1510_v39, %v1342_v8  ;;  %v2957_v39 = vld [vmem:[#allocation7 + $0x70] sm:$0xf]  ;;  %v3041_v8 = vld [vmem:[#allocation7 + $0x74] sm:$0xf0] }
 0x134   : > { %v635_v48 = vpop.f32.mrf.mxu2  ;;  %v1720_v26 = vadd.f32 %v1706_v46, %v1524_v31 }
 0x135   : > { %v919_v17 = vpop.f32.mrf.mxu3  ;;  %v1624_v45 = vmul.f32 %v3411_v19, %v635_v48  ;;  %v3412_v48 = vunpack.i.h.bf16 %v3410_v53  ;;  %v2949_v53 = vld [vmem:[#allocation7 + $0x60] sm:$0xf] }
 0x136   : > { %v960_v43 = vpop.f32.mrf.mxu0 }
 0x137   : > { %v1511_v28 = vmul.f32 %v4968_v54, %v960_v43  ;;  %v4504_v60 = vadd.f32 %v1624_v45, %v4235_v30  ;;  %v4506_v51 = vpop.permute.xlu1 %3397  ;;  %v2958_v43 = vor.u32 %v3041_v8, %v2957_v39  ;;  %v2959_v30 = vld [vmem:[#allocation7 + $0x78] sm:$0xf0]  ;;  %v3037_v39 = vld [vmem:[#allocation7 + $0x54] sm:$0xf0]  ;;  %v3036_v8 = vld [vmem:[#allocation7 + $0x54] sm:$0xf] }
 0x138   : > { %v1004_v4 = vpop.f32.mrf.mxu1 }
 0x139   : > { %5009 = vst [vmem:[#allocation30_spill] sm:$0xff] %v4504_v60  ;;  %v1525_v27 = vadd.f32 %v1511_v28, %v1343_v5  ;;  %v1707_v19 = vmul.f32 %v4969_v11, %v1004_v4  ;;  %v2962_v60 = vor.u32 %v3040_v42, %v2959_v30  ;;  %v4970_v5 = vunpack.i.l.bf16 %v4308_v41  ;;  %2050 = vmatpush.bf16.msrb.mxu3 %v2958_v43  ;;  %v3038_v28 = vld [vmem:[#allocation7 + $0x64] sm:$0xf] }
 0x13b   : > { %v1721_v13 = vadd.f32 %v1707_v19, %v1525_v27  ;;  %2094 = vmatpush.bf16.msrb.mxu0 %v2962_v60  ;;  %v2951_v27 = vld [vmem:[#allocation7 + $0x68] sm:$0xf0]  ;;  %v4971_v19 = vunpack.i.l.bf16 %v4129_v21  ;;  %v4973_v60 = vunpack.i.l.bf16 %v4368_v20 }
 0x13c   : > { %v637_v9 = vpop.f32.mrf.mxu2 }
 0x13d   : > { %v921_v55 = vpop.f32.mrf.mxu3  ;;  %v4510_v15 = vpack.c.bf16 %v1721_v13, %v1720_v26  ;;  %v1625_v45 = vmul.f32 %v3412_v48, %v637_v9  ;;  %v3039_v26 = vld [vmem:[#allocation7 + $0x64] sm:$0xf0]  ;;  %v4975_v48 = vunpack.i.h.bf16 %v4308_v41  ;;  %v4972_v9 = vunpack.i.h.bf16 %v4129_v21 }
 0x13e   : > { %v963_v54 = vpop.f32.mrf.mxu0  ;;  %v2950_v42 = vor.u32 %v3039_v26, %v2949_v53  ;;  %v1344_v30 = vmul.f32 %v4971_v19, %v919_v17  ;;  %v2933_v17 = vld [vmem:[#allocation7 + $0x40] sm:$0xf]  ;;  %v3035_v19 = vld [vmem:[#allocation7 + $0x44] sm:$0xf0] }
 0x13f   : > { %1882 = vmatmul.bf16.gmra.mxu1 %v4510_v15  ;;  %v4515_v4 = vadd.f32 %v1625_v45, %v4264_v35  ;;  %v4517_v31 = vpop.permute.xlu1 %3414  ;;  %v2954_v35 = vor.u32 %v3038_v28, %v2951_v27  ;;  %v1512_v13 = vmul.f32 %v4970_v5, %v963_v54  ;;  %v2943_v28 = vld [vmem:[#allocation7 + $0x58] sm:$0xf0]  ;;  %v1345_v54 = vmul.f32 %v4972_v9, %v921_v55  ;;  %v2935_v55 = vld [vmem:[#allocation7 + $0x48] sm:$0xf0] }
 0x140   : > { %v1007_v46 = vpop.f32.mrf.mxu1  ;;  %5011 = vst [vmem:[#allocation32_spill] sm:$0xff] %v4517_v31  ;;  %2833 = vmatmul.msk.bf16.gmra.mxu0 %vm847_vm4, %v4201_v52  ;;  %2051 = vmatpush.bf16.msrb.mxu3 %v2950_v42  ;;  %v2941_v52 = vld [vmem:[#allocation7 + $0x50] sm:$0xf]  ;;  %v2946_v11 = vor.u32 %v3036_v8, %v2943_v28  ;;  %v2934_v33 = vor.u32 %v3035_v19, %v2933_v17  ;;  %v2363_v31 = vld [vmem:[#allocation8 + $0x78] sm:$0xff] }
 0x141   : > { %5010 = vst [vmem:[#allocation31_spill] sm:$0xff] %v4515_v4  ;;  %2820 = vmatmul.msk.bf16.gmra.mxu2 %vm847_vm4, %v4257_v25  ;;  %2095 = vmatpush.bf16.msrb.mxu0 %v2954_v35  ;;  %v2942_v26 = vor.u32 %v3037_v39, %v2941_v52  ;;  %v1526_v42 = vadd.f32 %v1512_v13, %v1344_v30  ;;  %v3034_v4 = vld [vmem:[#allocation7 + $0x44] sm:$0xf]  ;;  %v5012_v39 = vunpack.i.h.bf16 %v4368_v20  ;;  %v2927_v19 = vld [vmem:[#allocation7 + $0x38] sm:$0xf0] }
 0x142   : > { %2827 = vmatmul.msk.bf16.gmra.mxu3 %vm847_vm4, %v4257_v25  ;;  %v1708_v35 = vmul.f32 %v4973_v60, %v1007_v46  ;;  %v2938_v9 = vor.u32 %v3034_v4, %v2935_v55  ;;  %2364 = vmatpush.msrb.mxu1 %v2363_v31  ;;  %v3031_v31 = vld [vmem:[#allocation7 + $0x24] sm:$0xf0]  ;;  %v4984_v55 = vunpack.i.h.bf16 %v4323_v23 }
 0x144   : > { %v640_v45 = vpop.f32.mrf.mxu2  ;;  %2052 = vmatpush.bf16.msrb.mxu3 %v2942_v26  ;;  %v1722_v46 = vadd.f32 %v1708_v35, %v1526_v42  ;;  %v3033_v26 = vld [vmem:[#allocation7 + $0x34] sm:$0xf0] }
 0x145   : > { %v4534_v53 = vpop.f32.mrf.mxu3  ;;  %2096 = vmatpush.bf16.msrb.mxu0 %v2946_v11  ;;  %v2925_v11 = vld [vmem:[#allocation7 + $0x30] sm:$0xf] }
 0x146   : > { %v965_v27 = vpop.f32.mrf.mxu0 }
 0x147   : > { %v1513_v5 = vmul.f32 %v4975_v48, %v965_v27  ;;  %v3032_v48 = vld [vmem:[#allocation7 + $0x34] sm:$0xf] }
 0x148   : > { %v1009_v43 = vpop.f32.mrf.mxu1  ;;  %v3426_v28 = vpop.permute.xlu1 %3425  ;;  %2053 = vmatpush.bf16.msrb.mxu3 %v2934_v33  ;;  %v2930_v35 = vor.u32 %v3032_v48, %v2927_v19  ;;  %v2919_v48 = vld [vmem:[#allocation7 + $0x28] sm:$0xf0] }
 0x149   : > { %v1527_v52 = vadd.f32 %v1513_v5, %v1345_v54  ;;  %v1709_v8 = vmul.f32 %v5012_v39, %v1009_v43  ;;  %v3428_v13 = vunpack.i.h.bf16 %v3426_v28  ;;  %v3427_v30 = vunpack.i.l.bf16 %v3426_v28  ;;  %2097 = vmatpush.bf16.msrb.mxu0 %v2938_v9 }
 0x14a   : > { %v2926_v43 = vor.u32 %v3033_v26, %v2925_v11  ;;  %v3214_v28 = vunpack.i.l.bf16 %v4237_v32 }
 0x14b   : > { %v1723_v60 = vadd.f32 %v1709_v8, %v1527_v52  ;;  %v1626_v27 = vmul.f32 %v3427_v30, %v640_v45  ;;  %v3319_v45 = vunpack.i.l.bf16 %v4323_v23  ;;  %v3030_v52 = vld [vmem:[#allocation7 + $0x24] sm:$0xf] }
 0x14c   : > { %v642_v6 = vpop.f32.mrf.mxu2  ;;  %2054 = vmatpush.bf16.msrb.mxu3 %v2926_v43  ;;  %v2922_v8 = vor.u32 %v3030_v52, %v2919_v48  ;;  %v1346_v11 = vmul.f32 %v3214_v28, %v4534_v53 }
 0x14d   : > { %v926_v5 = vpop.f32.mrf.mxu3  ;;  %v4544_v54 = vpack.c.bf16 %v1723_v60, %v1722_v46  ;;  %v4547_v17 = vadd.f32 %v1626_v27, %v4282_v24  ;;  %v1627_v4 = vmul.f32 %v3428_v13, %v642_v6  ;;  %2098 = vmatpush.bf16.msrb.mxu0 %v2930_v35  ;;  %v2917_v60 = vld [vmem:[#allocation7 + $0x20] sm:$0xf]  ;;  %v4979_v13 = vunpack.i.l.bf16 %v4392_v18  ;;  %v3028_v46 = vld [vmem:[#allocation7 + $0x14] sm:$0xf] }
 0x14e   : > { %v968_v42 = vpop.f32.mrf.mxu0  ;;  %v2918_v6 = vor.u32 %v3031_v31, %v2917_v60  ;;  %v4978_v27 = vunpack.i.h.bf16 %v4392_v18 }
 0x14f   : > { %1887 = vmatmul.bf16.gmra.mxu1 %v4544_v54  ;;  %v4552_v33 = vadd.f32 %v1627_v4, %v4294_v50  ;;  %v2362_v50 = vld [vmem:[#allocation8 + $0x70] sm:$0xff]  ;;  %v1514_v30 = vmul.f32 %v3319_v45, %v968_v42  ;;  %v2911_v4 = vld [vmem:[#allocation7 + $0x18] sm:$0xf0] }
 0x150   : > { %v1012_v9 = vpop.f32.mrf.mxu1  ;;  %2834 = vmatmul.msk.bf16.gmra.mxu0 %vm847_vm4, %v4257_v25  ;;  %v3443_v24 = vpop.permute.xlu1 %3442  ;;  %2365 = vmatpush.msrb.mxu1 %v2362_v50  ;;  %v3029_v25 = vld [vmem:[#allocation7 + $0x14] sm:$0xf0]  ;;  %v2914_v60 = vor.u32 %v3028_v46, %v2911_v4  ;;  %v2901_v50 = vld [vmem:[#allocation7] sm:$0xf] }
 0x151   : > { %1911 = vmatmul.bf16.vlgmr.msrb.gmra.mxu2 %v4389_v58  ;;  %v3444_v39 = vunpack.i.l.bf16 %v3443_v24  ;;  %2055 = vmatpush.bf16.msrb.mxu3 %v2918_v6  ;;  %v3215_v58 = vunpack.i.h.bf16 %v4237_v32  ;;  %v2910_v19 = vor.u32 %v3029_v25, %v2909_v36  ;;  %v1528_v52 = vadd.f32 %v1514_v30, %v1346_v11  ;;  %v3026_v36 = vld [vmem:[#allocation7 + $0x4] sm:$0xf] }
 0x152   : > { %2099 = vmatpush.bf16.msrb.mxu0 %v2922_v8  ;;  %v1710_v6 = vmul.f32 %v4979_v13, %v1012_v9  ;;  %v2903_v9 = vld [vmem:[#allocation7 + $0x8] sm:$0xf0]  ;;  %v3445_v46 = vunpack.i.h.bf16 %v3443_v24 }
 0x153   : > { %v1347_v31 = vmul.f32 %v3215_v58, %v926_v5  ;;  %v2906_v11 = vor.u32 %v3026_v36, %v2903_v9 }
 0x154   : > { %v645_v26 = vpop.f32.mrf.mxu2 }
 0x155   : > { %v929_v43 = vpop.f32.mrf.mxu3  ;;  %v1628_v35 = vmul.f32 %v3444_v39, %v645_v26  ;;  %2056 = vmatpush.bf16.msrb.mxu3 %v2910_v19  ;;  %v3027_v39 = vld [vmem:[#allocation7 + $0x4] sm:$0xf0]  ;;  %v1724_v26 = vadd.f32 %v1710_v6, %v1528_v52  ;;  %v5013_v52 = vmov 67   ;;  %v2360_v6 = vld [vmem:[#allocation8 + $0x60] sm:$0xff] }
 0x156   : > { %v970_v42 = vpop.f32.mrf.mxu0  ;;  %2100 = vmatpush.bf16.msrb.mxu0 %v2914_v60  ;;  %v2902_v30 = vor.u32 %v3027_v39, %v2901_v50  ;;  %3429 = vset.pattern.permute.xlu2 %v5013_v52  ;;  %v5015_v39 = vld [vmem:[#allocation24_spill] sm:$0xff] }
 0x157   : > { %v1515_v48 = vmul.f32 %v4984_v55, %v970_v42  ;;  %v4575_v8 = vadd.f32 %v1628_v35, %v4312_v10  ;;  %v2361_v10 = vld [vmem:[#allocation8 + $0x68] sm:$0xff]  ;;  %3431 = vperm.xlu2 %3429, %v3956_v3   ;;  %v4981_v36 = vunpack.i.l.bf16 %v5015_v39 }
 0x158   : > { %v1014_v53 = vpop.f32.mrf.mxu1  ;;  %2366 = vmatpush.msrb.mxu1 %v2361_v10 }
 0x159   : > { %v1529_v25 = vadd.f32 %v1515_v48, %v1347_v31  ;;  %v1711_v5 = vmul.f32 %v4978_v27, %v1014_v53  ;;  %2057 = vmatpush.bf16.msrb.mxu3 %v2902_v30  ;;  %v4976_v48 = vunpack.i.l.bf16 %v4387_v22  ;;  %v5014_v53 = vld [vmem:[#allocation20_spill] sm:$0xff]  ;;  %v4980_v30 = vunpack.i.h.bf16 %v5015_v39 }
 0x15a   : > { %2101 = vmatpush.bf16.msrb.mxu0 %v2906_v11  ;;  %v4977_v50 = vunpack.i.l.bf16 %v5014_v53  ;;  %2367 = vmatpush.msrb.mxu1 %v2360_v6  ;;  %v2359_v6 = vld [vmem:[#allocation8 + $0x58] sm:$0xff] }
 0x15b   : > { %v1725_v4 = vadd.f32 %v1711_v5, %v1529_v25  ;;  %v4982_v25 = vunpack.i.h.bf16 %v4387_v22 }
 0x15c   : > { %v647_v19 = vpop.f32.mrf.mxu2  ;;  %v1348_v9 = vmul.f32 %v4977_v50, %v929_v43  ;;  %2368 = vmatpush.msrb.mxu1 %v2359_v6  ;;  %v5023_v6 = vld [vmem:[#allocation25_spill] sm:$0xff] }
 0x15d   : > { %v931_v35 = vpop.f32.mrf.mxu3  ;;  %v4580_v42 = vpack.c.bf16 %v1725_v4, %v1724_v26  ;;  %v1629_v60 = vmul.f32 %v3445_v46, %v647_v19 }
 0x15e   : > { %v973_v31 = vpop.f32.mrf.mxu0 }
 0x15f   : > { %1892 = vmatmul.bf16.gmra.mxu1 %v4580_v42  ;;  %v4585_v37 = vadd.f32 %v1629_v60, %v4325_v0  ;;  %v1516_v5 = vmul.f32 %v4976_v48, %v973_v31  ;;  %v4983_v0 = vunpack.i.h.bf16 %v5014_v53 }
 0x160   : > { %v1017_v24 = vpop.f32.mrf.mxu1 }
 0x161   : > { %1916 = vmatmul.bf16.gmra.mxu2 %v4431_v47  ;;  %v1349_v26 = vmul.f32 %v4983_v0, %v931_v35  ;;  %v1530_v4 = vadd.f32 %v1516_v5, %v1348_v9  ;;  %v1712_v10 = vmul.f32 %v4981_v36, %v1017_v24  ;;  %v2358_v24 = vld [vmem:[#allocation8 + $0x50] sm:$0xff]  ;;  %v5016_v5 = vld [vmem:[#allocation18_spill] sm:$0xff]  ;;  %v5017_v9 = vld [vmem:[#allocation21_spill] sm:$0xff]  ;;  %v5025_v0 = vunpack.i.h.bf16 %v5023_v6 }
 0x162   : > { %3447 = vperm.xlu2 %3429, %v5016_v5   ;;  %2369 = vmatpush.msrb.mxu1 %v2358_v24 }
 0x163   : > { %v1726_v43 = vadd.f32 %v1712_v10, %v1530_v4  ;;  %v5021_v10 = vunpack.i.h.bf16 %v5017_v9 }
 0x164   : > { %v1031_v47 = vpop.f32.mrf.mxu2 }
 0x165   : > { %v1075_v46 = vpop.f32.mrf.mxu3 }
 0x166   : > { %v975_v11 = vpop.f32.mrf.mxu0 }
 0x167   : > { %v1517_v19 = vmul.f32 %v4982_v25, %v975_v11  ;;  %v5018_v11 = vunpack.i.l.bf16 %v5017_v9  ;;  %v5026_v9 = vmov 68  }
 0x168   : > { %v1019_v60 = vpop.f32.mrf.mxu1 }
 0x169   : > { %v1531_v31 = vadd.f32 %v1517_v19, %v1349_v26  ;;  %v1713_v52 = vmul.f32 %v4980_v30, %v1019_v60  ;;  %v1350_v26 = vmul.f32 %v5018_v11, %v1031_v47  ;;  %v5019_v19 = vld [vmem:[#allocation22_spill] sm:$0xff] }
 0x16a   : > { %v5020_v60 = vunpack.i.l.bf16 %v5019_v19  ;;  %v2357_v11 = vld [vmem:[#allocation8 + $0x48] sm:$0xff]  ;;  %3452 = vset.pattern.permute.xlu2 %v5026_v9 }
 0x16b   : > { %v1727_v48 = vadd.f32 %v1713_v52, %v1531_v31  ;;  %2370 = vmatpush.msrb.mxu1 %v2357_v11 }
 0x16c   : > { %v1033_v50 = vpop.f32.mrf.mxu2  ;;  %v1532_v4 = vmul.f32 %v5020_v60, %v1075_v46 }
 0x16d   : > { %v1077_v27 = vpop.f32.mrf.mxu3  ;;  %v4607_v13 = vpack.c.bf16 %v1727_v48, %v1726_v43  ;;  %v1351_v31 = vmul.f32 %v5021_v10, %v1033_v50  ;;  %v5022_v48 = vunpack.i.h.bf16 %v5019_v19  ;;  %v5024_v43 = vunpack.i.l.bf16 %v5023_v6  ;;  %v5027_v50 = vld [vmem:[#allocation17_spill] sm:$0xff] }
 0x16e   : > { %v1119_v35 = vpop.f32.mrf.mxu0  ;;  %v5028_v19 = vunpack.c.h.bf16 %v5027_v50 }
 0x16f   : > { %1897 = vmatmul.bf16.gmra.mxu1 %v4607_v13  ;;  %v1533_v52 = vmul.f32 %v5022_v48, %v1077_v27  ;;  %v1728_v30 = vmul.f32 %v5024_v43, %v1119_v35 }
 0x170   : > { %2275 = vperm.xlu2 %3452, %v5028_v19  }
 0x171   : > { %1921 = vmatmul.bf16.gmra.mxu2 %v4473_v62  ;;  %v1546_v62 = vadd.f32 %v1532_v4, %v1350_v26  ;;  %v1547_v24 = vadd.f32 %v1533_v52, %v1351_v31  ;;  %v2356_v26 = vld [vmem:[#allocation8 + $0x40] sm:$0xff]  ;;  %v5031_v31 = vld [vmem:[#allocation23_spill] sm:$0xff] }
 0x172   : > { %2371 = vmatpush.msrb.mxu1 %v2356_v26  ;;  %v5032_v48 = vunpack.i.l.bf16 %v5031_v31  ;;  %v2354_v26 = vld [vmem:[#allocation8 + $0x30] sm:$0xff] }
 0x173   : > { %v1742_v55 = vadd.f32 %v1728_v30, %v1546_v62 }
 0x174   : > { %v1036_v36 = vpop.f32.mrf.mxu2 }
 0x175   : > { %v1080_v5 = vpop.f32.mrf.mxu3 }
 0x176   : > { %v1121_v25 = vpop.f32.mrf.mxu0  ;;  %v1534_v52 = vmul.f32 %v5032_v48, %v1080_v5  ;;  %v5039_v48 = vunpack.i.h.bf16 %v4221_v14 }
 0x177   : > { %v1729_v47 = vmul.f32 %v5025_v0, %v1121_v25  ;;  %v2355_v25 = vld [vmem:[#allocation8 + $0x38] sm:$0xff]  ;;  %v5029_v0 = vld [vmem:[#allocation19_spill] sm:$0xff] }
 0x178   : > { %v5030_v30 = vunpack.i.l.bf16 %v5029_v0  ;;  %v5033_v6 = vunpack.i.h.bf16 %v5029_v0  ;;  %2372 = vmatpush.msrb.mxu1 %v2355_v25  ;;  %v5037_v25 = vunpack.i.l.bf16 %v4221_v14 }
 0x179   : > { %v1743_v46 = vadd.f32 %v1729_v47, %v1547_v24  ;;  %v5035_v24 = vunpack.i.l.bf16 %v4276_v1 }
 0x17a   : > { %v1352_v4 = vmul.f32 %v5030_v30, %v1036_v36  ;;  %v5036_v36 = vunpack.i.h.bf16 %v4276_v1  ;;  %2373 = vmatpush.msrb.mxu1 %v2354_v26  ;;  %v5038_v1 = vunpack.i.l.bf16 %v4333_v34  ;;  %v5043_v26 = vunpack.i.l.bf16 %v4206_v61 }
 0x17b   : > { %v1947_v27 = vpack.c.bf16 %v1743_v46, %v1742_v55  ;;  %v5034_v55 = vunpack.i.h.bf16 %v5031_v31 }
 0x17c   : > { %v1038_v60 = vpop.f32.mrf.mxu2  ;;  %v1548_v9 = vadd.f32 %v1534_v52, %v1352_v4 }
 0x17d   : > { %v1082_v35 = vpop.f32.mrf.mxu3  ;;  %2058 = vmatmul.bf16.vlgmr.msrb.gmra.mxu3 %v1947_v27  ;;  %2102 = vmatmul.bf16.vlgmr.msrb.gmra.mxu0 %v1947_v27  ;;  %v1353_v43 = vmul.f32 %v5033_v6, %v1038_v60  ;;  %v5040_v6 = vunpack.i.h.bf16 %v4333_v34 }
 0x17e   : > { %v1124_v10 = vpop.f32.mrf.mxu0  ;;  %v1535_v62 = vmul.f32 %v5034_v55, %v1082_v35  ;;  %v5041_v55 = vunpack.i.l.bf16 %v4290_v57 }
 0x17f   : > { %v1730_v47 = vmul.f32 %v5035_v24, %v1124_v10  ;;  %v2353_v10 = vld [vmem:[#allocation8 + $0x28] sm:$0xff] }
 0x180   : > { %v1549_v50 = vadd.f32 %v1535_v62, %v1353_v43  ;;  %2374 = vmatpush.msrb.mxu1 %v2353_v10  ;;  %v5046_v10 = vunpack.i.h.bf16 %v4370_v38 }
 0x181   : > { %1926 = vmatmul.bf16.gmra.mxu2 %v4510_v15  ;;  %v1744_v27 = vadd.f32 %v1730_v47, %v1548_v9 }
 0x184   : > { %v1041_v11 = vpop.f32.mrf.mxu2 }
 0x185   : > { %v1085_v46 = vpop.f32.mrf.mxu3  ;;  %v1354_v4 = vmul.f32 %v5037_v25, %v1041_v11  ;;  %v5042_v11 = vunpack.i.h.bf16 %v4290_v57  ;;  %v5044_v57 = vunpack.i.l.bf16 %v4370_v38 }
 0x186   : > { %v1126_v15 = vpop.f32.mrf.mxu0  ;;  %v1536_v31 = vmul.f32 %v5038_v1, %v1085_v46 }
 0x187   : > { %v1731_v19 = vmul.f32 %v5036_v36, %v1126_v15  ;;  %v2352_v36 = vld [vmem:[#allocation8 + $0x20] sm:$0xff] }
 0x188   : > { %v1550_v47 = vadd.f32 %v1536_v31, %v1354_v4  ;;  %2375 = vmatpush.msrb.mxu1 %v2352_v36  ;;  %v5047_v4 = vunpack.i.l.bf16 %v4345_v12 }
 0x189   : > { %v1745_v5 = vadd.f32 %v1731_v19, %v1549_v50 }
 0x18b   : > { %v1948_v60 = vpack.c.bf16 %v1745_v5, %v1744_v27  ;;  %v2351_v5 = vld [vmem:[#allocation8 + $0x18] sm:$0xff] }
 0x18c   : > { %v1043_v0 = vpop.f32.mrf.mxu2  ;;  %2376 = vmatpush.msrb.mxu1 %v2351_v5 }
 0x18d   : > { %v1087_v30 = vpop.f32.mrf.mxu3  ;;  %2063 = vmatmul.bf16.gmra.mxu3 %v1948_v60  ;;  %2107 = vmatmul.bf16.gmra.mxu0 %v1948_v60  ;;  %v1355_v52 = vmul.f32 %v5039_v48, %v1043_v0 }
 0x18e   : > { %v1129_v35 = vpop.f32.mrf.mxu0  ;;  %v1537_v43 = vmul.f32 %v5040_v6, %v1087_v30  ;;  %v5045_v30 = vunpack.i.h.bf16 %v4206_v61 }
 0x18f   : > { %v1732_v62 = vmul.f32 %v5041_v55, %v1129_v35 }
 0x190   : > { %v1551_v15 = vadd.f32 %v1537_v43, %v1355_v52  ;;  %v5048_v43 = vunpack.i.h.bf16 %v4345_v12  ;;  %v5050_v12 = vunpack.i.l.bf16 %v4308_v41 }
 0x191   : > { %1931 = vmatmul.bf16.gmra.mxu2 %v4544_v54  ;;  %v1746_v50 = vadd.f32 %v1732_v62, %v1550_v47 }
 0x194   : > { %v1046_v3 = vpop.f32.mrf.mxu2 }
 0x195   : > { %v1090_v24 = vpop.f32.mrf.mxu3  ;;  %v1356_v60 = vmul.f32 %v5043_v26, %v1046_v3 }
 0x196   : > { %v1131_v54 = vpop.f32.mrf.mxu0  ;;  %v1538_v0 = vmul.f32 %v5044_v57, %v1090_v24  ;;  %v2350_v24 = vld [vmem:[#allocation8 + $0x10] sm:$0xff] }
 0x197   : > { %v1733_v9 = vmul.f32 %v5042_v11, %v1131_v54  ;;  %2377 = vmatpush.msrb.mxu1 %v2350_v24  ;;  %v5049_v11 = vunpack.i.l.bf16 %v4129_v21 }
 0x199   : > { %v1747_v46 = vadd.f32 %v1733_v9, %v1551_v15  ;;  %v2349_v15 = vld [vmem:[#allocation8 + $0x8] sm:$0xff] }
 0x19a   : > { %2378 = vmatpush.msrb.mxu1 %v2349_v15 }
 0x19b   : > { %v1949_v14 = vpack.c.bf16 %v1747_v46, %v1746_v50  ;;  %v5051_v46 = vunpack.i.h.bf16 %v4129_v21 }
 0x19c   : > { %v1048_v19 = vpop.f32.mrf.mxu2 }
 0x19d   : > { %v1092_v34 = vpop.f32.mrf.mxu3  ;;  %2068 = vmatmul.bf16.gmra.mxu3 %v1949_v14  ;;  %2112 = vmatmul.bf16.gmra.mxu0 %v1949_v14  ;;  %v1357_v35 = vmul.f32 %v5045_v30, %v1048_v19  ;;  %v5052_v14 = vunpack.i.h.bf16 %v4308_v41 }
 0x19e   : > { %v1134_v27 = vpop.f32.mrf.mxu0  ;;  %v1539_v25 = vmul.f32 %v5046_v10, %v1092_v34  ;;  %v5053_v34 = vunpack.i.l.bf16 %v4368_v20 }
 0x19f   : > { %v1734_v1 = vmul.f32 %v5047_v4, %v1134_v27  ;;  %v2348_v4 = vld [vmem:[#allocation8] sm:$0xff] }
 0x1a0   : > { %v1553_v6 = vadd.f32 %v1539_v25, %v1357_v35  ;;  %v1868_v35 = vpop.f32.mrf.mxu1  ;;  %2379 = vmatpush.msrb.mxu1 %v2348_v4 }
 0x1a1   : > { %1936 = vmatmul.bf16.gmra.mxu2 %v4580_v42  ;;  %v1552_v42 = vadd.f32 %v1538_v0, %v1356_v60  ;;  %v5054_v0 = vunpack.i.h.bf16 %v4368_v20 }
 0x1a3   : > { %v1748_v62 = vadd.f32 %v1734_v1, %v1552_v42 }
 0x1a4   : > { %v1051_v31 = vpop.f32.mrf.mxu2 }
 0x1a5   : > { %v1095_v48 = vpop.f32.mrf.mxu3  ;;  %v1358_v9 = vmul.f32 %v5049_v11, %v1051_v31 }
 0x1a6   : > { %v1136_v52 = vpop.f32.mrf.mxu0  ;;  %v1540_v50 = vmul.f32 %v5050_v12, %v1095_v48  ;;  %v5058_v12 = vld [vmem:[#allocation26_spill] sm:$0xff] }
 0x1a7   : > { %v1735_v55 = vmul.f32 %v5048_v43, %v1136_v52 }
 0x1a8   : > { %v1554_v57 = vadd.f32 %v1540_v50, %v1358_v9  ;;  %v1870_v48 = vpop.f32.mrf.mxu1  ;;  %v3349_v50 = vunpack.i.l.bf16 %v5058_v12 }
 0x1a9   : > { %v1749_v3 = vadd.f32 %v1735_v55, %v1553_v6  ;;  %v5055_v6 = vunpack.i.h.bf16 %v4323_v23  ;;  %v5056_v55 = vunpack.i.l.bf16 %v4392_v18 }
 0x1ab   : > { %v1950_v61 = vpack.c.bf16 %v1749_v3, %v1748_v62 }
 0x1ac   : > { %v1053_v54 = vpop.f32.mrf.mxu2 }
 0x1ad   : > { %v1097_v47 = vpop.f32.mrf.mxu3  ;;  %2073 = vmatmul.bf16.gmra.mxu3 %v1950_v61  ;;  %2117 = vmatmul.bf16.gmra.mxu0 %v1950_v61  ;;  %v1359_v36 = vmul.f32 %v5051_v46, %v1053_v54  ;;  %v3355_v46 = vunpack.i.l.bf16 %v4421_v56 }
 0x1ae   : > { %v1139_v38 = vpop.f32.mrf.mxu0  ;;  %v1541_v19 = vmul.f32 %v5052_v14, %v1097_v47 }
 0x1af   : > { %v1736_v27 = vmul.f32 %v5053_v34, %v1139_v38  ;;  %v5057_v38 = vunpack.i.h.bf16 %v4392_v18  ;;  %v5061_v34 = vunpack.i.h.bf16 %v5014_v53 }
 0x1b0   : > { %v1873_v9 = vpop.f32.mrf.mxu1 }
 0x1b1   : > { %1941 = vmatmul.bf16.gmra.mxu2 %v4607_v13  ;;  %v1555_v13 = vadd.f32 %v1541_v19, %v1359_v36  ;;  %v1750_v10 = vadd.f32 %v1736_v27, %v1554_v57  ;;  %v5059_v36 = vunpack.i.l.bf16 %v5014_v53  ;;  %v5060_v19 = vunpack.i.l.bf16 %v4387_v22 }
 0x1b2   : > { %v5064_v53 = vunpack.i.h.bf16 %v5015_v39 }
 0x1b4   : > { %v1056_v5 = vpop.f32.mrf.mxu2 }
 0x1b5   : > { %v1100_v26 = vpop.f32.mrf.mxu3  ;;  %v1360_v52 = vmul.f32 %v3214_v28, %v1056_v5  ;;  %v5062_v5 = vunpack.i.h.bf16 %v4387_v22 }
 0x1b6   : > { %v1141_v60 = vpop.f32.mrf.mxu0  ;;  %v1542_v42 = vmul.f32 %v3319_v45, %v1100_v26 }
 0x1b7   : > { %v1737_v30 = vmul.f32 %v5054_v0, %v1141_v60  ;;  %v5063_v60 = vunpack.i.l.bf16 %v5015_v39  ;;  %v2194_v0 = vmul.f32 %v3349_v50, %v1868_v35  ;;  %v3356_v35 = vunpack.i.h.bf16 %v4421_v56 }
 0x1b8   : > { %v1556_v54 = vadd.f32 %v1542_v42, %v1360_v52  ;;  %v3350_v52 = vunpack.i.h.bf16 %v5058_v12 }
 0x1b9   : > { %v1751_v25 = vadd.f32 %v1737_v30, %v1555_v13 }
 0x1bb   : > { %v1951_v21 = vpack.c.bf16 %v1751_v25, %v1750_v10  ;;  %v1875_v25 = vpop.f32.mrf.mxu1 }
 0x1bc   : > { %v1058_v1 = vpop.f32.mrf.mxu2 }
 0x1bd   : > { %v1102_v41 = vpop.f32.mrf.mxu3  ;;  %2078 = vmatmul.bf16.gmra.mxu3 %v1951_v21  ;;  %2122 = vmatmul.bf16.gmra.mxu0 %v1951_v21  ;;  %v1361_v20 = vmul.f32 %v3215_v58, %v1058_v1 }
 0x1be   : > { %v1144_v31 = vpop.f32.mrf.mxu0  ;;  %v1543_v43 = vmul.f32 %v5055_v6, %v1102_v41 }
 0x1bf   : > { %v1738_v62 = vmul.f32 %v5056_v55, %v1144_v31 }
 0x1c0   : > { %v1557_v47 = vadd.f32 %v1543_v43, %v1361_v20  ;;  %v2195_v43 = vmul.f32 %v3350_v52, %v1870_v48 }
 0x1c1   : > { %v1752_v15 = vadd.f32 %v1738_v62, %v1556_v54 }
 0x1c3   : > { %v1878_v62 = vpop.f32.mrf.mxu1 }
 0x1c4   : > { %v1061_v3 = vpop.f32.mrf.mxu2 }
 0x1c5   : > { %v1105_v24 = vpop.f32.mrf.mxu3  ;;  %v1362_v14 = vmul.f32 %v5059_v36, %v1061_v3  ;;  %v5065_v3 = vld [vmem:[#allocation27_spill] sm:$0xff] }
 0x1c6   : > { %v1146_v61 = vpop.f32.mrf.mxu0  ;;  %v1544_v18 = vmul.f32 %v5060_v19, %v1105_v24  ;;  %v3365_v24 = vunpack.i.l.bf16 %v5065_v3 }
 0x1c7   : > { %v1739_v28 = vmul.f32 %v5057_v38, %v1146_v61  ;;  %v3371_v61 = vunpack.i.l.bf16 %v4466_v7 }
 0x1c8   : > { %v1558_v4 = vadd.f32 %v1544_v18, %v1362_v14  ;;  %v3388_v14 = vunpack.i.l.bf16 %v4477_v44 }
 0x1c9   : > { %v1753_v11 = vadd.f32 %v1739_v28, %v1557_v47  ;;  %v2196_v47 = vmul.f32 %v3365_v24, %v1873_v9  ;;  %v3366_v28 = vunpack.i.h.bf16 %v5065_v3 }
 0x1cb   : > { %v1952_v45 = vpack.c.bf16 %v1753_v11, %v1752_v15  ;;  %v1880_v11 = vpop.f32.mrf.mxu1 }
 0x1cc   : > { %v1063_v32 = vpop.f32.mrf.mxu2 }
 0x1cd   : > { %2083 = vmatmul.bf16.gmra.mxu3 %v1952_v45  ;;  %2127 = vmatmul.bf16.gmra.mxu0 %v1952_v45  ;;  %v1107_v58 = vpop.f32.mrf.mxu3  ;;  %v1363_v27 = vmul.f32 %v5061_v34, %v1063_v32  ;;  %v3372_v45 = vunpack.i.h.bf16 %v4466_v7 }
 0x1ce   : > { %v1149_v23 = vpop.f32.mrf.mxu0  ;;  %v1545_v26 = vmul.f32 %v5062_v5, %v1107_v58  ;;  %v3383_v58 = vunpack.i.l.bf16 %v4457_v63  ;;  %v3384_v5 = vunpack.i.h.bf16 %v4457_v63 }
 0x1cf   : > { %v1740_v57 = vmul.f32 %v5063_v60, %v1149_v23  ;;  %v3389_v60 = vunpack.i.h.bf16 %v4477_v44 }
 0x1d0   : > { %v1559_v21 = vadd.f32 %v1545_v26, %v1363_v27  ;;  %v2198_v18 = vmul.f32 %v3383_v58, %v1878_v62  ;;  %v5067_v62 = vld [vmem:[#allocation32_spill] sm:$0xff] }
 0x1d1   : > { %v1754_v22 = vadd.f32 %v1740_v57, %v1558_v4  ;;  %v2199_v57 = vmul.f32 %v3384_v5, %v1880_v11 }
 0x1d4   : > { %v1912_v13 = vpop.f32.mrf.mxu2 }
 0x1d5   : > { %v2278_v30 = vmul.f32 %v3355_v46, %v1912_v13 }
 0x1d6   : > { %v1151_v10 = vpop.f32.mrf.mxu0 }
 0x1d7   : > { %v1741_v1 = vmul.f32 %v5064_v53, %v1151_v10  ;;  %v2292_v41 = vadd.f32 %v2278_v30, %v2194_v0  ;;  %v4745_v10 = vpop.permute.xlu2 %3403 }
 0x1d8   : > { %v3405_v4 = vunpack.i.l.bf16 %v4745_v10 }
 0x1d9   : > { %v1755_v31 = vadd.f32 %v1741_v1, %v1559_v21  ;;  %v2334_v42 = vmul.f32 %v2292_v41, %v4424_v16 }
 0x1db   : > { %v1953_v20 = vpack.c.bf16 %v1755_v31, %v1754_v22  ;;  %2380 = vmatmul.f32.vlgmr.msrb.gmra.mxu1 %v2334_v42  ;;  %v3400_v31 = vunpack.i.h.bf16 %v4506_v51  ;;  %v5066_v42 = vld [vmem:[#allocation28_spill] sm:$0xff] }
 0x1dc   : > { %v1914_v6 = vpop.f32.mrf.mxu2 }
 0x1dd   : > { %2088 = vmatmul.bf16.gmra.mxu3 %v1953_v20  ;;  %2132 = vmatmul.bf16.gmra.mxu0 %v1953_v20  ;;  %v2279_v39 = vmul.f32 %v3356_v35, %v1914_v6  ;;  %v3406_v6 = vunpack.i.h.bf16 %v4745_v10 }
 0x1df   : > { %v2293_v55 = vadd.f32 %v2279_v39, %v2195_v43 }
 0x1e1   : > { %v2335_v16 = vmul.f32 %v2293_v55, %v4427_v29  ;;  %v2197_v29 = vmul.f32 %v3366_v28, %v1875_v25  ;;  %v3399_v25 = vunpack.i.l.bf16 %v4506_v51 }
 0x1e3   : > { %2383 = vmatmul.f32.gmra.mxu1 %v2335_v16  ;;  %v3416_v16 = vunpack.i.l.bf16 %v5067_v62 }
 0x1e4   : > { %v1917_v54 = vpop.f32.mrf.mxu2 }
 0x1e5   : > { %v2280_v38 = vmul.f32 %v3371_v61, %v1917_v54  ;;  %v5068_v54 = vld [vmem:[#allocation29_spill] sm:$0xff] }
 0x1e7   : > { %v2294_v48 = vadd.f32 %v2280_v38, %v2196_v47  ;;  %v4763_v38 = vpop.permute.xlu2 %3419 }
 0x1e9   : > { %v2336_v15 = vmul.f32 %v2294_v48, %v4452_v59  ;;  %v1883_v59 = vpop.f32.mrf.mxu1 }
 0x1ea   : > { %v2200_v53 = vmul.f32 %v3399_v25, %v1883_v59 }
 0x1eb   : > { %2386 = vmatmul.f32.gmra.mxu1 %v2336_v15  ;;  %v3421_v15 = vunpack.i.l.bf16 %v4763_v38 }
 0x1ec   : > { %v1919_v32 = vpop.f32.mrf.mxu2 }
 0x1ed   : > { %v2281_v23 = vmul.f32 %v3372_v45, %v1919_v32 }
 0x1ef   : > { %v2295_v9 = vadd.f32 %v2281_v23, %v2197_v29 }
 0x1f1   : > { %v2337_v36 = vmul.f32 %v2295_v9, %v4455_v49  ;;  %v1885_v0 = vpop.f32.mrf.mxu1  ;;  %v3417_v9 = vunpack.i.h.bf16 %v5067_v62 }
 0x1f3   : > { %2389 = vmatmul.f32.gmra.mxu1 %v2337_v36  ;;  %v5069_v36 = vld [vmem:[#allocation30_spill] sm:$0xff] }
 0x1f4   : > { %v1922_v19 = vpop.f32.mrf.mxu2 }
 0x1f5   : > { %v2282_v34 = vmul.f32 %v3388_v14, %v1922_v19  ;;  %v3422_v19 = vunpack.i.h.bf16 %v4763_v38 }
 0x1f7   : > { %v2296_v27 = vadd.f32 %v2282_v34, %v2198_v18 }
 0x1f9   : > { %v2338_v26 = vmul.f32 %v2296_v27, %v4415_v2  ;;  %v1888_v22 = vpop.f32.mrf.mxu1 }
 0x1fa   : > { %v2202_v32 = vmul.f32 %v3416_v16, %v1888_v22 }
 0x1fb   : > { %2392 = vmatmul.f32.gmra.mxu1 %v2338_v26 }
 0x1fc   : > { %v1924_v49 = vpop.f32.mrf.mxu2 }
 0x1fd   : > { %v2283_v13 = vmul.f32 %v3389_v60, %v1924_v49  ;;  %v4777_v49 = vpop.permute.xlu2 %3431 }
 0x1ff   : > { %v2297_v30 = vadd.f32 %v2283_v13, %v2199_v57  ;;  %v4779_v57 = vpop.permute.xlu0 %3437 }
 0x201   : > { %v2339_v2 = vmul.f32 %v2297_v30, %v4437_v40  ;;  %v2201_v40 = vmul.f32 %v3400_v31, %v1885_v0  ;;  %v1890_v48 = vpop.f32.mrf.mxu1  ;;  %v3433_v0 = vunpack.i.l.bf16 %v4777_v49  ;;  %v3439_v30 = vunpack.i.l.bf16 %v4779_v57 }
 0x202   : > { %v2203_v27 = vmul.f32 %v3417_v9, %v1890_v48 }
 0x203   : > { %2395 = vmatmul.f32.gmra.mxu1 %v2339_v2  ;;  %v5070_v2 = vld [vmem:[#allocation31_spill] sm:$0xff] }
 0x204   : > { %v1927_v21 = vpop.f32.mrf.mxu2 }
 0x205   : > { %v2284_v1 = vmul.f32 %v3405_v4, %v1927_v21 }
 0x207   : > { %v2298_v41 = vadd.f32 %v2284_v1, %v2200_v53 }
 0x209   : > { %v2340_v20 = vmul.f32 %v2298_v41, %v5066_v42  ;;  %v1893_v18 = vpop.f32.mrf.mxu1 }
 0x20a   : > { %v2204_v1 = vmul.f32 %v3433_v0, %v1893_v18  ;;  %v2059_v18 = vpop.f32.mrf.mxu3 }
 0x20b   : > { %2398 = vmatmul.f32.gmra.mxu1 %v2340_v20  ;;  %v3434_v20 = vunpack.i.h.bf16 %v4777_v49 }
 0x20c   : > { %v1929_v43 = vpop.f32.mrf.mxu2 }
 0x20d   : > { %v2285_v39 = vmul.f32 %v3406_v6, %v1929_v43 }
 0x20f   : > { %v2299_v55 = vadd.f32 %v2285_v39, %v2201_v40  ;;  %v3440_v40 = vunpack.i.h.bf16 %v4779_v57 }
 0x211   : > { %v2341_v47 = vmul.f32 %v2299_v55, %v5068_v54  ;;  %v1895_v22 = vpop.f32.mrf.mxu1 }
 0x212   : > { %v2205_v55 = vmul.f32 %v3434_v20, %v1895_v22  ;;  %v2061_v22 = vpop.f32.mrf.mxu3 }
 0x213   : > { %2401 = vmatmul.f32.gmra.mxu1 %v2341_v47  ;;  %v4795_v47 = vpop.permute.xlu2 %3447 }
 0x214   : > { %v1932_v11 = vpop.f32.mrf.mxu2 }
 0x215   : > { %v2286_v29 = vmul.f32 %v3421_v15, %v1932_v11 }
 0x217   : > { %v2300_v23 = vadd.f32 %v2286_v29, %v2202_v32  ;;  %v3449_v32 = vunpack.i.l.bf16 %v4795_v47 }
 0x219   : > { %v2342_v59 = vmul.f32 %v2300_v23, %v5069_v36  ;;  %v1898_v11 = vpop.f32.mrf.mxu1  ;;  %v4799_v23 = vpop.permute.xlu1 %2271 }
 0x21a   : > { %v2206_v36 = vmul.f32 %v3449_v32, %v1898_v11 }
 0x21b   : > { %2404 = vmatmul.f32.gmra.mxu1 %v2342_v59 }
 0x21c   : > { %v1934_v34 = vpop.f32.mrf.mxu2 }
 0x21d   : > { %v2287_v26 = vmul.f32 %v3422_v19, %v1934_v34 }
 0x21f   : > { %v2301_v13 = vadd.f32 %v2287_v26, %v2203_v27  ;;  %v2103_v27 = vpop.f32.mrf.mxu0  ;;  %v3450_v26 = vunpack.i.h.bf16 %v4795_v47 }
 0x221   : > { %v2343_v21 = vmul.f32 %v2301_v13, %v5070_v2  ;;  %v1900_v2 = vpop.f32.mrf.mxu1 }
 0x223   : > { %2407 = vmatmul.f32.gmra.mxu1 %v2343_v21 }
 0x224   : > { %v1937_v53 = vpop.f32.mrf.mxu2 }
 0x225   : > { %v2288_v41 = vmul.f32 %v3439_v30, %v1937_v53  ;;  %v2207_v53 = vmul.f32 %v3450_v26, %v1900_v2 }
 0x227   : > { %v2302_v42 = vadd.f32 %v2288_v41, %v2204_v1 }
 0x229   : > { %v2344_v43 = vmul.f32 %v2302_v42, %v4547_v17 }
 0x22b   : > { %2410 = vmatmul.f32.gmra.mxu1 %v2344_v43  ;;  %v2105_v43 = vpop.f32.mrf.mxu0 }
 0x22c   : > { %v1939_v39 = vpop.f32.mrf.mxu2 }
 0x22d   : > { %v2289_v54 = vmul.f32 %v3440_v40, %v1939_v39  ;;  %v2064_v39 = vpop.f32.mrf.mxu3 }
 0x22f   : > { %v2303_v48 = vadd.f32 %v2289_v54, %v2205_v55 }
 0x231   : > { %v2345_v29 = vmul.f32 %v2303_v48, %v4552_v33  ;;  %v4806_v33 = vpop.permute.xlu2 %2275  ;;  %v2306_v48 = vmul.f32 %v3355_v46, %v2103_v27 }
 0x233   : > { %2413 = vmatmul.f32.gmra.mxu1 %v2345_v29  ;;  %v2108_v55 = vpop.f32.mrf.mxu0 }
 0x234   : > { %v1942_v17 = vpop.f32.mrf.mxu2  ;;  %v2308_v12 = vmul.f32 %v3371_v61, %v2108_v55 }
 0x235   : > { %v2290_v59 = vmul.f32 %v4799_v23, %v1942_v17  ;;  %v2066_v54 = vpop.f32.mrf.mxu3 }
 0x237   : > { %v2304_v34 = vadd.f32 %v2290_v59, %v2206_v36 }
 0x239   : > { %v2346_v13 = vmul.f32 %v2304_v34, %v4575_v8  ;;  %v2208_v8 = vmul.f32 %v3349_v50, %v2059_v18  ;;  %v2307_v50 = vmul.f32 %v3356_v35, %v2105_v43  ;;  %v2211_v35 = vmul.f32 %v3366_v28, %v2066_v54 }
 0x23b   : > { %2416 = vmatmul.f32.gmra.mxu1 %v2346_v13  ;;  %v2110_v11 = vpop.f32.mrf.mxu0  ;;  %v2320_v29 = vadd.f32 %v2306_v48, %v2208_v8  ;;  %v2210_v13 = vmul.f32 %v3365_v24, %v2064_v39 }
 0x23c   : > { %v1944_v21 = vpop.f32.mrf.mxu2 }
 0x23d   : > { %v2291_v1 = vmul.f32 %v4806_v33, %v1944_v21  ;;  %v2069_v59 = vpop.f32.mrf.mxu3 }
 0x23e   : > { %v2212_v61 = vmul.f32 %v3383_v58, %v2069_v59 }
 0x23f   : > { %v2305_v41 = vadd.f32 %v2291_v1, %v2207_v53  ;;  %v2309_v1 = vmul.f32 %v3372_v45, %v2110_v11 }
 0x241   : > { %v2347_v42 = vmul.f32 %v2305_v41, %v4585_v37  ;;  %v2209_v37 = vmul.f32 %v3350_v52, %v2061_v22  ;;  %v2322_v52 = vadd.f32 %v2308_v12, %v2210_v13  ;;  %v2323_v41 = vadd.f32 %v2309_v1, %v2211_v35 }
 0x243   : > { %2419 = vmatmul.f32.gmra.mxu1 %v2347_v42  ;;  %v2321_v18 = vadd.f32 %v2307_v50, %v2209_v37  ;;  %v2113_v34 = vpop.f32.mrf.mxu0 }
 0x244   : > { %v2310_v39 = vmul.f32 %v3388_v14, %v2113_v34 }
 0x245   : > { %v2071_v2 = vpop.f32.mrf.mxu3 }
 0x246   : > { %v2324_v3 = vadd.f32 %v2310_v39, %v2212_v61  ;;  %v2213_v7 = vmul.f32 %v3384_v5, %v2071_v2 }
 0x24b   : > { %v2115_v56 = vpop.f32.mrf.mxu0 }
 0x24c   : > { %v2311_v8 = vmul.f32 %v3389_v60, %v2115_v56 }
 0x24d   : > { %v2074_v42 = vpop.f32.mrf.mxu3 }
 0x24e   : > { %v2325_v58 = vadd.f32 %v2311_v8, %v2213_v7 }
 0x253   : > { %v2118_v43 = vpop.f32.mrf.mxu0 }
 0x254   : > { %v2312_v14 = vmul.f32 %v3405_v4, %v2118_v43 }
 0x255   : > { %v2076_v45 = vpop.f32.mrf.mxu3 }
 0x256   : > { %v2215_v44 = vmul.f32 %v3400_v31, %v2076_v45 }
 0x258   : > { %v2381_v17 = vpop.f32.mrf.mxu1 }
 0x259   : > { %v2423_v36 = vadd.f32 %v2381_v17, %v2320_v29  ;;  %v2214_v29 = vmul.f32 %v3399_v25, %v2074_v42 }
 0x25b   : > { %2437 = vst [vmem:[%s4821_s17] sm:$0xff] %v2423_v36  ;;  %v2120_v54 = vpop.f32.mrf.mxu0  ;;  %v2326_v5 = vadd.f32 %v2312_v14, %v2214_v29 }
 0x25c   : > { %v2313_v60 = vmul.f32 %v3406_v6, %v2120_v54 }
 0x25d   : > { %v2079_v63 = vpop.f32.mrf.mxu3 }
 0x25e   : > { %v2327_v50 = vadd.f32 %v2313_v60, %v2215_v44  ;;  %v2216_v4 = vmul.f32 %v3416_v16, %v2079_v63 }
 0x260   : > { %v2384_v46 = vpop.f32.mrf.mxu1 }
 0x261   : > { %v2424_v27 = vadd.f32 %v2384_v46, %v2321_v18 }
 0x263   : > { %2438 = vst [vmem:[%s4821_s17 + $0x8] sm:$0xff] %v2424_v27  ;;  %v2123_v17 = vpop.f32.mrf.mxu0 }
 0x264   : > { %v2314_v46 = vmul.f32 %v3421_v15, %v2123_v17 }
 0x265   : > { %v2081_v25 = vpop.f32.mrf.mxu3 }
 0x266   : > { %v2328_v51 = vadd.f32 %v2314_v46, %v2216_v4  ;;  %v2217_v10 = vmul.f32 %v3417_v9, %v2081_v25 }
 0x268   : > { %v2387_v21 = vpop.f32.mrf.mxu1 }
 0x269   : > { %v2425_v53 = vadd.f32 %v2387_v21, %v2322_v52 }
 0x26b   : > { %2439 = vst [vmem:[%s4821_s17 + $0x10] sm:$0xff] %v2425_v53  ;;  %v2125_v34 = vpop.f32.mrf.mxu0 }
 0x26c   : > { %v2315_v12 = vmul.f32 %v3422_v19, %v2125_v34 }
 0x26d   : > { %v2084_v13 = vpop.f32.mrf.mxu3 }
 0x26e   : > { %v2329_v52 = vadd.f32 %v2315_v12, %v2217_v10  ;;  %v2218_v21 = vmul.f32 %v3433_v0, %v2084_v13 }
 0x270   : > { %v2390_v24 = vpop.f32.mrf.mxu1 }
 0x271   : > { %v2426_v22 = vadd.f32 %v2390_v24, %v2323_v41 }
 0x273   : > { %2440 = vst [vmem:[%s4821_s17 + $0x18] sm:$0xff] %v2426_v22  ;;  %v2128_v6 = vpop.f32.mrf.mxu0 }
 0x274   : > { %v2316_v53 = vmul.f32 %v3439_v30, %v2128_v6 }
 0x275   : > { %v2086_v15 = vpop.f32.mrf.mxu3 }
 0x276   : > { %v2330_v9 = vadd.f32 %v2316_v53, %v2218_v21  ;;  %v2219_v38 = vmul.f32 %v3434_v20, %v2086_v15 }
 0x278   : > { %v2393_v55 = vpop.f32.mrf.mxu1 }
 0x279   : > { %v2427_v28 = vadd.f32 %v2393_v55, %v2324_v3 }
 0x27b   : > { %2441 = vst [vmem:[%s4821_s17 + $0x20] sm:$0xff] %v2427_v28  ;;  %v2130_v62 = vpop.f32.mrf.mxu0 }
 0x27c   : > { %v2317_v19 = vmul.f32 %v3440_v40, %v2130_v62 }
 0x27d   : > { %v2089_v1 = vpop.f32.mrf.mxu3 }
 0x27e   : > { %v2331_v0 = vadd.f32 %v2317_v19, %v2219_v38  ;;  %v2220_v30 = vmul.f32 %v3449_v32, %v2089_v1 }
 0x280   : > { %v2396_v48 = vpop.f32.mrf.mxu1 }
 0x281   : > { %v2428_v11 = vadd.f32 %v2396_v48, %v2325_v58 }
 0x283   : > { %2442 = vst [vmem:[%s4821_s17 + $0x28] sm:$0xff] %v2428_v11  ;;  %v2133_v41 = vpop.f32.mrf.mxu0 }
 0x284   : > { %v2318_v42 = vmul.f32 %v4799_v23, %v2133_v41 }
 0x285   : > { %v2091_v20 = vpop.f32.mrf.mxu3 }
 0x286   : > { %v2332_v49 = vadd.f32 %v2318_v42, %v2220_v30  ;;  %v2221_v43 = vmul.f32 %v3450_v26, %v2091_v20 }
 0x288   : > { %v2399_v36 = vpop.f32.mrf.mxu1 }
 0x289   : > { %v2429_v37 = vadd.f32 %v2399_v36, %v2326_v5 }
 0x28b   : > { %2443 = vst [vmem:[%s4821_s17 + $0x30] sm:$0xff] %v2429_v37  ;;  %v2135_v61 = vpop.f32.mrf.mxu0 }
 0x28c   : > { %v2319_v32 = vmul.f32 %v4806_v33, %v2135_v61 }
 0x28e   : > { %v2333_v23 = vadd.f32 %v2319_v32, %v2221_v43 }
 0x290   : > { %v2402_v59 = vpop.f32.mrf.mxu1 }
 0x291   : > { %v2430_v18 = vadd.f32 %v2402_v59, %v2327_v50 }
 0x293   : > { %2444 = vst [vmem:[%s4821_s17 + $0x38] sm:$0xff] %v2430_v18 }
 0x298   : > { %v2405_v31 = vpop.f32.mrf.mxu1 }
 0x299   : > { %v2431_v27 = vadd.f32 %v2405_v31, %v2328_v51 }
 0x29b   : > { %2445 = vst [vmem:[%s4821_s17 + $0x40] sm:$0xff] %v2431_v27 }
 0x2a0   : > { %v2408_v2 = vpop.f32.mrf.mxu1 }
 0x2a1   : > { %v2432_v16 = vadd.f32 %v2408_v2, %v2329_v52 }
 0x2a3   : > { %2446 = vst [vmem:[%s4821_s17 + $0x48] sm:$0xff] %v2432_v16 }
 0x2a8   : > { %v2411_v56 = vpop.f32.mrf.mxu1 }
 0x2a9   : > { %v2433_v35 = vadd.f32 %v2411_v56, %v2330_v9 }
 0x2ab   : > { %2447 = vst [vmem:[%s4821_s17 + $0x50] sm:$0xff] %v2433_v35 }
 0x2b0   : > { %v2414_v24 = vpop.f32.mrf.mxu1 }
 0x2b1   : > { %v2434_v22 = vadd.f32 %v2414_v24, %v2331_v0 }
 0x2b3   : > { %2448 = vst [vmem:[%s4821_s17 + $0x58] sm:$0xff] %v2434_v22 }
 0x2b8   : > { %v2417_v57 = vpop.f32.mrf.mxu1 }
 0x2b9   : > { %v2435_v40 = vadd.f32 %v2417_v57, %v2332_v49 }
 0x2bb   : > { %2449 = vst [vmem:[%s4821_s17 + $0x60] sm:$0xff] %v2435_v40 }
 0x2c0   : > { %v2420_v39 = vpop.f32.mrf.mxu1 }
 0x2c1   : > { %v2436_v3 = vadd.f32 %v2420_v39, %v2333_v23 }
 0x2c3   : > { %2450 = vst [vmem:[%s4821_s17 + $0x68] sm:$0xff] %v2436_v3 }
 0x2c4   : > { %3600 = shalt.err (!%p3597_p8)
}
 0x2c5   : > { %s3666_s9 = smov 128   ;;  %s3667_s14 = smov 8  }
 0x2c6   : > { %3066 = dma.vmem_to_hbm [thread:$0]  (%p3746_p5), %s2465_s18, 1792, %s2467_s28, %s2452_s8, %s3666_s9, %s3666_s9, %s3667_s14  }
 0x2c7 PF: > { %p3093_p9 = scmp.ge.s32.totalorder %s3647_s27, 2  ;;  %s2481_s23 = sand.u32 1, %s3635_s24  }
 0x2c8   : > { %s2482_s15 = scalar_lea.sflag [#allocation4], %s2481_s23 }
 0x2c9   : > { %p3082_p10 = pnand %p3093_p9, %p3750_p6 }
 0x2cb   : > { %p3083_p11 = pneg %p3082_p10 }
 0x2cd   : > { %3630 = dma.done.wait (%p3083_p11), %s2482_s15, 1792  }
 0x2ce   : > { %3632 = vsyncadd (%p3083_p11), %s2482_s15, 4294965504  ;;  %s5071_s17 = sld [smem:[#allocation15_spill]]  ;;  %p20_p12 = scmp.ge.s32.totalorder %s3733_s30, 4  }
 0x2cf   : > { %s5072_s26 = sld [smem:[#allocation16_spill]]  ;;  %s5073_s24 = smov %s3639_s25 }
 0x2d0   : > { %s5075_s27 = smov %s3733_s30  ;;  %22 = sbr.rel (!%p20_p12) target bundleno = 9 (0x9), region = 103 }
 0x2d4   : > { %s5074_s25 = smov %s5071_s17 }
 0x2d5   :  { %2488 = vsyncpa [#allocation3], 1 }
 0x2d6   :  { %2490 = vsyncpa [#allocation3 + $0x1], 1 }
 0x2d7   :  { %2491 = vsyncpa [#allocation6], 1 }
 0x2d8   :  { %2492 = vsyncpa [#allocation9], 1 }
 0x2d9   :  { %2493 = vsyncpa [#allocation4], 1 }
 0x2da   :  { %2495 = vsyncpa [#allocation4 + $0x1], 1 }

// kernel: tpu_custom_call.1
= control target key start
LH: loop header
LB: loop body
LE: loop exit
PB: predicated region body
PF: predicated region fallthrough
CT: control target
= control target key end

     0   :  { %s4919_s0 = inlined_call_operand.vmem [shape: bf16[224,35], index: 0, kind: input, shape index: {}]   ;;  %s4920_s1 = inlined_call_operand.vmem [shape: bf16[224,69], index: 1, kind: input, shape index: {}]   ;;  %s4921_s2 = inlined_call_operand.hbm [shape: bf16[35,384], index: 2, kind: input, shape index: {}]   ;;  %s4922_s3 = inlined_call_operand.vmem [shape: bf16[69,768], index: 3, kind: input, shape index: {}]   ;;  %s4923_s4 = inlined_call_operand.hbm [shape: bf16[128,256], index: 4, kind: input, shape index: {}]   ;;  %s4924_s5 = inlined_call_operand.hbm [shape: bf16[128,256], index: 5, kind: input, shape index: {}]   ;;  %s4925_s6 = inlined_call_operand.hbm [shape: f32[128,128], index: 6, kind: input, shape index: {}]   ;;  %s4926_s7 = inlined_call_operand.hbm [shape: f32[224,128], index: 7, kind: output, shape index: {}]  }
   0x1   :  { %4985 = sst [smem:[#allocation33_spill]] %s4921_s2 }
   0x2   :  { %4986 = sst [smem:[#allocation34_spill]] %s4923_s4 }
   0x3   :  { %12 = vsyncpa [#allocation3], 0 }
   0x4   :  { %13 = vsyncpa [#allocation6], 0 }
   0x5   :  { %14 = vsyncpa [#allocation9], 0 }
   0x6   :  { %15 = vsyncpa [#allocation4], 0 }
   0x7   :  { %17 = vsyncpa [#allocation4 + $0x1], 0  ;;  %s3708_s24 = smov 0   ;;  %s3710_s25 = smov 0  }
   0x8   :  { %s3712_s26 = smov 0   ;;  %s3714_s27 = smov 0  }
   0x9 LB: > { %4987 = sst [smem:[#allocation15_spill]] %s3643_s26  ;;  %s3729_s28 = sadd.s32 4294967295, %s3647_s27   ;;  %s3647_s27 = sphi %s3714_s27, %s5075_s27   ;;  %s3643_s26 = sphi %s3712_s26, %s5072_s26   ;;  %s3639_s25 = sphi %s3710_s25, %s5074_s25   ;;  %s3635_s24 = sphi %s3708_s24, %s5073_s24  }
   0xa   : > { %s2582_s29 = sadd.s32 4294967294, %s3647_s27   ;;  %s3733_s30 = sadd.s32 1, %s3647_s27  }
   0xb   : > { %s187_s8 = sadd.s32 1, %s3643_s26  ;;  %s184_s9 = ssub.s32 %s3647_s27, %s3733_s30 }
   0xc   : > { %p197_p0 = scmp.ne.s32.totalorder %s3643_s26, %s3639_s25  ;;  %p185_p1 = scmp.eq.s32.totalorder %s184_s9, 0 }
   0xd   : > { %p198_p2 = scmp.eq.s32.totalorder %s3729_s28, 1  ;;  %p203_p3 = scmp.ne.s32.totalorder %s3639_s25, %s3635_s24 }
   0xe   : > { %p204_p4 = scmp.eq.s32.totalorder %s2582_s29, 1  ;;  %p2583_p7 = scmp.ge.s32.totalorder %s3647_s27, 1 }
   0xf   : > { %s3744_s10 = scalar_select %p185_p1, %s3643_s26, %s187_s8  }
  0x10   : > { %p3746_p5 = por %p198_p2, %p197_p0  ;;  %p3750_p6 = por %p204_p4, %p203_p3 }
  0x11   : > { %4988 = sst [smem:[#allocation16_spill]] %s3744_s10  ;;  %p211_p8 = scmp.lt.s32.totalorder %s3647_s27, 3 }
  0x12   : > { %p3085_p9 = scmp.eq.s32.totalorder %s3729_s28, 0  ;;  %s4992_s4 = sld [smem:[#allocation34_spill]] }
  0x13   : > { %p3757_p10 = pnand %p2583_p7, %p211_p8  ;;  %s3649_s17 = smov [#allocation5]  }
  0x14   : > { %s241_s18 = sshll.u32 %s3649_s17, 4  ;;  %s4994_s2 = sld [smem:[#allocation33_spill]]  ;;  %s242_s18 = int_to_ptr.vmem [resolvable:$true] %s241_s18 }
  0x15   : > { %p3068_p11 = pneg %p3757_p10  ;;  %s3650_s23 = smov 128  }
  0x16   : > { %s3651_s29 = smov 8   ;;  %s3652_s8 = smov [#allocation2]  }
  0x17   : > { %p3768_p12 = pnand %p3085_p9, %p3068_p11  ;;  %s224_s9 = sshll.u32 %s3652_s8, 4  ;;  %s225_s9 = int_to_ptr.vmem [resolvable:$true] %s224_s9 }
  0x18   : > { %s239_s16 = sshll.u32 %s4992_s4, 4  ;;  %s3653_s14 = smov 192   ;;  %s240_s16 = int_to_ptr.hbm [resolvable:$true] %s239_s16 }
  0x19   : > { %3074 = dma.hbm_to_vmem [thread:$0]  (!%p3768_p12), %s240_s16, 2048, %s242_s18, [#allocation6], %s3650_s23, %s3650_s23, %s3651_s29  }
  0x1a   : > { %s222_s22 = sshll.u32 %s4994_s2, 4  ;;  %s3654_s15 = smov 12   ;;  %s223_s22 = int_to_ptr.hbm [resolvable:$true] %s222_s22 }
  0x1b   : > { %3071 = dma.hbm_to_vmem [thread:$0]  (!%p3768_p12), %s223_s22, 960, %s225_s9, [#allocation3], %s3653_s14, %s3653_s14, %s3654_s15  }
  0x1c   : > { %s253_s20 = sshll.u32 %s4924_s5, 4  ;;  %s3655_s21 = smov [#allocation7]   ;;  %s254_s20 = int_to_ptr.hbm [resolvable:$true] %s253_s20 }
  0x1d   : > { %s255_s2 = sshll.u32 %s3655_s21, 4  ;;  %s267_s16 = sshll.u32 %s4925_s6, 4  ;;  %s256_s2 = int_to_ptr.vmem [resolvable:$true] %s255_s2  ;;  %s268_s16 = int_to_ptr.hbm [resolvable:$true] %s267_s16 }
  0x1e   : > { %3077 = dma.hbm_to_vmem [thread:$0]  (!%p3768_p12), %s254_s20, 2048, %s256_s2, [#allocation6], %s3650_s23, %s3650_s23, %s3651_s29  }
  0x1f   : > { %s3656_s18 = smov [#allocation8]   ;;  %303 = sbr.rel (%p3757_p10) target bundleno = 711 (0x2c7), region = 48 }
  0x20   : > { %s269_s8 = sshll.u32 %s3656_s18, 4  ;;  %s270_s8 = int_to_ptr.vmem [resolvable:$true] %s269_s8 }
  0x21   : > { %3080 = dma.hbm_to_vmem [thread:$0]  (!%p3768_p12), %s268_s16, 2048, %s270_s8, [#allocation9], %s3650_s23, %s3650_s23, %s3651_s29  }
  0x24   : > { %3618 = dma.done.wait (%p3085_p9), [#allocation3], 960  }
  0x25   : > { %3620 = vsyncadd (%p3085_p9), [#allocation3], 4294966336 }
  0x26   : > { %3622 = dma.done.wait (%p3085_p9), [#allocation6], 4096  }
  0x27   : > { %3624 = vsyncadd (%p3085_p9), [#allocation6], 4294963200 }
  0x28   : > { %3626 = dma.done.wait (%p3085_p9), [#allocation9], 2048  }
  0x29   : > { %3628 = vsyncadd (%p3085_p9), [#allocation9], 4294965248  ;;  %s356_s2 = smul.u32 14, %s3729_s28  ;;  %v3657_v0 = vmov 32   ;;  %vm505_vm0 = vcmask 1040384   ;;  %vm506_vm1 = vcmask 1041408  }
  0x2a   : > { %3156 = vset.pattern.permute.xlu1 %v3657_v0  ;;  %3167 = vset.pattern.permute.xlu2 %v3657_v0  ;;  %v3658_v1 = vmov 65535   ;;  %v406_v3 = vld [vmem:[#allocation2 + $0x30] sm:$0x33]  ;;  %v2638_v18 = vld [vmem:[#allocation2 + $0x18] sm:$0xf]  ;;  %vm869_vm2 = vcmask 1042432  }
  0x2b   : > { %3145 = vset.pattern.permute.xlu0 %v3657_v0  ;;  %p357_p13 = scmp.lt.s32.totalorder %s356_s2, 27  ;;  %v507_v2 = vsel %vm505_vm0, 4294967295, %v3658_v1  ;;  %v465_v5 = vunpack.c.l.b16 %v406_v3  ;;  %v466_v7 = vunpack.c.h.b16 %v406_v3  ;;  %v2984_v22 = vld [vmem:[#allocation2 + $0x20] sm:$0xf0]  ;;  %v2983_v23 = vld [vmem:[#allocation2 + $0x1c] sm:$0xf] }
  0x2c   : > { %v3817_v6 = vsel %vm506_vm1, %v507_v2, 0  ;;  %v2640_v28 = vld [vmem:[#allocation2 + $0x24] sm:$0xf0]  ;;  %v407_v30 = vld [vmem:[#allocation2 + $0x38] sm:$0x3]  ;;  %v2639_v35 = vor.u32 %v2984_v22, %v2638_v18  ;;  %v870_v53 = vsel %vm506_vm1, 4294967295, %v3658_v1 }
  0x2d   : > { %s5077_s2 = smov (!%p357_p13, %s356_s2), 27  ;;  %v474_v14 = vpack.c.b16 %v465_v5, %v465_v5  ;;  %v475_v15 = vpack.c.b16 %v466_v7, %v466_v7  ;;  %v467_v36 = vunpack.c.l.b16 %v407_v30  ;;  %v2643_v37 = vor.u32 %v2983_v23, %v2640_v28  ;;  %v2626_v38 = vld [vmem:[#allocation2] sm:$0xf]  ;;  %v2981_v39 = vld [vmem:[#allocation2 + $0x8] sm:$0xf0]  ;;  %s3042_s20 = smul.u32 112, %s3729_s28 }
  0x2e   : > { %s2594_s4 = sshll.u32 %s5077_s2, 2  ;;  %v2980_v42 = vld [vmem:[#allocation2 + $0x4] sm:$0xf]  ;;  %v2628_v43 = vld [vmem:[#allocation2 + $0xc] sm:$0xf0]  ;;  %v2627_v47 = vor.u32 %v2981_v39, %v2626_v38  ;;  %vm483_vm3 = vcmask 285696  }
  0x2f   : > { %s3813_s13 = scalar_lea.vmem %s4919_s0, %s2594_s4  ;;  %v510_v25 = vand.u32 %v3817_v6, %v474_v14  ;;  %v513_v26 = vand.u32 %v3817_v6, %v475_v15  ;;  %s3839_s23 = scalar_lea.vmem %s4920_s1, %s2594_s4  ;;  %v476_v44 = vpack.c.b16 %v467_v36, %v467_v36  ;;  %v2631_v49 = vor.u32 %v2980_v42, %v2628_v43  ;;  %v3853_v52 = vld [vmem:[%s4922_s3 + $0xc0] sm:$0x77]  ;;  %v2985_v60 = vld [vmem:[#allocation2 + $0x28] sm:$0xf0]  ;;  %v3007_v7 = vld [vmem:[%s4922_s3 + $0xa4] sm:$0xf0] }
  0x30   : > { %v374_v4 = vld [vmem:[%s3813_s13 + $0x10] sm:$0xff]   ;;  %v378_v8 = vld [vmem:[%s3813_s13 + $0x20] sm:$0xff]   ;;  %v376_v19 = vld [vmem:[%s3813_s13 + $0x18] sm:$0xff]   ;;  %v787_v0 = vunpack.c.l.b16 %v3853_v52  ;;  %v3869_v1 = vsel %vm869_vm2, %v870_v53, 0  ;;  %v3659_v18 = vmov 64   ;;  %vm847_vm4 = vcmask 564224  }
  0x31   : > { %v370_v9 = vld [vmem:[%s3813_s13] sm:$0xff]   ;;  %v1158_v10 = vunpack.c.l.bf16 %v374_v4  ;;  %v1159_v11 = vunpack.c.h.bf16 %v374_v4  ;;  %v1162_v12 = vunpack.c.l.bf16 %v378_v8  ;;  %v1163_v13 = vunpack.c.h.bf16 %v378_v8  ;;  %v380_v24 = vld [vmem:[%s3813_s13 + $0x28] sm:$0xff]   ;;  %523 = vmatpush.bf16.msra.mxu0 %v510_v25  ;;  %3043 = vmatpush.bf16.msra.mxu2 %v510_v25  ;;  %v382_v56 = vld [vmem:[%s3813_s13 + $0x30] sm:$0xff]   ;;  %s3593_s19 = scalar_lea.hbm %s4926_s7, 224 }
  0x32   : > { %v1154_v16 = vunpack.c.l.bf16 %v370_v9  ;;  %v1155_v17 = vunpack.c.h.bf16 %v370_v9  ;;  %v372_v29 = vld [vmem:[%s3813_s13 + $0x8] sm:$0xff]   ;;  %v1160_v31 = vunpack.c.l.bf16 %v376_v19  ;;  %v1161_v32 = vunpack.c.h.bf16 %v376_v19  ;;  %3046 = vmatpush.bf16.msra.mxu3 %v513_v26  ;;  %567 = vmatpush.bf16.msra.mxu1 %v513_v26  ;;  %v384_v48 = vld [vmem:[%s3839_s23] sm:$0xff]   ;;  %v390_v14 = vld [vmem:[%s3839_s23 + $0x18] sm:$0xff]  }
  0x33   : > { %v3822_v20 = vpack.i.bf16 %v1159_v11, %v1158_v10  ;;  %v3824_v21 = vpack.i.bf16 %v1163_v13, %v1162_v12  ;;  %v1164_v33 = vunpack.c.l.bf16 %v380_v24  ;;  %v1165_v34 = vunpack.c.h.bf16 %v380_v24  ;;  %v386_v51 = vld [vmem:[%s3839_s23 + $0x8] sm:$0xff]   ;;  %v3858_v54 = vld [vmem:[%s3813_s13] sm:$0xff]  ;;  %v2982_v12 = vld [vmem:[#allocation2 + $0x10] sm:$0xf0] }
  0x34   : > { %v3829_v27 = vpack.i.bf16 %v1155_v17, %v1154_v16  ;;  %v1156_v40 = vunpack.c.l.bf16 %v372_v29  ;;  %v1157_v41 = vunpack.c.h.bf16 %v372_v29  ;;  %v3842_v45 = vpack.i.bf16 %v1161_v32, %v1160_v31  ;;  %v3865_v57 = vld [vmem:[%s3813_s13 + $0x20] sm:$0xff]  ;;  %v2634_v11 = vld [vmem:[#allocation2 + $0x8] sm:$0xf]  ;;  %v388_v19 = vld [vmem:[%s3839_s23 + $0x10] sm:$0xff]  }
  0x35   : > { %3158 = vperm.xlu1 %3156, %v3822_v20   ;;  %3169 = vperm.xlu2 %3167, %v3824_v21   ;;  %v3844_v46 = vpack.i.bf16 %v1165_v34, %v1164_v33  ;;  %v516_v55 = vand.u32 %v3817_v6, %v476_v44  ;;  %v1168_v58 = vunpack.c.l.bf16 %v384_v48  ;;  %v2646_v59 = vld [vmem:[#allocation2 + $0x20] sm:$0xf]  ;;  %v1169_v61 = vunpack.c.h.bf16 %v384_v48  ;;  %v2771_v6 = vld [vmem:[%s4922_s3 + $0x90] sm:$0xf]  ;;  %v3001_v23 = vld [vmem:[%s4922_s3 + $0x74] sm:$0xf0] }
  0x36   : > { %3147 = vperm.xlu0 %3145, %v3829_v27   ;;  %524 = vmatpush.bf16.msra.mxu0 %v2639_v35  ;;  %v3847_v50 = vpack.i.bf16 %v1157_v41, %v1156_v40  ;;  %v1170_v62 = vunpack.c.l.bf16 %v386_v51  ;;  %v1171_v63 = vunpack.c.h.bf16 %v386_v51  ;;  %v1166_v2 = vunpack.c.l.bf16 %v382_v56  ;;  %v392_v15 = vld [vmem:[%s3839_s23 + $0x20] sm:$0xff]   ;;  %v2723_v33 = vld [vmem:[%s4922_s3 + $0x30] sm:$0xf]  ;;  %v2995_v34 = vld [vmem:[%s4922_s3 + $0x44] sm:$0xf0] }
  0x37   : > { %3044 = vmatpush.bf16.msra.mxu2 %v2639_v35  ;;  %3047 = vmatpush.bf16.msra.mxu3 %v2643_v37  ;;  %v1167_v3 = vunpack.c.h.bf16 %v382_v56  ;;  %v2647_v4 = vor.u32 %v2985_v60, %v2646_v59  ;;  %v817_v5 = vpack.c.b16 %v787_v0, %v787_v0  ;;  %v3884_v8 = vpack.i.bf16 %v1169_v61, %v1168_v58  ;;  %v2747_v22 = vld [vmem:[%s4922_s3 + $0x60] sm:$0xf]  ;;  %v675_v38 = vld [vmem:[%s4922_s3 + $0xc8] sm:$0x77]  ;;  %v3921_v40 = vld [vmem:[%s3839_s23 + $0x30] sm:$0xff]  }
  0x38   : > { %568 = vmatpush.bf16.msra.mxu1 %v2643_v37  ;;  %v3886_v9 = vpack.i.bf16 %v1171_v63, %v1170_v62  ;;  %v2635_v16 = vor.u32 %v2982_v12, %v2634_v11  ;;  %v2772_v17 = vor.u32 %v3007_v7, %v2771_v6  ;;  %v1174_v24 = vunpack.c.l.bf16 %v390_v14  ;;  %v394_v39 = vld [vmem:[%s3839_s23 + $0x28] sm:$0xff]   ;;  %4995 = vst [vmem:[#allocation17_spill] sm:$0xff] %v3921_v40  ;;  %v2989_v51 = vld [vmem:[%s4922_s3 + $0x14] sm:$0xf0]  ;;  %v3004_v62 = vld [vmem:[%s4922_s3 + $0x94] sm:$0xf] }
  0x39   : > { %v873_v10 = vand.u32 %v3869_v1, %v817_v5  ;;  %v3891_v13 = vpack.i.bf16 %v1167_v3, %v1166_v2  ;;  %v1175_v25 = vunpack.c.h.bf16 %v390_v14  ;;  %v1176_v26 = vunpack.c.l.bf16 %v392_v15  ;;  %v3927_v44 = vld [vmem:[%s3813_s13 + $0x8] sm:$0xff]  ;;  %v2779_v5 = vld [vmem:[%s4922_s3 + $0x98] sm:$0xf]  ;;  %v3008_v6 = vld [vmem:[%s4922_s3 + $0xac] sm:$0xf0] }
  0x3a   : > { %525 = vmatpush.bf16.msra.mxu0 %v2627_v47  ;;  %v1177_v28 = vunpack.c.h.bf16 %v392_v15  ;;  %v788_v29 = vunpack.c.h.b16 %v3853_v52  ;;  %v1172_v30 = vunpack.c.l.bf16 %v388_v19  ;;  %v1173_v31 = vunpack.c.h.bf16 %v388_v19  ;;  %v3930_v48 = vld [vmem:[%s3813_s13 + $0x28] sm:$0xff]  ;;  %v2998_v11 = vld [vmem:[%s4922_s3 + $0x64] sm:$0xf]  ;;  %v2749_v12 = vld [vmem:[%s4922_s3 + $0x78] sm:$0xf0] }
  0x3b   : > { %3045 = vmatpush.bf16.msra.mxu2 %v2627_v47  ;;  %3048 = vmatpush.bf16.msra.mxu3 %v2631_v49  ;;  %v2748_v32 = vor.u32 %v3001_v23, %v2747_v22  ;;  %v3912_v36 = vpack.i.bf16 %v1175_v25, %v1174_v24  ;;  %v789_v42 = vunpack.c.l.b16 %v675_v38  ;;  %v2724_v47 = vor.u32 %v2995_v34, %v2723_v33  ;;  %v2773_v63 = vld [vmem:[%s4922_s3 + $0xa8] sm:$0xf0]  ;;  %v2755_v15 = vld [vmem:[%s4922_s3 + $0x68] sm:$0xf]  ;;  %v2992_v19 = vld [vmem:[%s4922_s3 + $0x34] sm:$0xf] }
  0x3c   : > { %569 = vmatpush.bf16.msra.mxu1 %v2631_v49  ;;  %v818_v35 = vpack.c.b16 %v788_v29, %v788_v29  ;;  %v3914_v37 = vpack.i.bf16 %v1177_v28, %v1176_v26  ;;  %v3924_v43 = vpack.i.bf16 %v1173_v31, %v1172_v30  ;;  %v2699_v49 = vld [vmem:[%s4922_s3] sm:$0xf]  ;;  %v1178_v53 = vunpack.c.l.bf16 %v394_v39  ;;  %v2725_v22 = vld [vmem:[%s4922_s3 + $0x48] sm:$0xf0]  ;;  %v2731_v24 = vld [vmem:[%s4922_s3 + $0x38] sm:$0xf] }
  0x3d   : > { %3163 = vperm.xlu1 %3156, %v3842_v45   ;;  %3174 = vperm.xlu2 %3167, %v3844_v46   ;;  %v819_v52 = vpack.c.b16 %v789_v42, %v789_v42  ;;  %v1180_v56 = vunpack.c.l.bf16 %v3921_v40  ;;  %v4928_v58 = vunpack.c.h.bf16 %v3921_v40  ;;  %v790_v59 = vunpack.c.h.b16 %v675_v38  ;;  %v2996_v25 = vld [vmem:[%s4922_s3 + $0x4c] sm:$0xf0]  ;;  %v2986_v26 = vld [vmem:[%s4922_s3 + $0x4] sm:$0xf]  ;;  %v2701_v28 = vld [vmem:[%s4922_s3 + $0x18] sm:$0xf0] }
  0x3e   : > { %3152 = vperm.xlu0 %3145, %v3847_v50   ;;  %2648 = vmatmul.msk.bf16.vlgmr.msra.gmra.mxu0 %vm483_vm3, %v3858_v54  ;;  %v876_v41 = vand.u32 %v3869_v1, %v818_v35  ;;  %v2700_v61 = vor.u32 %v2989_v51, %v2699_v49  ;;  %v2776_v2 = vor.u32 %v3004_v62, %v2773_v63  ;;  %v4007_v31 = vld [vmem:[%s3813_s13 + $0x10] sm:$0xff]  ;;  %v2990_v33 = vld [vmem:[%s4922_s3 + $0x1c] sm:$0xf0]  ;;  %v3005_v38 = vld [vmem:[%s4922_s3 + $0x9c] sm:$0xf]  ;;  %v3661_v42 = vmov 66  }
  0x3f   : > { %611 = vmatpush.bf16.msrb.mxu2 %v516_v55  ;;  %2659 = vmatmul.msk.bf16.vlgmr.msra.gmra.mxu3 %vm483_vm3, %v3865_v57  ;;  %v1179_v55 = vunpack.c.h.bf16 %v394_v39  ;;  %v879_v60 = vand.u32 %v3869_v1, %v819_v52  ;;  %v820_v0 = vpack.c.b16 %v790_v59, %v790_v59  ;;  %v2752_v14 = vor.u32 %v2998_v11, %v2749_v12  ;;  %v4016_v34 = vld [vmem:[%s3813_s13 + $0x30] sm:$0xff]  ;;  %v4041_v49 = vld [vmem:[%s3839_s23] sm:$0xff]  ;;  %v2999_v52 = vld [vmem:[%s4922_s3 + $0x6c] sm:$0xf] }
  0x40   : > { %2652 = vmatmul.msk.bf16.vlgmr.msra.gmra.mxu2 %vm483_vm3, %v3865_v57  ;;  %2655 = vmatmul.msk.bf16.vlgmr.msra.gmra.mxu1 %vm483_vm3, %v3858_v54  ;;  %v2728_v23 = vor.u32 %v2992_v19, %v2725_v22  ;;  %v2732_v29 = vor.u32 %v2996_v25, %v2731_v24  ;;  %v2704_v30 = vor.u32 %v2986_v26, %v2701_v28  ;;  %v2781_v39 = vld [vmem:[%s4922_s3 + $0xb0] sm:$0xf0]  ;;  %v3662_v51 = vmov 65   ;;  %v2709_v19 = vld [vmem:[%s4922_s3 + $0x20] sm:$0xf0] }
  0x41   : > { %893 = vmatpush.bf16.msrb.mxu3 %v873_v10  ;;  %937 = vmatpush.bf16.msrb.mxu0 %v876_v41  ;;  %v3956_v3 = vpack.i.bf16 %v1179_v55, %v1178_v53  ;;  %v882_v7 = vand.u32 %v3869_v1, %v820_v0  ;;  %v2780_v10 = vor.u32 %v3008_v6, %v2779_v5  ;;  %v4064_v55 = vld [vmem:[%s3839_s23 + $0x8] sm:$0xff]  ;;  %v4080_v59 = vld [vmem:[%s3839_s23 + $0x10] sm:$0xff]  ;;  %v4109_v5 = vld [vmem:[%s3839_s23 + $0x18] sm:$0xff] }
  0x42   : > { %981 = vmatpush.bf16.msrb.mxu1 %v879_v60  ;;  %v2784_v41 = vor.u32 %v3005_v38, %v2781_v39  ;;  %v4929_v60 = vmov 68   ;;  %v2733_v62 = vld [vmem:[%s4922_s3 + $0x50] sm:$0xf0]  ;;  %v3009_v24 = vld [vmem:[%s4922_s3 + $0xb4] sm:$0xf0] }
  0x43   : > { %612 = vmatpush.bf16.msrb.mxu2 %v2647_v4  ;;  %v3962_v4 = vpack.i.bf16 %v4928_v58, %v1180_v56  ;;  %v676_v11 = vld [vmem:[%s4922_s3 + $0xd0] sm:$0x77]  ;;  %v3003_v28 = vld [vmem:[%s4922_s3 + $0x84] sm:$0xf0] }
  0x44   : > { %v2763_v26 = vld [vmem:[%s4922_s3 + $0x70] sm:$0xf] }
  0x45   : > { %3183 = vset.pattern.permute.xlu1 %v3659_v18  ;;  %3189 = vset.pattern.permute.xlu2 %v3659_v18  ;;  %4996 = vst [vmem:[#allocation18_spill] sm:$0xff] %v3962_v4  ;;  %v2715_v39 = vld [vmem:[%s4922_s3 + $0x10] sm:$0xf] }
  0x46   : > { %3185 = vperm.xlu1 %3183, %v3884_v8   ;;  %3191 = vperm.xlu2 %3189, %v3886_v9  }
  0x47   : > { %3179 = vperm.xlu0 %3145, %v3891_v13   ;;  %613 = vmatpush.bf16.msrb.mxu2 %v2635_v16  ;;  %v3002_v16 = vld [vmem:[%s4922_s3 + $0x7c] sm:$0xf0] }
  0x48   : > { %894 = vmatpush.bf16.msrb.mxu3 %v2772_v17  ;;  %938 = vmatpush.bf16.msrb.mxu0 %v2776_v2  ;;  %v2756_v17 = vor.u32 %v3002_v16, %v2755_v15  ;;  %v4932_v2 = vmov 67  }
  0x49   : > { %982 = vmatpush.bf16.msrb.mxu1 %v2780_v10 }
  0x4b   : > { %1025 = vmatpush.bf16.msra.mxu2 %v882_v7  ;;  %v3665_v7 = vmov 34  }
  0x4c   : > { %895 = vmatpush.bf16.msrb.mxu3 %v2748_v32  ;;  %939 = vmatpush.bf16.msrb.mxu0 %v2752_v14  ;;  %v2707_v32 = vld [vmem:[%s4922_s3 + $0x8] sm:$0xf]  ;;  %v791_v14 = vunpack.c.l.b16 %v676_v11 }
  0x4d   : > { %983 = vmatpush.bf16.msrb.mxu1 %v2756_v17  ;;  %v2708_v35 = vor.u32 %v2990_v33, %v2707_v32  ;;  %v2997_v32 = vld [vmem:[%s4922_s3 + $0x54] sm:$0xf0] }
  0x4e   : > { %3202 = vperm.xlu1 %3183, %v3912_v36   ;;  %3207 = vperm.xlu2 %3189, %v3914_v37   ;;  %v821_v15 = vpack.c.b16 %v791_v14, %v791_v14 }
  0x4f   : > { %3195 = vset.pattern.permute.xlu0 %v3659_v18  ;;  %2649 = vmatmul.msk.bf16.gmra.mxu0 %vm483_vm3, %v3927_v44  ;;  %v3660_v18 = vmov 33  }
  0x50   : > { %3197 = vperm.xlu0 %3195, %v3924_v43   ;;  %896 = vmatpush.bf16.msrb.mxu3 %v2724_v47  ;;  %v4038_v47 = vld [vmem:[%s3813_s13 + $0x18] sm:$0xff]  ;;  %s2463_s13 = scalar_lea.hbm %s4926_s7, %s3042_s20 }
  0x51   : > { %2653 = vmatmul.msk.bf16.gmra.mxu2 %vm483_vm3, %v3930_v48  ;;  %2660 = vmatmul.msk.bf16.gmra.mxu3 %vm483_vm3, %v3930_v48  ;;  %s2466_s28 = sshll.u32 %s2463_s13, 4  ;;  %s2467_s28 = int_to_ptr.hbm [resolvable:$true] %s2466_s28 }
  0x52   : > { %2656 = vmatmul.msk.bf16.gmra.mxu1 %vm483_vm3, %v3927_v44  ;;  %940 = vmatpush.bf16.msrb.mxu0 %v2728_v23  ;;  %v2787_v23 = vld [vmem:[%s4922_s3 + $0xa0] sm:$0xf]  ;;  %s3587_s2 = sshra.s32 %s2467_s28, 4  ;;  %s3588_s2 = int_to_ptr.hbm [resolvable:$true] %s3587_s2 }
  0x53   : > { %984 = vmatpush.bf16.msrb.mxu1 %v2732_v29  ;;  %1026 = vmatpush.bf16.msra.mxu2 %v2784_v41  ;;  %v2788_v25 = vor.u32 %v3009_v24, %v2787_v23  ;;  %v2991_v41 = vld [vmem:[%s4922_s3 + $0x24] sm:$0xf0]  ;;  %v2765_v23 = vld [vmem:[%s4922_s3 + $0x88] sm:$0xf0]  ;;  %s3589_s4 = scalar_lea.hbm %s3588_s2, 112  ;;  %p3594_p3 = scmp.lt.s32.totalorder %s3588_s2, %s4926_s7 }
  0x54   : > { %897 = vmatpush.bf16.msrb.mxu3 %v2700_v61  ;;  %v2993_v61 = vld [vmem:[%s4922_s3 + $0x3c] sm:$0xf]  ;;  %p3590_p0 = scmp.ne.s32.totalorder %s3588_s2, %s3589_s4  ;;  %p3595_p4 = scmp.lt.s32.totalorder %s3593_s19, %s3589_s4 }
  0x55   : > { %v2736_v63 = vor.u32 %v2993_v61, %v2733_v62  ;;  %v3006_v62 = vld [vmem:[%s4922_s3 + $0xa4] sm:$0xf] }
  0x56   : > { %3212 = vperm.xlu1 %3183, %v3956_v3   ;;  %3217 = vperm.xlu2 %3189, %v3962_v4   ;;  %p3591_p1 = pnand %p3590_p0, %p3746_p5  ;;  %p3596_p7 = por %p3595_p4, %p3594_p3 }
  0x57   : > { %941 = vmatpush.bf16.msrb.mxu0 %v2704_v30  ;;  %985 = vmatpush.bf16.msrb.mxu1 %v2708_v35  ;;  %v792_v30 = vunpack.c.h.b16 %v676_v11 }
  0x58   : > { %3221 = vset.pattern.permute.xlu0 %v3660_v18  ;;  %p3592_p2 = pneg %p3591_p1 }
  0x59   : > { %3223 = vperm.xlu0 %3221, %v3829_v27   ;;  %v822_v38 = vpack.c.b16 %v792_v30, %v792_v30 }
  0x5a   : > { %p3597_p8 = pnand %p3596_p7, %p3592_p2 }
  0x5e   : > { %3227 = vset.pattern.permute.xlu1 %v3660_v18  ;;  %3233 = vset.pattern.permute.xlu2 %v3660_v18  ;;  %v2987_v18 = vld [vmem:[%s4922_s3 + $0xc] sm:$0xf] }
  0x5f   : > { %3229 = vperm.xlu1 %3227, %v3847_v50   ;;  %3235 = vperm.xlu2 %3233, %v3822_v20   ;;  %v2712_v22 = vor.u32 %v2987_v18, %v2709_v19  ;;  %v2895_v18 = vld [vmem:[#allocation5 + $0x78] sm:$0xf0] }
  0x60   : > { %2650 = vmatmul.msk.bf16.gmra.mxu0 %vm483_vm3, %v4007_v31 }
  0x61   : > { %3250 = vperm.xlu0 %3221, %v3844_v46   ;;  %2654 = vmatmul.msk.bf16.gmra.mxu2 %vm483_vm3, %v4016_v34 }
  0x62   : > { %2661 = vmatmul.msk.bf16.gmra.mxu3 %vm483_vm3, %v4016_v34  ;;  %2657 = vmatmul.msk.bf16.gmra.mxu1 %vm483_vm3, %v4007_v31 }
  0x67   : > { %3240 = vperm.xlu1 %3227, %v3842_v45   ;;  %3245 = vperm.xlu2 %3233, %v3824_v21  }
  0x69   : > { %3265 = vset.pattern.permute.xlu0 %v3661_v42 }
  0x6a   : > { %3267 = vperm.xlu0 %3265, %v3884_v8  }
  0x6f   : > { %3255 = vperm.xlu1 %3227, %v3891_v13   ;;  %3259 = vset.pattern.permute.xlu2 %v3662_v51 }
  0x70   : > { %3261 = vperm.xlu2 %3259, %v3884_v8   ;;  %2651 = vmatmul.msk.bf16.gmra.mxu0 %vm483_vm3, %v4038_v47 }
  0x71   : > { %2662 = vmatmul.msk.bf16.vlgmr.msrb.gmra.mxu2 %vm483_vm3, %v3858_v54  ;;  %v2757_v54 = vld [vmem:[%s4922_s3 + $0x80] sm:$0xf0] }
  0x72   : > { %2793 = vmatmul.msk.bf16.vlgmr.msrb.gmra.mxu3 %vm847_vm4, %v4041_v49  ;;  %2658 = vmatmul.msk.bf16.gmra.mxu1 %vm483_vm3, %v4038_v47  ;;  %v2760_v53 = vor.u32 %v2999_v52, %v2757_v54  ;;  %v4201_v52 = vld [vmem:[%s3839_s23 + $0x28] sm:$0xff] }
  0x73   : > { %3293 = vset.pattern.permute.xlu0 %v3662_v51 }
  0x74   : > { %3295 = vperm.xlu0 %3293, %v3912_v36   ;;  %1027 = vmatpush.bf16.msra.mxu2 %v2760_v53 }
  0x77   : > { %3271 = vset.pattern.permute.xlu1 %v3662_v51 }
  0x78   : > { %3273 = vperm.xlu1 %3271, %v3886_v9   ;;  %3277 = vset.pattern.permute.xlu2 %v3661_v42 }
  0x79   : > { %3279 = vperm.xlu2 %3277, %v3886_v9   ;;  %1028 = vmatpush.bf16.msra.mxu2 %v2736_v63 }
  0x7c   : > { %3321 = vset.pattern.permute.xlu0 %v3661_v42 }
  0x7d   : > { %3323 = vperm.xlu0 %3321, %v3956_v3   ;;  %1029 = vmatpush.bf16.msra.mxu2 %v2712_v22 }
  0x80   : > { %3284 = vperm.xlu1 %3271, %v3924_v43   ;;  %2800 = vmatmul.msk.bf16.vlgmr.msrb.gmra.mxu0 %vm847_vm4, %v4041_v49 }
  0x81   : > { %3289 = vperm.xlu2 %3277, %v3924_v43   ;;  %2663 = vmatmul.msk.bf16.gmra.mxu2 %vm483_vm3, %v3927_v44 }
  0x82   : > { %2794 = vmatmul.msk.bf16.gmra.mxu3 %vm847_vm4, %v4064_v55  ;;  %2807 = vmatmul.msk.bf16.vlgmr.msrb.gmra.mxu1 %vm847_vm4, %v4041_v49 }
  0x85   : > { %3351 = vset.pattern.permute.xlu0 %v4929_v60 }
  0x86   : > { %3353 = vperm.xlu0 %3351, %v3884_v8  }
  0x88   : > { %3299 = vset.pattern.permute.xlu1 %v3661_v42 }
  0x89   : > { %3301 = vperm.xlu1 %3299, %v3912_v36   ;;  %3305 = vset.pattern.permute.xlu2 %v3662_v51 }
  0x8a   : > { %3307 = vperm.xlu2 %3305, %v3914_v37  }
  0x8e   : > { %3379 = vset.pattern.permute.xlu0 %v4932_v2 }
  0x8f   : > { %v4083_v44 = vpop.permute.xlu2 %3169  ;;  %3381 = vperm.xlu0 %3379, %v3924_v43  }
  0x90   : > { %2801 = vmatmul.msk.bf16.gmra.mxu0 %vm847_vm4, %v4064_v55 }
  0x91   : > { %3312 = vperm.xlu1 %3299, %v3914_v37   ;;  %2664 = vmatmul.msk.bf16.gmra.mxu2 %vm483_vm3, %v4007_v31  ;;  %v2739_v31 = vld [vmem:[%s4922_s3 + $0x40] sm:$0xf] }
  0x92   : > { %2795 = vmatmul.msk.bf16.gmra.mxu3 %vm847_vm4, %v4080_v59  ;;  %2808 = vmatmul.msk.bf16.gmra.mxu1 %vm847_vm4, %v4064_v55  ;;  %v2740_v35 = vor.u32 %v2997_v32, %v2739_v31 }
  0x93   : > { %3317 = vperm.xlu2 %3305, %v3956_v3  }
  0x97   : > { %v4102_v0 = vpop.permute.xlu2 %3174  ;;  %3407 = vset.pattern.permute.xlu0 %v3665_v7 }
  0x98   : > { %3409 = vperm.xlu0 %3407, %v3824_v21  }
  0x99   : > { %3327 = vset.pattern.permute.xlu1 %v3662_v51 }
  0x9a   : > { %3329 = vperm.xlu1 %3327, %v3962_v4  }
  0x9b   : > { %3333 = vset.pattern.permute.xlu2 %v3661_v42  ;;  %v888_v42 = vand.u32 %v3869_v1, %v822_v38  ;;  %v2994_v38 = vld [vmem:[%s4922_s3 + $0x44] sm:$0xf] }
  0x9c   : > { %3335 = vperm.xlu2 %3333, %v3962_v4  }
  0x9d   : > { %1113 = vmatpush.bf16.msra.mxu0 %v888_v42  ;;  %v2741_v42 = vld [vmem:[%s4922_s3 + $0x58] sm:$0xf0] }
  0xa0   : > { %v4111_v6 = vpop.permute.xlu2 %3191  ;;  %2802 = vmatmul.msk.bf16.gmra.mxu0 %vm847_vm4, %v4080_v59  ;;  %3435 = vset.pattern.permute.xlu0 %v4929_v60 }
  0xa1   : > { %4997 = vst [vmem:[#allocation19_spill] sm:$0xff] %v4111_v6  ;;  %2665 = vmatmul.msk.bf16.gmra.mxu2 %vm483_vm3, %v4038_v47  ;;  %v2716_v47 = vor.u32 %v2991_v41, %v2715_v39  ;;  %v3172_v39 = vunpack.i.h.bf16 %v4083_v44  ;;  %3437 = vperm.xlu0 %3435, %v3956_v3  }
  0xa2   : > { %2796 = vmatmul.msk.bf16.gmra.mxu3 %vm847_vm4, %v4109_v5  ;;  %3339 = vset.pattern.permute.xlu1 %v3665_v7 }
  0xa3   : > { %2809 = vmatmul.msk.bf16.gmra.mxu1 %vm847_vm4, %v4080_v59  ;;  %3341 = vperm.xlu1 %3339, %v3829_v27   ;;  %v885_v27 = vand.u32 %v3869_v1, %v821_v15  ;;  %v2789_v1 = vld [vmem:[%s4922_s3 + $0xb8] sm:$0xf0] }
  0xa4   : > { %3345 = vset.pattern.permute.xlu2 %v4932_v2  ;;  %v2792_v63 = vor.u32 %v3006_v62, %v2789_v1  ;;  %v2744_v62 = vor.u32 %v2994_v38, %v2741_v42  ;;  %v3022_v38 = vld [vmem:[#allocation5 + $0x64] sm:$0xf]  ;;  %v3023_v42 = vld [vmem:[#allocation5 + $0x64] sm:$0xf0] }
  0xa5   : > { %3347 = vperm.xlu2 %3345, %v3884_v8   ;;  %v4141_v8 = vld [vmem:[%s3839_s23 + $0x20] sm:$0xff]  ;;  %1069 = vmatpush.bf16.msra.mxu3 %v885_v27  ;;  %v3024_v27 = vld [vmem:[#allocation5 + $0x74] sm:$0xf] }
  0xa6   : > { %1114 = vmatpush.bf16.msra.mxu0 %v2792_v63  ;;  %v2898_v22 = vor.u32 %v3024_v27, %v2895_v18 }
  0xa7   : > { %v4127_v10 = vpop.permute.xlu1 %3158 }
  0xa8   : > { %v4129_v21 = vpop.permute.xlu2 %3207  ;;  %v4134_v12 = vpop.permute.xlu0 %3147  ;;  %1903 = vmatpush.bf16.msrb.mxu2 %v2898_v22 }
  0xa9   : > { %1070 = vmatpush.bf16.msra.mxu3 %v2788_v25  ;;  %v3150_v15 = vunpack.i.h.bf16 %v4134_v12 }
  0xab   : > { %3358 = vperm.xlu1 %3339, %v3847_v50  }
  0xad   : > { %3363 = vperm.xlu2 %3345, %v3886_v9  }
  0xaf   : > { %v4143_v16 = vpop.permute.xlu1 %3163 }
  0xb0   : > { %v4145_v17 = vpop.permute.xlu2 %3217  ;;  %2803 = vmatmul.msk.bf16.gmra.mxu0 %vm847_vm4, %v4109_v5  ;;  %v4155_v50 = vpop.permute.xlu0 %3152 }
  0xb1   : > { %4998 = vst [vmem:[#allocation20_spill] sm:$0xff] %v4145_v17  ;;  %2666 = vmatmul.msk.bf16.gmra.mxu2 %vm483_vm3, %v3865_v57  ;;  %v2764_v57 = vor.u32 %v3003_v28, %v2763_v26  ;;  %v3154_v1 = vunpack.i.l.bf16 %v4155_v50 }
  0xb2   : > { %2797 = vmatmul.msk.bf16.gmra.mxu3 %vm847_vm4, %v4141_v8 }
  0xb3   : > { %2810 = vmatmul.msk.bf16.gmra.mxu1 %vm847_vm4, %v4109_v5  ;;  %3367 = vset.pattern.permute.xlu1 %v4929_v60 }
  0xb4   : > { %3369 = vperm.xlu1 %3367, %v3886_v9   ;;  %1071 = vmatpush.bf16.msra.mxu3 %v2764_v57 }
  0xb5   : > { %3373 = vset.pattern.permute.xlu2 %v3665_v7 }
  0xb6   : > { %3375 = vperm.xlu2 %3373, %v3822_v20   ;;  %v3149_v20 = vunpack.i.l.bf16 %v4134_v12 }
  0xb8   : > { %v4179_v29 = vpop.permute.xlu1 %3185  ;;  %1072 = vmatpush.bf16.msra.mxu3 %v2740_v35  ;;  %v2893_v35 = vld [vmem:[#allocation5 + $0x70] sm:$0xf] }
  0xb9   : > { %4999 = vst [vmem:[#allocation21_spill] sm:$0xff] %v4179_v29  ;;  %v4187_v33 = vpop.permute.xlu2 %3235  ;;  %v4189_v9 = vpop.permute.xlu0 %3179 }
  0xbb   : > { %v527_v51 = vpop.f32.mrf.mxu0 }
  0xbc   : > { %3386 = vperm.xlu1 %3367, %v3924_v43   ;;  %v4204_v54 = vmul.f32 %v3149_v20, %v527_v51  ;;  %1073 = vmatpush.bf16.msra.mxu3 %v2716_v47  ;;  %v3171_v43 = vunpack.i.l.bf16 %v4083_v44  ;;  %v3025_v20 = vld [vmem:[#allocation5 + $0x74] sm:$0xf0] }
  0xbd   : > { %v571_v53 = vpop.f32.mrf.mxu1  ;;  %v2894_v41 = vor.u32 %v3025_v20, %v2893_v35  ;;  %v2988_v44 = vld [vmem:[%s4922_s3 + $0x14] sm:$0xf] }
  0xbe   : > { %3391 = vperm.xlu2 %3373, %v3842_v45  }
  0xbf   : > { %1859 = vmatpush.bf16.msra.mxu1 %v2894_v41 }
  0xc0   : > { %v4206_v61 = vpop.permute.xlu1 %3202  ;;  %2804 = vmatmul.msk.bf16.gmra.mxu0 %vm847_vm4, %v4141_v8 }
  0xc1   : > { %v3246_v45 = vpop.permute.xlu2 %3245  ;;  %2667 = vmatmul.msk.bf16.gmra.mxu2 %vm483_vm3, %v3930_v48  ;;  %v3000_v48 = vld [vmem:[%s4922_s3 + $0x74] sm:$0xf] }
  0xc2   : > { %2798 = vmatmul.msk.bf16.gmra.mxu3 %vm847_vm4, %v4201_v52  ;;  %v3247_v11 = vunpack.i.l.bf16 %v3246_v45  ;;  %v4221_v14 = vpop.permute.xlu0 %3197  ;;  %v591_v25 = vpop.f32.mrf.mxu3  ;;  %v2768_v12 = vor.u32 %v3000_v48, %v2765_v23  ;;  %v3248_v47 = vunpack.i.h.bf16 %v3246_v45  ;;  %v2717_v45 = vld [vmem:[%s4922_s3 + $0x28] sm:$0xf0] }
  0xc3   : > { %2811 = vmatmul.msk.bf16.gmra.mxu1 %vm847_vm4, %v4141_v8  ;;  %v547_v19 = vpop.f32.mrf.mxu2  ;;  %v529_v28 = vpop.f32.mrf.mxu0 }
  0xc4   : > { %v1260_v24 = vmul.f32 %v3171_v43, %v547_v19  ;;  %3395 = vset.pattern.permute.xlu1 %v4932_v2  ;;  %v1428_v26 = vmul.f32 %v3247_v11, %v591_v25  ;;  %v1253_v57 = vmul.f32 %v3150_v15, %v529_v28  ;;  %1115 = vmatpush.bf16.msra.mxu0 %v2768_v12  ;;  %v4257_v25 = vld [vmem:[%s3839_s23 + $0x30] sm:$0xff]  ;;  %s353_s23 = sand.u32 1, %s3639_s25  }
  0xc5   : > { %3397 = vperm.xlu1 %3395, %v3912_v36   ;;  %v573_v31 = vpop.f32.mrf.mxu1  ;;  %v2720_v19 = vor.u32 %v2988_v44, %v2717_v45  ;;  %s3049_s15 = smul.u32 112, %s353_s23  ;;  %s2452_s8 = scalar_lea.sflag [#allocation4], %s353_s23 }
  0xc6   : > { %3401 = vset.pattern.permute.xlu2 %v4929_v60  ;;  %v4235_v30 = vadd.f32 %v1428_v26, %v1260_v24 }
  0xc7   : > { %3403 = vperm.xlu2 %3401, %v3912_v36   ;;  %v2909_v36 = vld [vmem:[#allocation7 + $0x10] sm:$0xf]  ;;  %s4821_s17 = scalar_lea.vmem [#allocation10], %s3049_s15 }
  0xc8   : > { %v4237_v32 = vpop.permute.xlu1 %3212  ;;  %1116 = vmatpush.bf16.msra.mxu0 %v2744_v62  ;;  %s2464_s18 = sshll.u32 %s4821_s17, 4  ;;  %s2465_s18 = int_to_ptr.vmem [resolvable:$true] %s2464_s18 }
  0xca   : > { %v4246_v51 = vpop.permute.xlu2 %3261  ;;  %v593_v18 = vpop.f32.mrf.mxu3 }
  0xcb   : > { %5000 = vst [vmem:[#allocation22_spill] sm:$0xff] %v4246_v51  ;;  %v3224_v43 = vpop.permute.xlu0 %3223  ;;  %v549_v15 = vpop.f32.mrf.mxu2  ;;  %v1429_v23 = vmul.f32 %v3248_v47, %v593_v18  ;;  %v3155_v47 = vunpack.i.h.bf16 %v4155_v50 }
  0xcc   : > { %v3226_v63 = vunpack.i.h.bf16 %v3224_v43  ;;  %v3225_v11 = vunpack.i.l.bf16 %v3224_v43  ;;  %v1261_v27 = vmul.f32 %v3172_v39, %v549_v15  ;;  %v532_v24 = vpop.f32.mrf.mxu0  ;;  %1117 = vmatpush.bf16.msra.mxu0 %v2720_v19  ;;  %v2887_v39 = vld [vmem:[#allocation5 + $0x68] sm:$0xf0]  ;;  %v2877_v19 = vld [vmem:[#allocation5 + $0x50] sm:$0xf] }
  0xcd   : > { %3414 = vperm.xlu1 %3395, %v3914_v37   ;;  %v1254_v12 = vmul.f32 %v3154_v1, %v532_v24  ;;  %v2890_v41 = vor.u32 %v3022_v38, %v2887_v39  ;;  %v3177_v38 = vunpack.i.h.bf16 %v4102_v0 }
  0xce   : > { %v1421_v22 = vmul.f32 %v3226_v63, %v573_v31  ;;  %v1420_v48 = vmul.f32 %v3225_v11, %v571_v53  ;;  %v4264_v35 = vadd.f32 %v1429_v23, %v1261_v27  ;;  %v3176_v53 = vunpack.i.l.bf16 %v4102_v0 }
  0xcf   : > { %v576_v20 = vpop.f32.mrf.mxu1  ;;  %1904 = vmatpush.bf16.msrb.mxu2 %v2890_v41  ;;  %v3019_v41 = vld [vmem:[#allocation5 + $0x44] sm:$0xf0]  ;;  %3419 = vperm.xlu2 %3401, %v3914_v37  }
  0xd0   : > { %v4260_v26 = vadd.f32 %v1420_v48, %v4204_v54  ;;  %v4262_v28 = vadd.f32 %v1421_v22, %v1253_v57  ;;  %2805 = vmatmul.msk.bf16.gmra.mxu0 %vm847_vm4, %v4201_v52  ;;  %v2885_v57 = vld [vmem:[#allocation5 + $0x60] sm:$0xf]  ;;  %v3021_v22 = vld [vmem:[#allocation5 + $0x54] sm:$0xf0] }
  0xd1   : > { %v3230_v31 = vpop.permute.xlu1 %3229  ;;  %2668 = vmatmul.msk.bf16.gmra.mxu2 %vm483_vm3, %v4016_v34  ;;  %v2886_v43 = vor.u32 %v3023_v42, %v2885_v57  ;;  %v2878_v23 = vor.u32 %v3021_v22, %v2877_v19 }
  0xd2   : > { %2799 = vmatmul.msk.bf16.gmra.mxu3 %vm847_vm4, %v4257_v25  ;;  %v3231_v54 = vunpack.i.l.bf16 %v3230_v31  ;;  %v3232_v34 = vunpack.i.h.bf16 %v3230_v31  ;;  %v2869_v31 = vld [vmem:[#allocation5 + $0x40] sm:$0xf] }
  0xd3   : > { %v3251_v62 = vpop.permute.xlu0 %3250  ;;  %2812 = vmatmul.msk.bf16.gmra.mxu1 %vm847_vm4, %v4201_v52  ;;  %v4276_v1 = vpop.permute.xlu2 %3279 }
  0xd4   : > { %v1422_v63 = vmul.f32 %v3231_v54, %v576_v20  ;;  %v3252_v11 = vunpack.i.l.bf16 %v3251_v62  ;;  %v552_v15 = vpop.f32.mrf.mxu2  ;;  %v596_v45 = vpop.f32.mrf.mxu3  ;;  %1860 = vmatpush.bf16.msra.mxu1 %v2886_v43 }
  0xd5   : > { %v1262_v44 = vmul.f32 %v3176_v53, %v552_v15  ;;  %3423 = vset.pattern.permute.xlu1 %v3665_v7  ;;  %v534_v50 = vpop.f32.mrf.mxu0  ;;  %v3160_v7 = vunpack.i.l.bf16 %v4127_v10  ;;  %v3020_v15 = vld [vmem:[#allocation5 + $0x54] sm:$0xf] }
  0xd6   : > { %v4278_v27 = vadd.f32 %v1422_v63, %v1254_v12  ;;  %v1430_v18 = vmul.f32 %v3252_v11, %v596_v45  ;;  %v1255_v48 = vmul.f32 %v3155_v47, %v534_v50  ;;  %3425 = vperm.xlu1 %3423, %v3844_v46   ;;  %v3253_v12 = vunpack.i.h.bf16 %v3251_v62  ;;  %v2861_v62 = vld [vmem:[#allocation5 + $0x30] sm:$0xf] }
  0xd7   : > { %v578_v20 = vpop.f32.mrf.mxu1  ;;  %v2870_v46 = vor.u32 %v3019_v41, %v2869_v31  ;;  %v3237_v47 = vunpack.i.l.bf16 %v4187_v33 }
  0xd8   : > { %v4282_v24 = vadd.f32 %v1430_v18, %v1262_v44  ;;  %v1423_v39 = vmul.f32 %v3232_v34, %v578_v20  ;;  %1861 = vmatpush.bf16.msra.mxu1 %v2878_v23  ;;  %v2879_v34 = vld [vmem:[#allocation5 + $0x58] sm:$0xf0]  ;;  %v3017_v18 = vld [vmem:[#allocation5 + $0x34] sm:$0xf0]  ;;  %v3181_v20 = vunpack.i.l.bf16 %v4189_v9 }
  0xd9   : > { %v4285_v53 = vpop.permute.xlu1 %3240  ;;  %v2882_v45 = vor.u32 %v3020_v15, %v2879_v34  ;;  %v2862_v22 = vor.u32 %v3017_v18, %v2861_v62  ;;  %v3013_v15 = vld [vmem:[#allocation5 + $0x14] sm:$0xf0] }
  0xda   : > { %v4288_v54 = vadd.f32 %v1423_v39, %v1255_v48  ;;  %v3015_v39 = vld [vmem:[#allocation5 + $0x24] sm:$0xf0] }
  0xdb   : > { %v4290_v57 = vpop.permute.xlu2 %3289  ;;  %1905 = vmatpush.bf16.msrb.mxu2 %v2882_v45 }
  0xdc   : > { %v554_v42 = vpop.f32.mrf.mxu2  ;;  %v598_v63 = vpop.f32.mrf.mxu3  ;;  %1862 = vmatpush.bf16.msra.mxu1 %v2870_v46  ;;  %v3238_v46 = vunpack.i.h.bf16 %v4187_v33  ;;  %v3182_v33 = vunpack.i.h.bf16 %v4189_v9 }
  0xdd   : > { %v1263_v43 = vmul.f32 %v3177_v38, %v554_v42  ;;  %v1431_v0 = vmul.f32 %v3253_v12, %v598_v63  ;;  %v537_v11 = vpop.f32.mrf.mxu0  ;;  %v2853_v38 = vld [vmem:[#allocation5 + $0x20] sm:$0xf]  ;;  %v3161_v12 = vunpack.i.h.bf16 %v4127_v10 }
  0xde   : > { %v1256_v44 = vmul.f32 %v3160_v7, %v537_v11  ;;  %3442 = vperm.xlu1 %3423, %v3891_v13   ;;  %v2854_v7 = vor.u32 %v3015_v39, %v2853_v38  ;;  %v2845_v11 = vld [vmem:[#allocation5 + $0x10] sm:$0xf]  ;;  %v3242_v39 = vunpack.i.l.bf16 %v4285_v53 }
  0xdf   : > { %v4294_v50 = vadd.f32 %v1431_v0, %v1263_v43  ;;  %v581_v19 = vpop.f32.mrf.mxu1 }
  0xe0   : > { %v1424_v48 = vmul.f32 %v3237_v47, %v581_v19  ;;  %2806 = vmatmul.msk.bf16.gmra.mxu0 %vm847_vm4, %v4257_v25  ;;  %1863 = vmatpush.bf16.msra.mxu1 %v2862_v22  ;;  %v2837_v22 = vld [vmem:[#allocation5] sm:$0xf] }
  0xe1   : > { %v3256_v23 = vpop.permute.xlu1 %3255  ;;  %2814 = vmatmul.msk.bf16.vlgmr.msra.gmra.mxu2 %vm847_vm4, %v4041_v49 }
  0xe2   : > { %2821 = vmatmul.msk.bf16.vlgmr.msra.gmra.mxu3 %vm847_vm4, %v4041_v49  ;;  %v3257_v13 = vunpack.i.l.bf16 %v3256_v23  ;;  %v4304_v31 = vadd.f32 %v1424_v48, %v1256_v44  ;;  %v2846_v44 = vor.u32 %v3013_v15, %v2845_v11  ;;  %v3258_v18 = vunpack.i.h.bf16 %v3256_v23  ;;  %v3011_v48 = vld [vmem:[#allocation5 + $0x4] sm:$0xf0] }
  0xe3   : > { %2813 = vmatmul.msk.bf16.gmra.mxu1 %vm847_vm4, %v4257_v25  ;;  %v2838_v38 = vor.u32 %v3011_v48, %v2837_v22 }
  0xe4   : > { %v4308_v41 = vpop.permute.xlu2 %3307  ;;  %v557_v42 = vpop.f32.mrf.mxu2  ;;  %1864 = vmatpush.bf16.msra.mxu1 %v2854_v7 }
  0xe5   : > { %v601_v47 = vpop.f32.mrf.mxu3  ;;  %v1264_v43 = vmul.f32 %v3181_v20, %v557_v42  ;;  %v539_v0 = vpop.f32.mrf.mxu0  ;;  %v3165_v20 = vunpack.i.l.bf16 %v4143_v16  ;;  %v3018_v42 = vld [vmem:[#allocation5 + $0x44] sm:$0xf] }
  0xe6   : > { %v1432_v63 = vmul.f32 %v3257_v13, %v601_v47  ;;  %v1257_v34 = vmul.f32 %v3161_v12, %v539_v0  ;;  %3451 = vset.pattern.permute.xlu1 %v4929_v60 }
  0xe7   : > { %v583_v62 = vpop.f32.mrf.mxu1  ;;  %2271 = vperm.xlu1 %3451, %v1180_v56   ;;  %v2871_v56 = vld [vmem:[#allocation5 + $0x48] sm:$0xf0] }
  0xe8   : > { %v4312_v10 = vadd.f32 %v1432_v63, %v1264_v43  ;;  %v1425_v45 = vmul.f32 %v3238_v46, %v583_v62  ;;  %1865 = vmatpush.bf16.msra.mxu1 %v2846_v44  ;;  %v2874_v43 = vor.u32 %v3018_v42, %v2871_v56  ;;  %v3166_v62 = vunpack.i.h.bf16 %v4143_v16  ;;  %v2863_v42 = vld [vmem:[#allocation5 + $0x38] sm:$0xf0]  ;;  %v4347_v16 = vpop.permute.xlu0 %3267 }
  0xe9   : > { %5003 = vst [vmem:[#allocation25_spill] sm:$0xff] %v4347_v16 }
  0xea   : > { %v4317_v19 = vpop.permute.xlu1 %3273  ;;  %v4320_v13 = vadd.f32 %v1425_v45, %v1257_v34  ;;  %1906 = vmatpush.bf16.msrb.mxu2 %v2874_v43  ;;  %v3243_v45 = vunpack.i.h.bf16 %v4285_v53  ;;  %v4931_v53 = vunpack.i.l.bf16 %v4179_v29 }
  0xeb   : > { %5001 = vst [vmem:[#allocation23_spill] sm:$0xff] %v4317_v19 }
  0xec   : > { %v559_v12 = vpop.f32.mrf.mxu2  ;;  %1866 = vmatpush.bf16.msra.mxu1 %v2838_v38 }
  0xed   : > { %v603_v7 = vpop.f32.mrf.mxu3  ;;  %v1265_v46 = vmul.f32 %v3182_v33, %v559_v12  ;;  %v542_v9 = vpop.f32.mrf.mxu0 }
  0xee   : > { %v1433_v47 = vmul.f32 %v3258_v18, %v603_v7  ;;  %v4323_v23 = vpop.permute.xlu2 %3317  ;;  %v1258_v63 = vmul.f32 %v3165_v20, %v542_v9  ;;  %v3016_v7 = vld [vmem:[#allocation5 + $0x34] sm:$0xf] }
  0xef   : > { %v586_v11 = vpop.f32.mrf.mxu1  ;;  %v2866_v56 = vor.u32 %v3016_v7, %v2863_v42 }
  0xf0   : > { %v4325_v0 = vadd.f32 %v1433_v47, %v1265_v46  ;;  %v1426_v15 = vmul.f32 %v3242_v39, %v586_v11  ;;  %2828 = vmatmul.msk.bf16.vlgmr.msra.gmra.mxu0 %vm847_vm4, %v4041_v49  ;;  %v4930_v46 = vunpack.i.l.bf16 %v4246_v51 }
  0xf1   : > { %2815 = vmatmul.msk.bf16.gmra.mxu2 %vm847_vm4, %v4064_v55 }
  0xf2   : > { %2822 = vmatmul.msk.bf16.gmra.mxu3 %vm847_vm4, %v4064_v55  ;;  %v4333_v34 = vpop.permute.xlu1 %3284  ;;  %v4336_v44 = vadd.f32 %v1426_v15, %v1258_v63  ;;  %1907 = vmatpush.bf16.msrb.mxu2 %v2866_v56  ;;  %v4934_v15 = vunpack.i.h.bf16 %v4179_v29  ;;  %v4943_v56 = vunpack.i.h.bf16 %v4347_v16  ;;  %v4942_v29 = vunpack.i.l.bf16 %v4111_v6 }
  0xf4   : > { %v4339_v33 = vpop.f32.mrf.mxu2 }
  0xf5   : > { %v899_v18 = vpop.f32.mrf.mxu3  ;;  %v544_v22 = vpop.f32.mrf.mxu0 }
  0xf6   : > { %v4341_v48 = vpop.permute.xlu2 %3335  ;;  %v1259_v49 = vmul.f32 %v3166_v62, %v544_v22  ;;  %v1336_v62 = vmul.f32 %v4931_v53, %v899_v18  ;;  %v4938_v22 = vunpack.i.l.bf16 %v4347_v16 }
  0xf7   : > { %5002 = vst [vmem:[#allocation24_spill] sm:$0xff] %v4341_v48  ;;  %v588_v20 = vpop.f32.mrf.mxu1 }
  0xf8   : > { %v1427_v38 = vmul.f32 %v3243_v45, %v588_v20 }
  0xfa   : > { %v4343_v39 = vadd.f32 %v1427_v38, %v1259_v49  ;;  %v4939_v49 = vunpack.i.h.bf16 %v4246_v51  ;;  %v4370_v38 = vpop.permute.xlu0 %3295 }
  0xfb   : > { %v4345_v12 = vpop.permute.xlu1 %3301 }
  0xfc   : > { %v4351_v47 = vpop.f32.mrf.mxu2 }
  0xfd   : > { %v901_v9 = vpop.f32.mrf.mxu3  ;;  %v943_v43 = vpop.f32.mrf.mxu0 }
  0xfe   : > { %v1504_v45 = vmul.f32 %v4930_v46, %v943_v43  ;;  %v1337_v18 = vmul.f32 %v4934_v15, %v901_v9 }
  0xff   : > { %v4353_v63 = vpop.permute.xlu2 %3347  ;;  %v987_v11 = vpop.f32.mrf.mxu1 }
 0x100   : > { %5004 = vst [vmem:[#allocation26_spill] sm:$0xff] %v4353_v63  ;;  %2829 = vmatmul.msk.bf16.gmra.mxu0 %vm847_vm4, %v4064_v55  ;;  %v1518_v7 = vadd.f32 %v1504_v45, %v1336_v62  ;;  %v1700_v43 = vmul.f32 %v4938_v22, %v987_v11  ;;  %v3014_v62 = vld [vmem:[#allocation5 + $0x24] sm:$0xf]  ;;  %v2855_v45 = vld [vmem:[#allocation5 + $0x28] sm:$0xf0]  ;;  %v4941_v11 = vunpack.i.l.bf16 %v4317_v19 }
 0x101   : > { %2816 = vmatmul.msk.bf16.gmra.mxu2 %vm847_vm4, %v4080_v59  ;;  %v2858_v15 = vor.u32 %v3014_v62, %v2855_v45 }
 0x102   : > { %2823 = vmatmul.msk.bf16.gmra.mxu3 %vm847_vm4, %v4080_v59  ;;  %v1714_v63 = vadd.f32 %v1700_v43, %v1518_v7 }
 0x103   : > { %v4368_v20 = vpop.permute.xlu1 %3312  ;;  %1908 = vmatpush.bf16.msrb.mxu2 %v2858_v15  ;;  %v4967_v15 = vunpack.i.h.bf16 %v4317_v19 }
 0x104   : > { %v4374_v42 = vpop.f32.mrf.mxu2 }
 0x105   : > { %v904_v55 = vpop.f32.mrf.mxu3  ;;  %v945_v58 = vpop.f32.mrf.mxu0 }
 0x106   : > { %v1505_v60 = vmul.f32 %v4939_v49, %v945_v58 }
 0x107   : > { %v4381_v46 = vpop.permute.xlu2 %3363  ;;  %v989_v53 = vpop.f32.mrf.mxu1 }
 0x108   : > { %5005 = vst [vmem:[#allocation27_spill] sm:$0xff] %v4381_v46  ;;  %v1519_v2 = vadd.f32 %v1505_v60, %v1337_v18  ;;  %v1701_v9 = vmul.f32 %v4943_v56, %v989_v53  ;;  %v4392_v18 = vpop.permute.xlu0 %3323  ;;  %v4951_v53 = vunpack.i.l.bf16 %v4276_v1 }
 0x10a   : > { %v1715_v40 = vadd.f32 %v1701_v9, %v1519_v2  ;;  %v1338_v2 = vmul.f32 %v4942_v29, %v904_v55 }
 0x10c   : > { %v4387_v22 = vpop.permute.xlu1 %3329  ;;  %v4389_v58 = vpack.c.bf16 %v1715_v40, %v1714_v63  ;;  %v622_v49 = vpop.f32.mrf.mxu2  ;;  %v4952_v40 = vunpack.i.h.bf16 %v4111_v6 }
 0x10d   : > { %v906_v46 = vpop.f32.mrf.mxu3  ;;  %v948_v60 = vpop.f32.mrf.mxu0 }
 0x10e   : > { %1867 = vmatmul.bf16.vlgmr.msra.gmra.mxu1 %v4389_v58  ;;  %v1506_v7 = vmul.f32 %v4941_v11, %v948_v60  ;;  %v1339_v60 = vmul.f32 %v4952_v40, %v906_v46 }
 0x10f   : > { %v992_v43 = vpop.f32.mrf.mxu1 }
 0x110   : > { %v3376_v9 = vpop.permute.xlu2 %3375  ;;  %2830 = vmatmul.msk.bf16.gmra.mxu0 %vm847_vm4, %v4080_v59  ;;  %v1520_v55 = vadd.f32 %v1506_v7, %v1338_v2  ;;  %v1702_v62 = vmul.f32 %v4951_v53, %v992_v43  ;;  %v3012_v43 = vld [vmem:[#allocation5 + $0x14] sm:$0xf]  ;;  %v2847_v53 = vld [vmem:[#allocation5 + $0x18] sm:$0xf0] }
 0x111   : > { %2817 = vmatmul.msk.bf16.gmra.mxu2 %vm847_vm4, %v4109_v5  ;;  %v3377_v63 = vunpack.i.l.bf16 %v3376_v9  ;;  %v3378_v6 = vunpack.i.h.bf16 %v3376_v9  ;;  %v2850_v19 = vor.u32 %v3012_v43, %v2847_v53 }
 0x112   : > { %2824 = vmatmul.msk.bf16.gmra.mxu3 %vm847_vm4, %v4109_v5  ;;  %v1716_v17 = vadd.f32 %v1702_v62, %v1520_v55 }
 0x113   : > { %1909 = vmatpush.bf16.msrb.mxu2 %v2850_v19  ;;  %v4957_v19 = vunpack.i.l.bf16 %v4290_v57 }
 0x114   : > { %v625_v11 = vpop.f32.mrf.mxu2 }
 0x115   : > { %v909_v59 = vpop.f32.mrf.mxu3  ;;  %v1620_v29 = vmul.f32 %v3377_v63, %v625_v11  ;;  %v3342_v56 = vpop.permute.xlu1 %3341  ;;  %v5006_v11 = vunpack.i.h.bf16 %v4276_v1 }
 0x116   : > { %v950_v16 = vpop.f32.mrf.mxu0  ;;  %v3344_v51 = vunpack.i.h.bf16 %v3342_v56  ;;  %v3343_v4 = vunpack.i.l.bf16 %v3342_v56  ;;  %v4421_v56 = vpop.permute.xlu0 %3353 }
 0x117   : > { %v1507_v48 = vmul.f32 %v4967_v15, %v950_v16  ;;  %v4415_v2 = vadd.f32 %v1620_v29, %v4304_v31  ;;  %v994_v7 = vpop.f32.mrf.mxu1 }
 0x118   : > { %v1617_v45 = vmul.f32 %v3344_v51, %v4351_v47  ;;  %v1616_v46 = vmul.f32 %v3343_v4, %v4339_v33  ;;  %v1703_v63 = vmul.f32 %v5006_v11, %v994_v7  ;;  %v4963_v51 = vunpack.i.l.bf16 %v4221_v14  ;;  %v2839_v11 = vld [vmem:[#allocation5 + $0x8] sm:$0xf0] }
 0x119   : > { %v1521_v40 = vadd.f32 %v1507_v48, %v1339_v60  ;;  %v4962_v4 = vunpack.i.l.bf16 %v4333_v34 }
 0x11a   : > { %v4424_v16 = vadd.f32 %v1616_v46, %v4260_v26  ;;  %v4427_v29 = vadd.f32 %v1617_v45, %v4262_v28  ;;  %v3392_v26 = vpop.permute.xlu2 %3391  ;;  %v4958_v28 = vunpack.i.h.bf16 %v4221_v14  ;;  %v4960_v46 = vunpack.i.h.bf16 %v4333_v34 }
 0x11b   : > { %v1717_v31 = vadd.f32 %v1703_v63, %v1521_v40 }
 0x11c   : > { %v627_v33 = vpop.f32.mrf.mxu2 }
 0x11d   : > { %v911_v48 = vpop.f32.mrf.mxu3  ;;  %v4431_v47 = vpack.c.bf16 %v1717_v31, %v1716_v17  ;;  %v1621_v9 = vmul.f32 %v3378_v6, %v627_v33  ;;  %v3359_v55 = vpop.permute.xlu1 %3358  ;;  %v1340_v17 = vmul.f32 %v4963_v51, %v909_v59  ;;  %v4959_v31 = vunpack.i.h.bf16 %v4290_v57 }
 0x11e   : > { %v953_v62 = vpop.f32.mrf.mxu0  ;;  %v3361_v53 = vunpack.i.h.bf16 %v3359_v55  ;;  %v3360_v60 = vunpack.i.l.bf16 %v3359_v55  ;;  %v4457_v63 = vpop.permute.xlu0 %3381  ;;  %v1341_v33 = vmul.f32 %v4958_v28, %v911_v48 }
 0x11f   : > { %1872 = vmatmul.bf16.gmra.mxu1 %v4431_v47  ;;  %v4437_v40 = vadd.f32 %v1621_v9, %v4320_v13  ;;  %v1508_v43 = vmul.f32 %v4962_v4, %v953_v62  ;;  %v3393_v13 = vunpack.i.l.bf16 %v3392_v26 }
 0x120   : > { %v997_v45 = vpop.f32.mrf.mxu1  ;;  %v1619_v7 = vmul.f32 %v3361_v53, %v622_v49  ;;  %v1618_v6 = vmul.f32 %v3360_v60, %v4374_v42  ;;  %2831 = vmatmul.msk.bf16.gmra.mxu0 %vm847_vm4, %v4109_v5  ;;  %v3010_v42 = vld [vmem:[#allocation5 + $0x4] sm:$0xf] }
 0x121   : > { %2818 = vmatmul.msk.bf16.gmra.mxu2 %vm847_vm4, %v4141_v8  ;;  %v2842_v5 = vor.u32 %v3010_v42, %v2839_v11  ;;  %v1522_v9 = vadd.f32 %v1508_v43, %v1340_v17  ;;  %v1704_v55 = vmul.f32 %v4957_v19, %v997_v45  ;;  %v3394_v45 = vunpack.i.h.bf16 %v3392_v26 }
 0x122   : > { %2825 = vmatmul.msk.bf16.gmra.mxu3 %vm847_vm4, %v4141_v8  ;;  %v4452_v59 = vadd.f32 %v1618_v6, %v4278_v27  ;;  %v4455_v49 = vadd.f32 %v1619_v7, %v4288_v54  ;;  %v4964_v26 = vunpack.i.l.bf16 %v4206_v61 }
 0x123   : > { %1910 = vmatpush.bf16.msrb.mxu2 %v2842_v5  ;;  %v1718_v11 = vadd.f32 %v1704_v55, %v1522_v9  ;;  %v4966_v55 = vunpack.i.l.bf16 %v4345_v12 }
 0x124   : > { %v630_v62 = vpop.f32.mrf.mxu2 }
 0x125   : > { %v914_v27 = vpop.f32.mrf.mxu3  ;;  %v1622_v53 = vmul.f32 %v3393_v13, %v630_v62 }
 0x126   : > { %v955_v60 = vpop.f32.mrf.mxu0  ;;  %v4466_v7 = vpop.permute.xlu1 %3369 }
 0x127   : > { %v1509_v54 = vmul.f32 %v4960_v46, %v955_v60  ;;  %v4469_v6 = vadd.f32 %v1622_v53, %v4336_v44  ;;  %v4961_v60 = vunpack.i.l.bf16 %v4370_v38  ;;  %v3410_v53 = vpop.permute.xlu0 %3409 }
 0x128   : > { %v999_v42 = vpop.f32.mrf.mxu1 }
 0x129   : > { %5007 = vst [vmem:[#allocation28_spill] sm:$0xff] %v4469_v6  ;;  %v1523_v48 = vadd.f32 %v1509_v54, %v1341_v33  ;;  %v1705_v17 = vmul.f32 %v4959_v31, %v999_v42  ;;  %v4968_v54 = vunpack.i.h.bf16 %v4370_v38  ;;  %v4965_v42 = vunpack.i.h.bf16 %v4206_v61 }
 0x12b   : > { %v1719_v43 = vadd.f32 %v1705_v17, %v1523_v48 }
 0x12c   : > { %v632_v19 = vpop.f32.mrf.mxu2 }
 0x12d   : > { %v916_v13 = vpop.f32.mrf.mxu3  ;;  %v4473_v62 = vpack.c.bf16 %v1719_v43, %v1718_v11  ;;  %v1623_v5 = vmul.f32 %v3394_v45, %v632_v19  ;;  %v3411_v19 = vunpack.i.l.bf16 %v3410_v53  ;;  %v4969_v11 = vunpack.i.h.bf16 %v4345_v12 }
 0x12e   : > { %v958_v28 = vpop.f32.mrf.mxu0  ;;  %v4477_v44 = vpop.permute.xlu1 %3386 }
 0x12f   : > { %1877 = vmatmul.bf16.gmra.mxu1 %v4473_v62  ;;  %v4480_v33 = vadd.f32 %v1623_v5, %v4343_v39  ;;  %v1510_v39 = vmul.f32 %v4961_v60, %v958_v28  ;;  %v1343_v5 = vmul.f32 %v4965_v42, %v916_v13  ;;  %v3040_v42 = vld [vmem:[#allocation7 + $0x74] sm:$0xf] }
 0x130   : > { %v1002_v9 = vpop.f32.mrf.mxu1  ;;  %2832 = vmatmul.msk.bf16.gmra.mxu0 %vm847_vm4, %v4141_v8  ;;  %v1342_v8 = vmul.f32 %v4964_v26, %v914_v27 }
 0x131   : > { %5008 = vst [vmem:[#allocation29_spill] sm:$0xff] %v4480_v33  ;;  %2819 = vmatmul.msk.bf16.gmra.mxu2 %vm847_vm4, %v4201_v52  ;;  %v1706_v46 = vmul.f32 %v4966_v55, %v1002_v9 }
 0x132   : > { %2826 = vmatmul.msk.bf16.gmra.mxu3 %vm847_vm4, %v4201_v52  ;;  %v1524_v31 = vadd.f32 %v1510_v39, %v1342_v8  ;;  %v2957_v39 = vld [vmem:[#allocation7 + $0x70] sm:$0xf]  ;;  %v3041_v8 = vld [vmem:[#allocation7 + $0x74] sm:$0xf0] }
 0x134   : > { %v635_v48 = vpop.f32.mrf.mxu2  ;;  %v1720_v26 = vadd.f32 %v1706_v46, %v1524_v31 }
 0x135   : > { %v919_v17 = vpop.f32.mrf.mxu3  ;;  %v1624_v45 = vmul.f32 %v3411_v19, %v635_v48  ;;  %v3412_v48 = vunpack.i.h.bf16 %v3410_v53  ;;  %v2949_v53 = vld [vmem:[#allocation7 + $0x60] sm:$0xf] }
 0x136   : > { %v960_v43 = vpop.f32.mrf.mxu0 }
 0x137   : > { %v1511_v28 = vmul.f32 %v4968_v54, %v960_v43  ;;  %v4504_v60 = vadd.f32 %v1624_v45, %v4235_v30  ;;  %v4506_v51 = vpop.permute.xlu1 %3397  ;;  %v2958_v43 = vor.u32 %v3041_v8, %v2957_v39  ;;  %v2959_v30 = vld [vmem:[#allocation7 + $0x78] sm:$0xf0]  ;;  %v3037_v39 = vld [vmem:[#allocation7 + $0x54] sm:$0xf0]  ;;  %v3036_v8 = vld [vmem:[#allocation7 + $0x54] sm:$0xf] }
 0x138   : > { %v1004_v4 = vpop.f32.mrf.mxu1 }
 0x139   : > { %5009 = vst [vmem:[#allocation30_spill] sm:$0xff] %v4504_v60  ;;  %v1525_v27 = vadd.f32 %v1511_v28, %v1343_v5  ;;  %v1707_v19 = vmul.f32 %v4969_v11, %v1004_v4  ;;  %v2962_v60 = vor.u32 %v3040_v42, %v2959_v30  ;;  %v4970_v5 = vunpack.i.l.bf16 %v4308_v41  ;;  %2050 = vmatpush.bf16.msrb.mxu3 %v2958_v43  ;;  %v3038_v28 = vld [vmem:[#allocation7 + $0x64] sm:$0xf] }
 0x13b   : > { %v1721_v13 = vadd.f32 %v1707_v19, %v1525_v27  ;;  %2094 = vmatpush.bf16.msrb.mxu0 %v2962_v60  ;;  %v2951_v27 = vld [vmem:[#allocation7 + $0x68] sm:$0xf0]  ;;  %v4971_v19 = vunpack.i.l.bf16 %v4129_v21  ;;  %v4973_v60 = vunpack.i.l.bf16 %v4368_v20 }
 0x13c   : > { %v637_v9 = vpop.f32.mrf.mxu2 }
 0x13d   : > { %v921_v55 = vpop.f32.mrf.mxu3  ;;  %v4510_v15 = vpack.c.bf16 %v1721_v13, %v1720_v26  ;;  %v1625_v45 = vmul.f32 %v3412_v48, %v637_v9  ;;  %v3039_v26 = vld [vmem:[#allocation7 + $0x64] sm:$0xf0]  ;;  %v4975_v48 = vunpack.i.h.bf16 %v4308_v41  ;;  %v4972_v9 = vunpack.i.h.bf16 %v4129_v21 }
 0x13e   : > { %v963_v54 = vpop.f32.mrf.mxu0  ;;  %v2950_v42 = vor.u32 %v3039_v26, %v2949_v53  ;;  %v1344_v30 = vmul.f32 %v4971_v19, %v919_v17  ;;  %v2933_v17 = vld [vmem:[#allocation7 + $0x40] sm:$0xf]  ;;  %v3035_v19 = vld [vmem:[#allocation7 + $0x44] sm:$0xf0] }
 0x13f   : > { %1882 = vmatmul.bf16.gmra.mxu1 %v4510_v15  ;;  %v4515_v4 = vadd.f32 %v1625_v45, %v4264_v35  ;;  %v4517_v31 = vpop.permute.xlu1 %3414  ;;  %v2954_v35 = vor.u32 %v3038_v28, %v2951_v27  ;;  %v1512_v13 = vmul.f32 %v4970_v5, %v963_v54  ;;  %v2943_v28 = vld [vmem:[#allocation7 + $0x58] sm:$0xf0]  ;;  %v1345_v54 = vmul.f32 %v4972_v9, %v921_v55  ;;  %v2935_v55 = vld [vmem:[#allocation7 + $0x48] sm:$0xf0] }
 0x140   : > { %v1007_v46 = vpop.f32.mrf.mxu1  ;;  %5011 = vst [vmem:[#allocation32_spill] sm:$0xff] %v4517_v31  ;;  %2833 = vmatmul.msk.bf16.gmra.mxu0 %vm847_vm4, %v4201_v52  ;;  %2051 = vmatpush.bf16.msrb.mxu3 %v2950_v42  ;;  %v2941_v52 = vld [vmem:[#allocation7 + $0x50] sm:$0xf]  ;;  %v2946_v11 = vor.u32 %v3036_v8, %v2943_v28  ;;  %v2934_v33 = vor.u32 %v3035_v19, %v2933_v17  ;;  %v2363_v31 = vld [vmem:[#allocation8 + $0x78] sm:$0xff] }
 0x141   : > { %5010 = vst [vmem:[#allocation31_spill] sm:$0xff] %v4515_v4  ;;  %2820 = vmatmul.msk.bf16.gmra.mxu2 %vm847_vm4, %v4257_v25  ;;  %2095 = vmatpush.bf16.msrb.mxu0 %v2954_v35  ;;  %v2942_v26 = vor.u32 %v3037_v39, %v2941_v52  ;;  %v1526_v42 = vadd.f32 %v1512_v13, %v1344_v30  ;;  %v3034_v4 = vld [vmem:[#allocation7 + $0x44] sm:$0xf]  ;;  %v5012_v39 = vunpack.i.h.bf16 %v4368_v20  ;;  %v2927_v19 = vld [vmem:[#allocation7 + $0x38] sm:$0xf0] }
 0x142   : > { %2827 = vmatmul.msk.bf16.gmra.mxu3 %vm847_vm4, %v4257_v25  ;;  %v1708_v35 = vmul.f32 %v4973_v60, %v1007_v46  ;;  %v2938_v9 = vor.u32 %v3034_v4, %v2935_v55  ;;  %2364 = vmatpush.msrb.mxu1 %v2363_v31  ;;  %v3031_v31 = vld [vmem:[#allocation7 + $0x24] sm:$0xf0]  ;;  %v4984_v55 = vunpack.i.h.bf16 %v4323_v23 }
 0x144   : > { %v640_v45 = vpop.f32.mrf.mxu2  ;;  %2052 = vmatpush.bf16.msrb.mxu3 %v2942_v26  ;;  %v1722_v46 = vadd.f32 %v1708_v35, %v1526_v42  ;;  %v3033_v26 = vld [vmem:[#allocation7 + $0x34] sm:$0xf0] }
 0x145   : > { %v4534_v53 = vpop.f32.mrf.mxu3  ;;  %2096 = vmatpush.bf16.msrb.mxu0 %v2946_v11  ;;  %v2925_v11 = vld [vmem:[#allocation7 + $0x30] sm:$0xf] }
 0x146   : > { %v965_v27 = vpop.f32.mrf.mxu0 }
 0x147   : > { %v1513_v5 = vmul.f32 %v4975_v48, %v965_v27  ;;  %v3032_v48 = vld [vmem:[#allocation7 + $0x34] sm:$0xf] }
 0x148   : > { %v1009_v43 = vpop.f32.mrf.mxu1  ;;  %v3426_v28 = vpop.permute.xlu1 %3425  ;;  %2053 = vmatpush.bf16.msrb.mxu3 %v2934_v33  ;;  %v2930_v35 = vor.u32 %v3032_v48, %v2927_v19  ;;  %v2919_v48 = vld [vmem:[#allocation7 + $0x28] sm:$0xf0] }
 0x149   : > { %v1527_v52 = vadd.f32 %v1513_v5, %v1345_v54  ;;  %v1709_v8 = vmul.f32 %v5012_v39, %v1009_v43  ;;  %v3428_v13 = vunpack.i.h.bf16 %v3426_v28  ;;  %v3427_v30 = vunpack.i.l.bf16 %v3426_v28  ;;  %2097 = vmatpush.bf16.msrb.mxu0 %v2938_v9 }
 0x14a   : > { %v2926_v43 = vor.u32 %v3033_v26, %v2925_v11  ;;  %v3214_v28 = vunpack.i.l.bf16 %v4237_v32 }
 0x14b   : > { %v1723_v60 = vadd.f32 %v1709_v8, %v1527_v52  ;;  %v1626_v27 = vmul.f32 %v3427_v30, %v640_v45  ;;  %v3319_v45 = vunpack.i.l.bf16 %v4323_v23  ;;  %v3030_v52 = vld [vmem:[#allocation7 + $0x24] sm:$0xf] }
 0x14c   : > { %v642_v6 = vpop.f32.mrf.mxu2  ;;  %2054 = vmatpush.bf16.msrb.mxu3 %v2926_v43  ;;  %v2922_v8 = vor.u32 %v3030_v52, %v2919_v48  ;;  %v1346_v11 = vmul.f32 %v3214_v28, %v4534_v53 }
 0x14d   : > { %v926_v5 = vpop.f32.mrf.mxu3  ;;  %v4544_v54 = vpack.c.bf16 %v1723_v60, %v1722_v46  ;;  %v4547_v17 = vadd.f32 %v1626_v27, %v4282_v24  ;;  %v1627_v4 = vmul.f32 %v3428_v13, %v642_v6  ;;  %2098 = vmatpush.bf16.msrb.mxu0 %v2930_v35  ;;  %v2917_v60 = vld [vmem:[#allocation7 + $0x20] sm:$0xf]  ;;  %v4979_v13 = vunpack.i.l.bf16 %v4392_v18  ;;  %v3028_v46 = vld [vmem:[#allocation7 + $0x14] sm:$0xf] }
 0x14e   : > { %v968_v42 = vpop.f32.mrf.mxu0  ;;  %v2918_v6 = vor.u32 %v3031_v31, %v2917_v60  ;;  %v4978_v27 = vunpack.i.h.bf16 %v4392_v18 }
 0x14f   : > { %1887 = vmatmul.bf16.gmra.mxu1 %v4544_v54  ;;  %v4552_v33 = vadd.f32 %v1627_v4, %v4294_v50  ;;  %v2362_v50 = vld [vmem:[#allocation8 + $0x70] sm:$0xff]  ;;  %v1514_v30 = vmul.f32 %v3319_v45, %v968_v42  ;;  %v2911_v4 = vld [vmem:[#allocation7 + $0x18] sm:$0xf0] }
 0x150   : > { %v1012_v9 = vpop.f32.mrf.mxu1  ;;  %2834 = vmatmul.msk.bf16.gmra.mxu0 %vm847_vm4, %v4257_v25  ;;  %v3443_v24 = vpop.permute.xlu1 %3442  ;;  %2365 = vmatpush.msrb.mxu1 %v2362_v50  ;;  %v3029_v25 = vld [vmem:[#allocation7 + $0x14] sm:$0xf0]  ;;  %v2914_v60 = vor.u32 %v3028_v46, %v2911_v4  ;;  %v2901_v50 = vld [vmem:[#allocation7] sm:$0xf] }
 0x151   : > { %1911 = vmatmul.bf16.vlgmr.msrb.gmra.mxu2 %v4389_v58  ;;  %v3444_v39 = vunpack.i.l.bf16 %v3443_v24  ;;  %2055 = vmatpush.bf16.msrb.mxu3 %v2918_v6  ;;  %v3215_v58 = vunpack.i.h.bf16 %v4237_v32  ;;  %v2910_v19 = vor.u32 %v3029_v25, %v2909_v36  ;;  %v1528_v52 = vadd.f32 %v1514_v30, %v1346_v11  ;;  %v3026_v36 = vld [vmem:[#allocation7 + $0x4] sm:$0xf] }
 0x152   : > { %2099 = vmatpush.bf16.msrb.mxu0 %v2922_v8  ;;  %v1710_v6 = vmul.f32 %v4979_v13, %v1012_v9  ;;  %v2903_v9 = vld [vmem:[#allocation7 + $0x8] sm:$0xf0]  ;;  %v3445_v46 = vunpack.i.h.bf16 %v3443_v24 }
 0x153   : > { %v1347_v31 = vmul.f32 %v3215_v58, %v926_v5  ;;  %v2906_v11 = vor.u32 %v3026_v36, %v2903_v9 }
 0x154   : > { %v645_v26 = vpop.f32.mrf.mxu2 }
 0x155   : > { %v929_v43 = vpop.f32.mrf.mxu3  ;;  %v1628_v35 = vmul.f32 %v3444_v39, %v645_v26  ;;  %2056 = vmatpush.bf16.msrb.mxu3 %v2910_v19  ;;  %v3027_v39 = vld [vmem:[#allocation7 + $0x4] sm:$0xf0]  ;;  %v1724_v26 = vadd.f32 %v1710_v6, %v1528_v52  ;;  %v5013_v52 = vmov 67   ;;  %v2360_v6 = vld [vmem:[#allocation8 + $0x60] sm:$0xff] }
 0x156   : > { %v970_v42 = vpop.f32.mrf.mxu0  ;;  %2100 = vmatpush.bf16.msrb.mxu0 %v2914_v60  ;;  %v2902_v30 = vor.u32 %v3027_v39, %v2901_v50  ;;  %3429 = vset.pattern.permute.xlu2 %v5013_v52  ;;  %v5015_v39 = vld [vmem:[#allocation24_spill] sm:$0xff] }
 0x157   : > { %v1515_v48 = vmul.f32 %v4984_v55, %v970_v42  ;;  %v4575_v8 = vadd.f32 %v1628_v35, %v4312_v10  ;;  %v2361_v10 = vld [vmem:[#allocation8 + $0x68] sm:$0xff]  ;;  %3431 = vperm.xlu2 %3429, %v3956_v3   ;;  %v4981_v36 = vunpack.i.l.bf16 %v5015_v39 }
 0x158   : > { %v1014_v53 = vpop.f32.mrf.mxu1  ;;  %2366 = vmatpush.msrb.mxu1 %v2361_v10 }
 0x159   : > { %v1529_v25 = vadd.f32 %v1515_v48, %v1347_v31  ;;  %v1711_v5 = vmul.f32 %v4978_v27, %v1014_v53  ;;  %2057 = vmatpush.bf16.msrb.mxu3 %v2902_v30  ;;  %v4976_v48 = vunpack.i.l.bf16 %v4387_v22  ;;  %v5014_v53 = vld [vmem:[#allocation20_spill] sm:$0xff]  ;;  %v4980_v30 = vunpack.i.h.bf16 %v5015_v39 }
 0x15a   : > { %2101 = vmatpush.bf16.msrb.mxu0 %v2906_v11  ;;  %v4977_v50 = vunpack.i.l.bf16 %v5014_v53  ;;  %2367 = vmatpush.msrb.mxu1 %v2360_v6  ;;  %v2359_v6 = vld [vmem:[#allocation8 + $0x58] sm:$0xff] }
 0x15b   : > { %v1725_v4 = vadd.f32 %v1711_v5, %v1529_v25  ;;  %v4982_v25 = vunpack.i.h.bf16 %v4387_v22 }
 0x15c   : > { %v647_v19 = vpop.f32.mrf.mxu2  ;;  %v1348_v9 = vmul.f32 %v4977_v50, %v929_v43  ;;  %2368 = vmatpush.msrb.mxu1 %v2359_v6  ;;  %v5023_v6 = vld [vmem:[#allocation25_spill] sm:$0xff] }
 0x15d   : > { %v931_v35 = vpop.f32.mrf.mxu3  ;;  %v4580_v42 = vpack.c.bf16 %v1725_v4, %v1724_v26  ;;  %v1629_v60 = vmul.f32 %v3445_v46, %v647_v19 }
 0x15e   : > { %v973_v31 = vpop.f32.mrf.mxu0 }
 0x15f   : > { %1892 = vmatmul.bf16.gmra.mxu1 %v4580_v42  ;;  %v4585_v37 = vadd.f32 %v1629_v60, %v4325_v0  ;;  %v1516_v5 = vmul.f32 %v4976_v48, %v973_v31  ;;  %v4983_v0 = vunpack.i.h.bf16 %v5014_v53 }
 0x160   : > { %v1017_v24 = vpop.f32.mrf.mxu1 }
 0x161   : > { %1916 = vmatmul.bf16.gmra.mxu2 %v4431_v47  ;;  %v1349_v26 = vmul.f32 %v4983_v0, %v931_v35  ;;  %v1530_v4 = vadd.f32 %v1516_v5, %v1348_v9  ;;  %v1712_v10 = vmul.f32 %v4981_v36, %v1017_v24  ;;  %v2358_v24 = vld [vmem:[#allocation8 + $0x50] sm:$0xff]  ;;  %v5016_v5 = vld [vmem:[#allocation18_spill] sm:$0xff]  ;;  %v5017_v9 = vld [vmem:[#allocation21_spill] sm:$0xff]  ;;  %v5025_v0 = vunpack.i.h.bf16 %v5023_v6 }
 0x162   : > { %3447 = vperm.xlu2 %3429, %v5016_v5   ;;  %2369 = vmatpush.msrb.mxu1 %v2358_v24 }
 0x163   : > { %v1726_v43 = vadd.f32 %v1712_v10, %v1530_v4  ;;  %v5021_v10 = vunpack.i.h.bf16 %v5017_v9 }
 0x164   : > { %v1031_v47 = vpop.f32.mrf.mxu2 }
 0x165   : > { %v1075_v46 = vpop.f32.mrf.mxu3 }
 0x166   : > { %v975_v11 = vpop.f32.mrf.mxu0 }
 0x167   : > { %v1517_v19 = vmul.f32 %v4982_v25, %v975_v11  ;;  %v5018_v11 = vunpack.i.l.bf16 %v5017_v9  ;;  %v5026_v9 = vmov 68  }
 0x168   : > { %v1019_v60 = vpop.f32.mrf.mxu1 }
 0x169   : > { %v1531_v31 = vadd.f32 %v1517_v19, %v1349_v26  ;;  %v1713_v52 = vmul.f32 %v4980_v30, %v1019_v60  ;;  %v1350_v26 = vmul.f32 %v5018_v11, %v1031_v47  ;;  %v5019_v19 = vld [vmem:[#allocation22_spill] sm:$0xff] }
 0x16a   : > { %v5020_v60 = vunpack.i.l.bf16 %v5019_v19  ;;  %v2357_v11 = vld [vmem:[#allocation8 + $0x48] sm:$0xff]  ;;  %3452 = vset.pattern.permute.xlu2 %v5026_v9 }
 0x16b   : > { %v1727_v48 = vadd.f32 %v1713_v52, %v1531_v31  ;;  %2370 = vmatpush.msrb.mxu1 %v2357_v11 }
 0x16c   : > { %v1033_v50 = vpop.f32.mrf.mxu2  ;;  %v1532_v4 = vmul.f32 %v5020_v60, %v1075_v46 }
 0x16d   : > { %v1077_v27 = vpop.f32.mrf.mxu3  ;;  %v4607_v13 = vpack.c.bf16 %v1727_v48, %v1726_v43  ;;  %v1351_v31 = vmul.f32 %v5021_v10, %v1033_v50  ;;  %v5022_v48 = vunpack.i.h.bf16 %v5019_v19  ;;  %v5024_v43 = vunpack.i.l.bf16 %v5023_v6  ;;  %v5027_v50 = vld [vmem:[#allocation17_spill] sm:$0xff] }
 0x16e   : > { %v1119_v35 = vpop.f32.mrf.mxu0  ;;  %v5028_v19 = vunpack.c.h.bf16 %v5027_v50 }
 0x16f   : > { %1897 = vmatmul.bf16.gmra.mxu1 %v4607_v13  ;;  %v1533_v52 = vmul.f32 %v5022_v48, %v1077_v27  ;;  %v1728_v30 = vmul.f32 %v5024_v43, %v1119_v35 }
 0x170   : > { %2275 = vperm.xlu2 %3452, %v5028_v19  }
 0x171   : > { %1921 = vmatmul.bf16.gmra.mxu2 %v4473_v62  ;;  %v1546_v62 = vadd.f32 %v1532_v4, %v1350_v26  ;;  %v1547_v24 = vadd.f32 %v1533_v52, %v1351_v31  ;;  %v2356_v26 = vld [vmem:[#allocation8 + $0x40] sm:$0xff]  ;;  %v5031_v31 = vld [vmem:[#allocation23_spill] sm:$0xff] }
 0x172   : > { %2371 = vmatpush.msrb.mxu1 %v2356_v26  ;;  %v5032_v48 = vunpack.i.l.bf16 %v5031_v31  ;;  %v2354_v26 = vld [vmem:[#allocation8 + $0x30] sm:$0xff] }
 0x173   : > { %v1742_v55 = vadd.f32 %v1728_v30, %v1546_v62 }
 0x174   : > { %v1036_v36 = vpop.f32.mrf.mxu2 }
 0x175   : > { %v1080_v5 = vpop.f32.mrf.mxu3 }
 0x176   : > { %v1121_v25 = vpop.f32.mrf.mxu0  ;;  %v1534_v52 = vmul.f32 %v5032_v48, %v1080_v5  ;;  %v5039_v48 = vunpack.i.h.bf16 %v4221_v14 }
 0x177   : > { %v1729_v47 = vmul.f32 %v5025_v0, %v1121_v25  ;;  %v2355_v25 = vld [vmem:[#allocation8 + $0x38] sm:$0xff]  ;;  %v5029_v0 = vld [vmem:[#allocation19_spill] sm:$0xff] }
 0x178   : > { %v5030_v30 = vunpack.i.l.bf16 %v5029_v0  ;;  %v5033_v6 = vunpack.i.h.bf16 %v5029_v0  ;;  %2372 = vmatpush.msrb.mxu1 %v2355_v25  ;;  %v5037_v25 = vunpack.i.l.bf16 %v4221_v14 }
 0x179   : > { %v1743_v46 = vadd.f32 %v1729_v47, %v1547_v24  ;;  %v5035_v24 = vunpack.i.l.bf16 %v4276_v1 }
 0x17a   : > { %v1352_v4 = vmul.f32 %v5030_v30, %v1036_v36  ;;  %v5036_v36 = vunpack.i.h.bf16 %v4276_v1  ;;  %2373 = vmatpush.msrb.mxu1 %v2354_v26  ;;  %v5038_v1 = vunpack.i.l.bf16 %v4333_v34  ;;  %v5043_v26 = vunpack.i.l.bf16 %v4206_v61 }
 0x17b   : > { %v1947_v27 = vpack.c.bf16 %v1743_v46, %v1742_v55  ;;  %v5034_v55 = vunpack.i.h.bf16 %v5031_v31 }
 0x17c   : > { %v1038_v60 = vpop.f32.mrf.mxu2  ;;  %v1548_v9 = vadd.f32 %v1534_v52, %v1352_v4 }
 0x17d   : > { %v1082_v35 = vpop.f32.mrf.mxu3  ;;  %2058 = vmatmul.bf16.vlgmr.msrb.gmra.mxu3 %v1947_v27  ;;  %2102 = vmatmul.bf16.vlgmr.msrb.gmra.mxu0 %v1947_v27  ;;  %v1353_v43 = vmul.f32 %v5033_v6, %v1038_v60  ;;  %v5040_v6 = vunpack.i.h.bf16 %v4333_v34 }
 0x17e   : > { %v1124_v10 = vpop.f32.mrf.mxu0  ;;  %v1535_v62 = vmul.f32 %v5034_v55, %v1082_v35  ;;  %v5041_v55 = vunpack.i.l.bf16 %v4290_v57 }
 0x17f   : > { %v1730_v47 = vmul.f32 %v5035_v24, %v1124_v10  ;;  %v2353_v10 = vld [vmem:[#allocation8 + $0x28] sm:$0xff] }
 0x180   : > { %v1549_v50 = vadd.f32 %v1535_v62, %v1353_v43  ;;  %2374 = vmatpush.msrb.mxu1 %v2353_v10  ;;  %v5046_v10 = vunpack.i.h.bf16 %v4370_v38 }
 0x181   : > { %1926 = vmatmul.bf16.gmra.mxu2 %v4510_v15  ;;  %v1744_v27 = vadd.f32 %v1730_v47, %v1548_v9 }
 0x184   : > { %v1041_v11 = vpop.f32.mrf.mxu2 }
 0x185   : > { %v1085_v46 = vpop.f32.mrf.mxu3  ;;  %v1354_v4 = vmul.f32 %v5037_v25, %v1041_v11  ;;  %v5042_v11 = vunpack.i.h.bf16 %v4290_v57  ;;  %v5044_v57 = vunpack.i.l.bf16 %v4370_v38 }
 0x186   : > { %v1126_v15 = vpop.f32.mrf.mxu0  ;;  %v1536_v31 = vmul.f32 %v5038_v1, %v1085_v46 }
 0x187   : > { %v1731_v19 = vmul.f32 %v5036_v36, %v1126_v15  ;;  %v2352_v36 = vld [vmem:[#allocation8 + $0x20] sm:$0xff] }
 0x188   : > { %v1550_v47 = vadd.f32 %v1536_v31, %v1354_v4  ;;  %2375 = vmatpush.msrb.mxu1 %v2352_v36  ;;  %v5047_v4 = vunpack.i.l.bf16 %v4345_v12 }
 0x189   : > { %v1745_v5 = vadd.f32 %v1731_v19, %v1549_v50 }
 0x18b   : > { %v1948_v60 = vpack.c.bf16 %v1745_v5, %v1744_v27  ;;  %v2351_v5 = vld [vmem:[#allocation8 + $0x18] sm:$0xff] }
 0x18c   : > { %v1043_v0 = vpop.f32.mrf.mxu2  ;;  %2376 = vmatpush.msrb.mxu1 %v2351_v5 }
 0x18d   : > { %v1087_v30 = vpop.f32.mrf.mxu3  ;;  %2063 = vmatmul.bf16.gmra.mxu3 %v1948_v60  ;;  %2107 = vmatmul.bf16.gmra.mxu0 %v1948_v60  ;;  %v1355_v52 = vmul.f32 %v5039_v48, %v1043_v0 }
 0x18e   : > { %v1129_v35 = vpop.f32.mrf.mxu0  ;;  %v1537_v43 = vmul.f32 %v5040_v6, %v1087_v30  ;;  %v5045_v30 = vunpack.i.h.bf16 %v4206_v61 }
 0x18f   : > { %v1732_v62 = vmul.f32 %v5041_v55, %v1129_v35 }
 0x190   : > { %v1551_v15 = vadd.f32 %v1537_v43, %v1355_v52  ;;  %v5048_v43 = vunpack.i.h.bf16 %v4345_v12  ;;  %v5050_v12 = vunpack.i.l.bf16 %v4308_v41 }
 0x191   : > { %1931 = vmatmul.bf16.gmra.mxu2 %v4544_v54  ;;  %v1746_v50 = vadd.f32 %v1732_v62, %v1550_v47 }
 0x194   : > { %v1046_v3 = vpop.f32.mrf.mxu2 }
 0x195   : > { %v1090_v24 = vpop.f32.mrf.mxu3  ;;  %v1356_v60 = vmul.f32 %v5043_v26, %v1046_v3 }
 0x196   : > { %v1131_v54 = vpop.f32.mrf.mxu0  ;;  %v1538_v0 = vmul.f32 %v5044_v57, %v1090_v24  ;;  %v2350_v24 = vld [vmem:[#allocation8 + $0x10] sm:$0xff] }
 0x197   : > { %v1733_v9 = vmul.f32 %v5042_v11, %v1131_v54  ;;  %2377 = vmatpush.msrb.mxu1 %v2350_v24  ;;  %v5049_v11 = vunpack.i.l.bf16 %v4129_v21 }
 0x199   : > { %v1747_v46 = vadd.f32 %v1733_v9, %v1551_v15  ;;  %v2349_v15 = vld [vmem:[#allocation8 + $0x8] sm:$0xff] }
 0x19a   : > { %2378 = vmatpush.msrb.mxu1 %v2349_v15 }
 0x19b   : > { %v1949_v14 = vpack.c.bf16 %v1747_v46, %v1746_v50  ;;  %v5051_v46 = vunpack.i.h.bf16 %v4129_v21 }
 0x19c   : > { %v1048_v19 = vpop.f32.mrf.mxu2 }
 0x19d   : > { %v1092_v34 = vpop.f32.mrf.mxu3  ;;  %2068 = vmatmul.bf16.gmra.mxu3 %v1949_v14  ;;  %2112 = vmatmul.bf16.gmra.mxu0 %v1949_v14  ;;  %v1357_v35 = vmul.f32 %v5045_v30, %v1048_v19  ;;  %v5052_v14 = vunpack.i.h.bf16 %v4308_v41 }
 0x19e   : > { %v1134_v27 = vpop.f32.mrf.mxu0  ;;  %v1539_v25 = vmul.f32 %v5046_v10, %v1092_v34  ;;  %v5053_v34 = vunpack.i.l.bf16 %v4368_v20 }
 0x19f   : > { %v1734_v1 = vmul.f32 %v5047_v4, %v1134_v27  ;;  %v2348_v4 = vld [vmem:[#allocation8] sm:$0xff] }
 0x1a0   : > { %v1553_v6 = vadd.f32 %v1539_v25, %v1357_v35  ;;  %v1868_v35 = vpop.f32.mrf.mxu1  ;;  %2379 = vmatpush.msrb.mxu1 %v2348_v4 }
 0x1a1   : > { %1936 = vmatmul.bf16.gmra.mxu2 %v4580_v42  ;;  %v1552_v42 = vadd.f32 %v1538_v0, %v1356_v60  ;;  %v5054_v0 = vunpack.i.h.bf16 %v4368_v20 }
 0x1a3   : > { %v1748_v62 = vadd.f32 %v1734_v1, %v1552_v42 }
 0x1a4   : > { %v1051_v31 = vpop.f32.mrf.mxu2 }
 0x1a5   : > { %v1095_v48 = vpop.f32.mrf.mxu3  ;;  %v1358_v9 = vmul.f32 %v5049_v11, %v1051_v31 }
 0x1a6   : > { %v1136_v52 = vpop.f32.mrf.mxu0  ;;  %v1540_v50 = vmul.f32 %v5050_v12, %v1095_v48  ;;  %v5058_v12 = vld [vmem:[#allocation26_spill] sm:$0xff] }
 0x1a7   : > { %v1735_v55 = vmul.f32 %v5048_v43, %v1136_v52 }
 0x1a8   : > { %v1554_v57 = vadd.f32 %v1540_v50, %v1358_v9  ;;  %v1870_v48 = vpop.f32.mrf.mxu1  ;;  %v3349_v50 = vunpack.i.l.bf16 %v5058_v12 }
 0x1a9   : > { %v1749_v3 = vadd.f32 %v1735_v55, %v1553_v6  ;;  %v5055_v6 = vunpack.i.h.bf16 %v4323_v23  ;;  %v5056_v55 = vunpack.i.l.bf16 %v4392_v18 }
 0x1ab   : > { %v1950_v61 = vpack.c.bf16 %v1749_v3, %v1748_v62 }
 0x1ac   : > { %v1053_v54 = vpop.f32.mrf.mxu2 }
 0x1ad   : > { %v1097_v47 = vpop.f32.mrf.mxu3  ;;  %2073 = vmatmul.bf16.gmra.mxu3 %v1950_v61  ;;  %2117 = vmatmul.bf16.gmra.mxu0 %v1950_v61  ;;  %v1359_v36 = vmul.f32 %v5051_v46, %v1053_v54  ;;  %v3355_v46 = vunpack.i.l.bf16 %v4421_v56 }
 0x1ae   : > { %v1139_v38 = vpop.f32.mrf.mxu0  ;;  %v1541_v19 = vmul.f32 %v5052_v14, %v1097_v47 }
 0x1af   : > { %v1736_v27 = vmul.f32 %v5053_v34, %v1139_v38  ;;  %v5057_v38 = vunpack.i.h.bf16 %v4392_v18  ;;  %v5061_v34 = vunpack.i.h.bf16 %v5014_v53 }
 0x1b0   : > { %v1873_v9 = vpop.f32.mrf.mxu1 }
 0x1b1   : > { %1941 = vmatmul.bf16.gmra.mxu2 %v4607_v13  ;;  %v1555_v13 = vadd.f32 %v1541_v19, %v1359_v36  ;;  %v1750_v10 = vadd.f32 %v1736_v27, %v1554_v57  ;;  %v5059_v36 = vunpack.i.l.bf16 %v5014_v53  ;;  %v5060_v19 = vunpack.i.l.bf16 %v4387_v22 }
 0x1b2   : > { %v5064_v53 = vunpack.i.h.bf16 %v5015_v39 }
 0x1b4   : > { %v1056_v5 = vpop.f32.mrf.mxu2 }
 0x1b5   : > { %v1100_v26 = vpop.f32.mrf.mxu3  ;;  %v1360_v52 = vmul.f32 %v3214_v28, %v1056_v5  ;;  %v5062_v5 = vunpack.i.h.bf16 %v4387_v22 }
 0x1b6   : > { %v1141_v60 = vpop.f32.mrf.mxu0  ;;  %v1542_v42 = vmul.f32 %v3319_v45, %v1100_v26 }
 0x1b7   : > { %v1737_v30 = vmul.f32 %v5054_v0, %v1141_v60  ;;  %v5063_v60 = vunpack.i.l.bf16 %v5015_v39  ;;  %v2194_v0 = vmul.f32 %v3349_v50, %v1868_v35  ;;  %v3356_v35 = vunpack.i.h.bf16 %v4421_v56 }
 0x1b8   : > { %v1556_v54 = vadd.f32 %v1542_v42, %v1360_v52  ;;  %v3350_v52 = vunpack.i.h.bf16 %v5058_v12 }
 0x1b9   : > { %v1751_v25 = vadd.f32 %v1737_v30, %v1555_v13 }
 0x1bb   : > { %v1951_v21 = vpack.c.bf16 %v1751_v25, %v1750_v10  ;;  %v1875_v25 = vpop.f32.mrf.mxu1 }
 0x1bc   : > { %v1058_v1 = vpop.f32.mrf.mxu2 }
 0x1bd   : > { %v1102_v41 = vpop.f32.mrf.mxu3  ;;  %2078 = vmatmul.bf16.gmra.mxu3 %v1951_v21  ;;  %2122 = vmatmul.bf16.gmra.mxu0 %v1951_v21  ;;  %v1361_v20 = vmul.f32 %v3215_v58, %v1058_v1 }
 0x1be   : > { %v1144_v31 = vpop.f32.mrf.mxu0  ;;  %v1543_v43 = vmul.f32 %v5055_v6, %v1102_v41 }
 0x1bf   : > { %v1738_v62 = vmul.f32 %v5056_v55, %v1144_v31 }
 0x1c0   : > { %v1557_v47 = vadd.f32 %v1543_v43, %v1361_v20  ;;  %v2195_v43 = vmul.f32 %v3350_v52, %v1870_v48 }
 0x1c1   : > { %v1752_v15 = vadd.f32 %v1738_v62, %v1556_v54 }
 0x1c3   : > { %v1878_v62 = vpop.f32.mrf.mxu1 }
 0x1c4   : > { %v1061_v3 = vpop.f32.mrf.mxu2 }
 0x1c5   : > { %v1105_v24 = vpop.f32.mrf.mxu3  ;;  %v1362_v14 = vmul.f32 %v5059_v36, %v1061_v3  ;;  %v5065_v3 = vld [vmem:[#allocation27_spill] sm:$0xff] }
 0x1c6   : > { %v1146_v61 = vpop.f32.mrf.mxu0  ;;  %v1544_v18 = vmul.f32 %v5060_v19, %v1105_v24  ;;  %v3365_v24 = vunpack.i.l.bf16 %v5065_v3 }
 0x1c7   : > { %v1739_v28 = vmul.f32 %v5057_v38, %v1146_v61  ;;  %v3371_v61 = vunpack.i.l.bf16 %v4466_v7 }
 0x1c8   : > { %v1558_v4 = vadd.f32 %v1544_v18, %v1362_v14  ;;  %v3388_v14 = vunpack.i.l.bf16 %v4477_v44 }
 0x1c9   : > { %v1753_v11 = vadd.f32 %v1739_v28, %v1557_v47  ;;  %v2196_v47 = vmul.f32 %v3365_v24, %v1873_v9  ;;  %v3366_v28 = vunpack.i.h.bf16 %v5065_v3 }
 0x1cb   : > { %v1952_v45 = vpack.c.bf16 %v1753_v11, %v1752_v15  ;;  %v1880_v11 = vpop.f32.mrf.mxu1 }
 0x1cc   : > { %v1063_v32 = vpop.f32.mrf.mxu2 }
 0x1cd   : > { %2083 = vmatmul.bf16.gmra.mxu3 %v1952_v45  ;;  %2127 = vmatmul.bf16.gmra.mxu0 %v1952_v45  ;;  %v1107_v58 = vpop.f32.mrf.mxu3  ;;  %v1363_v27 = vmul.f32 %v5061_v34, %v1063_v32  ;;  %v3372_v45 = vunpack.i.h.bf16 %v4466_v7 }
 0x1ce   : > { %v1149_v23 = vpop.f32.mrf.mxu0  ;;  %v1545_v26 = vmul.f32 %v5062_v5, %v1107_v58  ;;  %v3383_v58 = vunpack.i.l.bf16 %v4457_v63  ;;  %v3384_v5 = vunpack.i.h.bf16 %v4457_v63 }
 0x1cf   : > { %v1740_v57 = vmul.f32 %v5063_v60, %v1149_v23  ;;  %v3389_v60 = vunpack.i.h.bf16 %v4477_v44 }
 0x1d0   : > { %v1559_v21 = vadd.f32 %v1545_v26, %v1363_v27  ;;  %v2198_v18 = vmul.f32 %v3383_v58, %v1878_v62  ;;  %v5067_v62 = vld [vmem:[#allocation32_spill] sm:$0xff] }
 0x1d1   : > { %v1754_v22 = vadd.f32 %v1740_v57, %v1558_v4  ;;  %v2199_v57 = vmul.f32 %v3384_v5, %v1880_v11 }
 0x1d4   : > { %v1912_v13 = vpop.f32.mrf.mxu2 }
 0x1d5   : > { %v2278_v30 = vmul.f32 %v3355_v46, %v1912_v13 }
 0x1d6   : > { %v1151_v10 = vpop.f32.mrf.mxu0 }
 0x1d7   : > { %v1741_v1 = vmul.f32 %v5064_v53, %v1151_v10  ;;  %v2292_v41 = vadd.f32 %v2278_v30, %v2194_v0  ;;  %v4745_v10 = vpop.permute.xlu2 %3403 }
 0x1d8   : > { %v3405_v4 = vunpack.i.l.bf16 %v4745_v10 }
 0x1d9   : > { %v1755_v31 = vadd.f32 %v1741_v1, %v1559_v21  ;;  %v2334_v42 = vmul.f32 %v2292_v41, %v4424_v16 }
 0x1db   : > { %v1953_v20 = vpack.c.bf16 %v1755_v31, %v1754_v22  ;;  %2380 = vmatmul.f32.vlgmr.msrb.gmra.mxu1 %v2334_v42  ;;  %v3400_v31 = vunpack.i.h.bf16 %v4506_v51  ;;  %v5066_v42 = vld [vmem:[#allocation28_spill] sm:$0xff] }
 0x1dc   : > { %v1914_v6 = vpop.f32.mrf.mxu2 }
 0x1dd   : > { %2088 = vmatmul.bf16.gmra.mxu3 %v1953_v20  ;;  %2132 = vmatmul.bf16.gmra.mxu0 %v1953_v20  ;;  %v2279_v39 = vmul.f32 %v3356_v35, %v1914_v6  ;;  %v3406_v6 = vunpack.i.h.bf16 %v4745_v10 }
 0x1df   : > { %v2293_v55 = vadd.f32 %v2279_v39, %v2195_v43 }
 0x1e1   : > { %v2335_v16 = vmul.f32 %v2293_v55, %v4427_v29  ;;  %v2197_v29 = vmul.f32 %v3366_v28, %v1875_v25  ;;  %v3399_v25 = vunpack.i.l.bf16 %v4506_v51 }
 0x1e3   : > { %2383 = vmatmul.f32.gmra.mxu1 %v2335_v16  ;;  %v3416_v16 = vunpack.i.l.bf16 %v5067_v62 }
 0x1e4   : > { %v1917_v54 = vpop.f32.mrf.mxu2 }
 0x1e5   : > { %v2280_v38 = vmul.f32 %v3371_v61, %v1917_v54  ;;  %v5068_v54 = vld [vmem:[#allocation29_spill] sm:$0xff] }
 0x1e7   : > { %v2294_v48 = vadd.f32 %v2280_v38, %v2196_v47  ;;  %v4763_v38 = vpop.permute.xlu2 %3419 }
 0x1e9   : > { %v2336_v15 = vmul.f32 %v2294_v48, %v4452_v59  ;;  %v1883_v59 = vpop.f32.mrf.mxu1 }
 0x1ea   : > { %v2200_v53 = vmul.f32 %v3399_v25, %v1883_v59 }
 0x1eb   : > { %2386 = vmatmul.f32.gmra.mxu1 %v2336_v15  ;;  %v3421_v15 = vunpack.i.l.bf16 %v4763_v38 }
 0x1ec   : > { %v1919_v32 = vpop.f32.mrf.mxu2 }
 0x1ed   : > { %v2281_v23 = vmul.f32 %v3372_v45, %v1919_v32 }
 0x1ef   : > { %v2295_v9 = vadd.f32 %v2281_v23, %v2197_v29 }
 0x1f1   : > { %v2337_v36 = vmul.f32 %v2295_v9, %v4455_v49  ;;  %v1885_v0 = vpop.f32.mrf.mxu1  ;;  %v3417_v9 = vunpack.i.h.bf16 %v5067_v62 }
 0x1f3   : > { %2389 = vmatmul.f32.gmra.mxu1 %v2337_v36  ;;  %v5069_v36 = vld [vmem:[#allocation30_spill] sm:$0xff] }
 0x1f4   : > { %v1922_v19 = vpop.f32.mrf.mxu2 }
 0x1f5   : > { %v2282_v34 = vmul.f32 %v3388_v14, %v1922_v19  ;;  %v3422_v19 = vunpack.i.h.bf16 %v4763_v38 }
 0x1f7   : > { %v2296_v27 = vadd.f32 %v2282_v34, %v2198_v18 }
 0x1f9   : > { %v2338_v26 = vmul.f32 %v2296_v27, %v4415_v2  ;;  %v1888_v22 = vpop.f32.mrf.mxu1 }
 0x1fa   : > { %v2202_v32 = vmul.f32 %v3416_v16, %v1888_v22 }
 0x1fb   : > { %2392 = vmatmul.f32.gmra.mxu1 %v2338_v26 }
 0x1fc   : > { %v1924_v49 = vpop.f32.mrf.mxu2 }
 0x1fd   : > { %v2283_v13 = vmul.f32 %v3389_v60, %v1924_v49  ;;  %v4777_v49 = vpop.permute.xlu2 %3431 }
 0x1ff   : > { %v2297_v30 = vadd.f32 %v2283_v13, %v2199_v57  ;;  %v4779_v57 = vpop.permute.xlu0 %3437 }
 0x201   : > { %v2339_v2 = vmul.f32 %v2297_v30, %v4437_v40  ;;  %v2201_v40 = vmul.f32 %v3400_v31, %v1885_v0  ;;  %v1890_v48 = vpop.f32.mrf.mxu1  ;;  %v3433_v0 = vunpack.i.l.bf16 %v4777_v49  ;;  %v3439_v30 = vunpack.i.l.bf16 %v4779_v57 }
 0x202   : > { %v2203_v27 = vmul.f32 %v3417_v9, %v1890_v48 }
 0x203   : > { %2395 = vmatmul.f32.gmra.mxu1 %v2339_v2  ;;  %v5070_v2 = vld [vmem:[#allocation31_spill] sm:$0xff] }
 0x204   : > { %v1927_v21 = vpop.f32.mrf.mxu2 }
 0x205   : > { %v2284_v1 = vmul.f32 %v3405_v4, %v1927_v21 }
 0x207   : > { %v2298_v41 = vadd.f32 %v2284_v1, %v2200_v53 }
 0x209   : > { %v2340_v20 = vmul.f32 %v2298_v41, %v5066_v42  ;;  %v1893_v18 = vpop.f32.mrf.mxu1 }
 0x20a   : > { %v2204_v1 = vmul.f32 %v3433_v0, %v1893_v18  ;;  %v2059_v18 = vpop.f32.mrf.mxu3 }
 0x20b   : > { %2398 = vmatmul.f32.gmra.mxu1 %v2340_v20  ;;  %v3434_v20 = vunpack.i.h.bf16 %v4777_v49 }
 0x20c   : > { %v1929_v43 = vpop.f32.mrf.mxu2 }
 0x20d   : > { %v2285_v39 = vmul.f32 %v3406_v6, %v1929_v43 }
 0x20f   : > { %v2299_v55 = vadd.f32 %v2285_v39, %v2201_v40  ;;  %v3440_v40 = vunpack.i.h.bf16 %v4779_v57 }
 0x211   : > { %v2341_v47 = vmul.f32 %v2299_v55, %v5068_v54  ;;  %v1895_v22 = vpop.f32.mrf.mxu1 }
 0x212   : > { %v2205_v55 = vmul.f32 %v3434_v20, %v1895_v22  ;;  %v2061_v22 = vpop.f32.mrf.mxu3 }
 0x213   : > { %2401 = vmatmul.f32.gmra.mxu1 %v2341_v47  ;;  %v4795_v47 = vpop.permute.xlu2 %3447 }
 0x214   : > { %v1932_v11 = vpop.f32.mrf.mxu2 }
 0x215   : > { %v2286_v29 = vmul.f32 %v3421_v15, %v1932_v11 }
 0x217   : > { %v2300_v23 = vadd.f32 %v2286_v29, %v2202_v32  ;;  %v3449_v32 = vunpack.i.l.bf16 %v4795_v47 }
 0x219   : > { %v2342_v59 = vmul.f32 %v2300_v23, %v5069_v36  ;;  %v1898_v11 = vpop.f32.mrf.mxu1  ;;  %v4799_v23 = vpop.permute.xlu1 %2271 }
 0x21a   : > { %v2206_v36 = vmul.f32 %v3449_v32, %v1898_v11 }
 0x21b   : > { %2404 = vmatmul.f32.gmra.mxu1 %v2342_v59 }
 0x21c   : > { %v1934_v34 = vpop.f32.mrf.mxu2 }
 0x21d   : > { %v2287_v26 = vmul.f32 %v3422_v19, %v1934_v34 }
 0x21f   : > { %v2301_v13 = vadd.f32 %v2287_v26, %v2203_v27  ;;  %v2103_v27 = vpop.f32.mrf.mxu0  ;;  %v3450_v26 = vunpack.i.h.bf16 %v4795_v47 }
 0x221   : > { %v2343_v21 = vmul.f32 %v2301_v13, %v5070_v2  ;;  %v1900_v2 = vpop.f32.mrf.mxu1 }
 0x223   : > { %2407 = vmatmul.f32.gmra.mxu1 %v2343_v21 }
 0x224   : > { %v1937_v53 = vpop.f32.mrf.mxu2 }
 0x225   : > { %v2288_v41 = vmul.f32 %v3439_v30, %v1937_v53  ;;  %v2207_v53 = vmul.f32 %v3450_v26, %v1900_v2 }
 0x227   : > { %v2302_v42 = vadd.f32 %v2288_v41, %v2204_v1 }
 0x229   : > { %v2344_v43 = vmul.f32 %v2302_v42, %v4547_v17 }
 0x22b   : > { %2410 = vmatmul.f32.gmra.mxu1 %v2344_v43  ;;  %v2105_v43 = vpop.f32.mrf.mxu0 }
 0x22c   : > { %v1939_v39 = vpop.f32.mrf.mxu2 }
 0x22d   : > { %v2289_v54 = vmul.f32 %v3440_v40, %v1939_v39  ;;  %v2064_v39 = vpop.f32.mrf.mxu3 }
 0x22f   : > { %v2303_v48 = vadd.f32 %v2289_v54, %v2205_v55 }
 0x231   : > { %v2345_v29 = vmul.f32 %v2303_v48, %v4552_v33  ;;  %v4806_v33 = vpop.permute.xlu2 %2275  ;;  %v2306_v48 = vmul.f32 %v3355_v46, %v2103_v27 }
 0x233   : > { %2413 = vmatmul.f32.gmra.mxu1 %v2345_v29  ;;  %v2108_v55 = vpop.f32.mrf.mxu0 }
 0x234   : > { %v1942_v17 = vpop.f32.mrf.mxu2  ;;  %v2308_v12 = vmul.f32 %v3371_v61, %v2108_v55 }
 0x235   : > { %v2290_v59 = vmul.f32 %v4799_v23, %v1942_v17  ;;  %v2066_v54 = vpop.f32.mrf.mxu3 }
 0x237   : > { %v2304_v34 = vadd.f32 %v2290_v59, %v2206_v36 }
 0x239   : > { %v2346_v13 = vmul.f32 %v2304_v34, %v4575_v8  ;;  %v2208_v8 = vmul.f32 %v3349_v50, %v2059_v18  ;;  %v2307_v50 = vmul.f32 %v3356_v35, %v2105_v43  ;;  %v2211_v35 = vmul.f32 %v3366_v28, %v2066_v54 }
 0x23b   : > { %2416 = vmatmul.f32.gmra.mxu1 %v2346_v13  ;;  %v2110_v11 = vpop.f32.mrf.mxu0  ;;  %v2320_v29 = vadd.f32 %v2306_v48, %v2208_v8  ;;  %v2210_v13 = vmul.f32 %v3365_v24, %v2064_v39 }
 0x23c   : > { %v1944_v21 = vpop.f32.mrf.mxu2 }
 0x23d   : > { %v2291_v1 = vmul.f32 %v4806_v33, %v1944_v21  ;;  %v2069_v59 = vpop.f32.mrf.mxu3 }
 0x23e   : > { %v2212_v61 = vmul.f32 %v3383_v58, %v2069_v59 }
 0x23f   : > { %v2305_v41 = vadd.f32 %v2291_v1, %v2207_v53  ;;  %v2309_v1 = vmul.f32 %v3372_v45, %v2110_v11 }
 0x241   : > { %v2347_v42 = vmul.f32 %v2305_v41, %v4585_v37  ;;  %v2209_v37 = vmul.f32 %v3350_v52, %v2061_v22  ;;  %v2322_v52 = vadd.f32 %v2308_v12, %v2210_v13  ;;  %v2323_v41 = vadd.f32 %v2309_v1, %v2211_v35 }
 0x243   : > { %2419 = vmatmul.f32.gmra.mxu1 %v2347_v42  ;;  %v2321_v18 = vadd.f32 %v2307_v50, %v2209_v37  ;;  %v2113_v34 = vpop.f32.mrf.mxu0 }
 0x244   : > { %v2310_v39 = vmul.f32 %v3388_v14, %v2113_v34 }
 0x245   : > { %v2071_v2 = vpop.f32.mrf.mxu3 }
 0x246   : > { %v2324_v3 = vadd.f32 %v2310_v39, %v2212_v61  ;;  %v2213_v7 = vmul.f32 %v3384_v5, %v2071_v2 }
 0x24b   : > { %v2115_v56 = vpop.f32.mrf.mxu0 }
 0x24c   : > { %v2311_v8 = vmul.f32 %v3389_v60, %v2115_v56 }
 0x24d   : > { %v2074_v42 = vpop.f32.mrf.mxu3 }
 0x24e   : > { %v2325_v58 = vadd.f32 %v2311_v8, %v2213_v7 }
 0x253   : > { %v2118_v43 = vpop.f32.mrf.mxu0 }
 0x254   : > { %v2312_v14 = vmul.f32 %v3405_v4, %v2118_v43 }
 0x255   : > { %v2076_v45 = vpop.f32.mrf.mxu3 }
 0x256   : > { %v2215_v44 = vmul.f32 %v3400_v31, %v2076_v45 }
 0x258   : > { %v2381_v17 = vpop.f32.mrf.mxu1 }
 0x259   : > { %v2423_v36 = vadd.f32 %v2381_v17, %v2320_v29  ;;  %v2214_v29 = vmul.f32 %v3399_v25, %v2074_v42 }
 0x25b   : > { %2437 = vst [vmem:[%s4821_s17] sm:$0xff] %v2423_v36  ;;  %v2120_v54 = vpop.f32.mrf.mxu0  ;;  %v2326_v5 = vadd.f32 %v2312_v14, %v2214_v29 }
 0x25c   : > { %v2313_v60 = vmul.f32 %v3406_v6, %v2120_v54 }
 0x25d   : > { %v2079_v63 = vpop.f32.mrf.mxu3 }
 0x25e   : > { %v2327_v50 = vadd.f32 %v2313_v60, %v2215_v44  ;;  %v2216_v4 = vmul.f32 %v3416_v16, %v2079_v63 }
 0x260   : > { %v2384_v46 = vpop.f32.mrf.mxu1 }
 0x261   : > { %v2424_v27 = vadd.f32 %v2384_v46, %v2321_v18 }
 0x263   : > { %2438 = vst [vmem:[%s4821_s17 + $0x8] sm:$0xff] %v2424_v27  ;;  %v2123_v17 = vpop.f32.mrf.mxu0 }
 0x264   : > { %v2314_v46 = vmul.f32 %v3421_v15, %v2123_v17 }
 0x265   : > { %v2081_v25 = vpop.f32.mrf.mxu3 }
 0x266   : > { %v2328_v51 = vadd.f32 %v2314_v46, %v2216_v4  ;;  %v2217_v10 = vmul.f32 %v3417_v9, %v2081_v25 }
 0x268   : > { %v2387_v21 = vpop.f32.mrf.mxu1 }
 0x269   : > { %v2425_v53 = vadd.f32 %v2387_v21, %v2322_v52 }
 0x26b   : > { %2439 = vst [vmem:[%s4821_s17 + $0x10] sm:$0xff] %v2425_v53  ;;  %v2125_v34 = vpop.f32.mrf.mxu0 }
 0x26c   : > { %v2315_v12 = vmul.f32 %v3422_v19, %v2125_v34 }
 0x26d   : > { %v2084_v13 = vpop.f32.mrf.mxu3 }
 0x26e   : > { %v2329_v52 = vadd.f32 %v2315_v12, %v2217_v10  ;;  %v2218_v21 = vmul.f32 %v3433_v0, %v2084_v13 }
 0x270   : > { %v2390_v24 = vpop.f32.mrf.mxu1 }
 0x271   : > { %v2426_v22 = vadd.f32 %v2390_v24, %v2323_v41 }
 0x273   : > { %2440 = vst [vmem:[%s4821_s17 + $0x18] sm:$0xff] %v2426_v22  ;;  %v2128_v6 = vpop.f32.mrf.mxu0 }
 0x274   : > { %v2316_v53 = vmul.f32 %v3439_v30, %v2128_v6 }
 0x275   : > { %v2086_v15 = vpop.f32.mrf.mxu3 }
 0x276   : > { %v2330_v9 = vadd.f32 %v2316_v53, %v2218_v21  ;;  %v2219_v38 = vmul.f32 %v3434_v20, %v2086_v15 }
 0x278   : > { %v2393_v55 = vpop.f32.mrf.mxu1 }
 0x279   : > { %v2427_v28 = vadd.f32 %v2393_v55, %v2324_v3 }
 0x27b   : > { %2441 = vst [vmem:[%s4821_s17 + $0x20] sm:$0xff] %v2427_v28  ;;  %v2130_v62 = vpop.f32.mrf.mxu0 }
 0x27c   : > { %v2317_v19 = vmul.f32 %v3440_v40, %v2130_v62 }
 0x27d   : > { %v2089_v1 = vpop.f32.mrf.mxu3 }
 0x27e   : > { %v2331_v0 = vadd.f32 %v2317_v19, %v2219_v38  ;;  %v2220_v30 = vmul.f32 %v3449_v32, %v2089_v1 }
 0x280   : > { %v2396_v48 = vpop.f32.mrf.mxu1 }
 0x281   : > { %v2428_v11 = vadd.f32 %v2396_v48, %v2325_v58 }
 0x283   : > { %2442 = vst [vmem:[%s4821_s17 + $0x28] sm:$0xff] %v2428_v11  ;;  %v2133_v41 = vpop.f32.mrf.mxu0 }
 0x284   : > { %v2318_v42 = vmul.f32 %v4799_v23, %v2133_v41 }
 0x285   : > { %v2091_v20 = vpop.f32.mrf.mxu3 }
 0x286   : > { %v2332_v49 = vadd.f32 %v2318_v42, %v2220_v30  ;;  %v2221_v43 = vmul.f32 %v3450_v26, %v2091_v20 }
 0x288   : > { %v2399_v36 = vpop.f32.mrf.mxu1 }
 0x289   : > { %v2429_v37 = vadd.f32 %v2399_v36, %v2326_v5 }
 0x28b   : > { %2443 = vst [vmem:[%s4821_s17 + $0x30] sm:$0xff] %v2429_v37  ;;  %v2135_v61 = vpop.f32.mrf.mxu0 }
 0x28c   : > { %v2319_v32 = vmul.f32 %v4806_v33, %v2135_v61 }
 0x28e   : > { %v2333_v23 = vadd.f32 %v2319_v32, %v2221_v43 }
 0x290   : > { %v2402_v59 = vpop.f32.mrf.mxu1 }
 0x291   : > { %v2430_v18 = vadd.f32 %v2402_v59, %v2327_v50 }
 0x293   : > { %2444 = vst [vmem:[%s4821_s17 + $0x38] sm:$0xff] %v2430_v18 }
 0x298   : > { %v2405_v31 = vpop.f32.mrf.mxu1 }
 0x299   : > { %v2431_v27 = vadd.f32 %v2405_v31, %v2328_v51 }
 0x29b   : > { %2445 = vst [vmem:[%s4821_s17 + $0x40] sm:$0xff] %v2431_v27 }
 0x2a0   : > { %v2408_v2 = vpop.f32.mrf.mxu1 }
 0x2a1   : > { %v2432_v16 = vadd.f32 %v2408_v2, %v2329_v52 }
 0x2a3   : > { %2446 = vst [vmem:[%s4821_s17 + $0x48] sm:$0xff] %v2432_v16 }
 0x2a8   : > { %v2411_v56 = vpop.f32.mrf.mxu1 }
 0x2a9   : > { %v2433_v35 = vadd.f32 %v2411_v56, %v2330_v9 }
 0x2ab   : > { %2447 = vst [vmem:[%s4821_s17 + $0x50] sm:$0xff] %v2433_v35 }
 0x2b0   : > { %v2414_v24 = vpop.f32.mrf.mxu1 }
 0x2b1   : > { %v2434_v22 = vadd.f32 %v2414_v24, %v2331_v0 }
 0x2b3   : > { %2448 = vst [vmem:[%s4821_s17 + $0x58] sm:$0xff] %v2434_v22 }
 0x2b8   : > { %v2417_v57 = vpop.f32.mrf.mxu1 }
 0x2b9   : > { %v2435_v40 = vadd.f32 %v2417_v57, %v2332_v49 }
 0x2bb   : > { %2449 = vst [vmem:[%s4821_s17 + $0x60] sm:$0xff] %v2435_v40 }
 0x2c0   : > { %v2420_v39 = vpop.f32.mrf.mxu1 }
 0x2c1   : > { %v2436_v3 = vadd.f32 %v2420_v39, %v2333_v23 }
 0x2c3   : > { %2450 = vst [vmem:[%s4821_s17 + $0x68] sm:$0xff] %v2436_v3 }
 0x2c4   : > { %3600 = shalt.err (!%p3597_p8)
}
 0x2c5   : > { %s3666_s9 = smov 128   ;;  %s3667_s14 = smov 8  }
 0x2c6   : > { %3066 = dma.vmem_to_hbm [thread:$0]  (%p3746_p5), %s2465_s18, 1792, %s2467_s28, %s2452_s8, %s3666_s9, %s3666_s9, %s3667_s14  }
 0x2c7 PF: > { %p3093_p9 = scmp.ge.s32.totalorder %s3647_s27, 2  ;;  %s2481_s23 = sand.u32 1, %s3635_s24  }
 0x2c8   : > { %s2482_s15 = scalar_lea.sflag [#allocation4], %s2481_s23 }
 0x2c9   : > { %p3082_p10 = pnand %p3093_p9, %p3750_p6 }
 0x2cb   : > { %p3083_p11 = pneg %p3082_p10 }
 0x2cd   : > { %3630 = dma.done.wait (%p3083_p11), %s2482_s15, 1792  }
 0x2ce   : > { %3632 = vsyncadd (%p3083_p11), %s2482_s15, 4294965504  ;;  %s5071_s17 = sld [smem:[#allocation15_spill]]  ;;  %p20_p12 = scmp.ge.s32.totalorder %s3733_s30, 4  }
 0x2cf   : > { %s5072_s26 = sld [smem:[#allocation16_spill]]  ;;  %s5073_s24 = smov %s3639_s25 }
 0x2d0   : > { %s5075_s27 = smov %s3733_s30  ;;  %22 = sbr.rel (!%p20_p12) target bundleno = 9 (0x9), region = 103 }
 0x2d4   : > { %s5074_s25 = smov %s5071_s17 }
 0x2d5   :  { %2488 = vsyncpa [#allocation3], 1 }
 0x2d6   :  { %2490 = vsyncpa [#allocation3 + $0x1], 1 }
 0x2d7   :  { %2491 = vsyncpa [#allocation6], 1 }
 0x2d8   :  { %2492 = vsyncpa [#allocation9], 1 }
 0x2d9   :  { %2493 = vsyncpa [#allocation4], 1 }
 0x2da   :  { %2495 = vsyncpa [#allocation4 + $0x1], 1 }

</bundles_post_ra>
